<compile_context>
chip_gen: v5e
topology: v5e:2x2
jax: 0.10.0
libtpu: 0.0.40
codegen_flags: <defaults>
</compile_context>

<pallas_src>
import jax
import jax.numpy as jnp
import numpy as np
from jax import lax
from jax.experimental import pallas as pl
from jax.experimental.pallas import tpu as pltpu

DROP_RATE = 0.2       # training-only; disabled at inference
HIDDEN_SIZE = 32
INPUT_SIZE = 49
LAYERS = 4
NUM_LABEL = 3

_B_TILE = 8           # sublane-aligned batch tile
_OUT_PAD = 128        # lane-dense output width (sliced back to NUM_LABEL outside)


def _lstm_kernel(x_ref,
                 wih0, whh0, b0,
                 wih1, whh1, b1,
                 wih2, whh2, b2,
                 wih3, whh3, b3,
                 w_out, b_out,
                 out_ref,
                 buf_a, buf_b, pregates):
    """Full 4-layer LSTM + output projection for one batch tile.

    x_ref   : (T, Bt, INPUT_SIZE)  f32, VMEM
    wihK    : (in_dim_K, 4H)  whhK: (H, 4H)  bK: (1, 4H)   gate order i,f,g,o
    w_out   : (H, _OUT_PAD)   b_out: (1, _OUT_PAD)  (zero-padded past NUM_LABEL)
    out_ref : (T, Bt, _OUT_PAD)
    buf_a/buf_b : (T, Bt, H)  per-layer hidden-sequence ping-pong scratch
    pregates    : (T, Bt, 4H) hoisted x @ W_ih + b scratch (reused per layer)
    """
    T = x_ref.shape[0]
    Bt = x_ref.shape[1]
    H = HIDDEN_SIZE

    def run_layer(seq_2d, out_buf, wih_ref, whh_ref, b_ref):
        # Hoisted input-to-hidden: ONE (T*Bt, in_dim) @ (in_dim, 4H) matmul
        # (+ bias folded in) instead of T tiny matmuls on the serial path.
        pre = (jnp.dot(seq_2d, wih_ref[...], preferred_element_type=jnp.float32)
               + b_ref[...])                                    # (T*Bt, 4H)
        pregates[...] = pre.reshape(T, Bt, 4 * H)

        whh = whh_ref[...]                                      # (H, 4H)

        def step(t, carry):
            h, c = carry
            gates = pregates[t] + jnp.dot(h, whh,
                                          preferred_element_type=jnp.float32)
            # Full-tile activations (one EUP pass each), then lane slices.
            sig = jax.nn.sigmoid(gates)
            tah = jnp.tanh(gates)
            i = sig[:, 0 * H:1 * H]
            f = sig[:, 1 * H:2 * H]
            g = tah[:, 2 * H:3 * H]
            o = sig[:, 3 * H:4 * H]
            c_new = f * c + i * g
            h_new = o * jnp.tanh(c_new)
            out_buf[t] = h_new
            return h_new, c_new

        h0 = jnp.zeros((Bt, H), jnp.float32)
        c0 = jnp.zeros((Bt, H), jnp.float32)
        # Fully unrolled recurrence (T is static) for scheduler visibility.
        lax.fori_loop(0, T, step, (h0, c0), unroll=True)

    # TODO(synk): PyTorch applies dropout(p=0.2) between LSTM layers in
    # training mode only; inference forward pass has no dropout, so it is
    # intentionally omitted here.

    # layer 0: x     -> buf_a
    run_layer(x_ref[...].reshape(T * Bt, INPUT_SIZE), buf_a, wih0, whh0, b0)
    # layer 1: buf_a -> buf_b
    run_layer(buf_a[...].reshape(T * Bt, H), buf_b, wih1, whh1, b1)
    # layer 2: buf_b -> buf_a
    run_layer(buf_b[...].reshape(T * Bt, H), buf_a, wih2, whh2, b2)
    # layer 3: buf_a -> buf_b
    run_layer(buf_a[...].reshape(T * Bt, H), buf_b, wih3, whh3, b3)

    # Final Linear projection: one bulk matmul + one lane-dense store.
    h_all = buf_b[...].reshape(T * Bt, H)
    proj = (jnp.dot(h_all, w_out[...], preferred_element_type=jnp.float32)
            + b_out[...])                                       # (T*Bt, 128)
    out_ref[...] = proj.reshape(T, Bt, out_ref.shape[2])


def lstm_forward(x, params):
    """x: (B, T, INPUT_SIZE) float32 -> (B, T, NUM_LABEL) float32."""
    B, T, _ = x.shape
    H = HIDDEN_SIZE
    B_pad = ((B + _B_TILE - 1) // _B_TILE) * _B_TILE

    xt = jnp.transpose(x, (1, 0, 2))                 # time-major (T, B, IN)
    if B_pad != B:
        xt = jnp.pad(xt, ((0, 0), (0, B_pad - B), (0, 0)))

    # Pad the output projection to 128 lanes -> unmasked, lane-dense stores.
    w_out_p = jnp.zeros((H, _OUT_PAD), jnp.float32).at[:, :NUM_LABEL].set(
        params["w_out"])
    b_out_p = jnp.zeros((1, _OUT_PAD), jnp.float32).at[:, :NUM_LABEL].set(
        params["b_out"])

    weight_args, weight_specs = [], []
    for l in range(LAYERS):
        for name in (f"wih{l}", f"whh{l}", f"b{l}"):
            w = params[name]
            weight_args.append(w)
            weight_specs.append(pl.BlockSpec(w.shape, lambda j: (0, 0)))
    for w in (w_out_p, b_out_p):
        weight_args.append(w)
        weight_specs.append(pl.BlockSpec(w.shape, lambda j: (0, 0)))

    grid = (B_pad // _B_TILE,)

    out_tm = pl.pallas_call(
        _lstm_kernel,
        out_shape=jax.ShapeDtypeStruct((T, B_pad, _OUT_PAD), jnp.float32),
        grid=grid,
        in_specs=[pl.BlockSpec((T, _B_TILE, INPUT_SIZE), lambda j: (0, j, 0))]
                 + weight_specs,
        out_specs=pl.BlockSpec((T, _B_TILE, _OUT_PAD), lambda j: (0, j, 0)),
        scratch_shapes=[
            pltpu.VMEM((T, _B_TILE, H), jnp.float32),
            pltpu.VMEM((T, _B_TILE, H), jnp.float32),
            pltpu.VMEM((T, _B_TILE, 4 * H), jnp.float32),
        ],
        compiler_params=pltpu.CompilerParams(
            dimension_semantics=("parallel",),          # batch tiles -> both TCs (v7x)
            vmem_limit_bytes=32 * 1024 * 1024),
    )(xt, *weight_args)

    out = out_tm[:, :B, :NUM_LABEL]                    # drop batch/lane padding
    return jnp.transpose(out, (1, 0, 2))               # back to (B, T, NUM_LABEL)


def init_params(key):
    """Deterministic init matching PyTorch LSTM/Linear shapes (uniform(-k, k))."""
    params = {}
    H = HIDDEN_SIZE
    k_lstm = 1.0 / np.sqrt(H)
    for l in range(LAYERS):
        in_dim = INPUT_SIZE if l == 0 else H
        key, k1, k2, k3, k4 = jax.random.split(key, 5)
        # stored transposed: (in_dim, 4H) and (H, 4H); gate order i,f,g,o
        params[f"wih{l}"] = jax.random.uniform(
            k1, (in_dim, 4 * H), jnp.float32, -k_lstm, k_lstm)
        params[f"whh{l}"] = jax.random.uniform(
            k2, (H, 4 * H), jnp.float32, -k_lstm, k_lstm)
        b_ih = jax.random.uniform(k3, (1, 4 * H), jnp.float32, -k_lstm, k_lstm)
        b_hh = jax.random.uniform(k4, (1, 4 * H), jnp.float32, -k_lstm, k_lstm)
        params[f"b{l}"] = b_ih + b_hh
    key, k1, k2 = jax.random.split(key, 3)
    k_lin = 1.0 / np.sqrt(H)
    params["w_out"] = jax.random.uniform(
        k1, (H, NUM_LABEL), jnp.float32, -k_lin, k_lin)
    params["b_out"] = jax.random.uniform(
        k2, (1, NUM_LABEL), jnp.float32, -k_lin, k_lin)
    return params


def lstm_forward_ref(x, params):
    """Pure-JAX reference of the same forward pass (for validation)."""
    B, T, _ = x.shape
    H = HIDDEN_SIZE
    layer_in = x
    for l in range(LAYERS):
        wih, whh, b = params[f"wih{l}"], params[f"whh{l}"], params[f"b{l}"]
        h = jnp.zeros((B, H), jnp.float32)
        c = jnp.zeros((B, H), jnp.float32)
        outs = []
        for t in range(T):
            gates = layer_in[:, t, :] @ wih + h @ whh + b
            i = jax.nn.sigmoid(gates[:, 0 * H:1 * H])
            f = jax.nn.sigmoid(gates[:, 1 * H:2 * H])
            g = jnp.tanh(gates[:, 2 * H:3 * H])
            o = jax.nn.sigmoid(gates[:, 3 * H:4 * H])
            c = f * c + i * g
            h = o * jnp.tanh(c)
            outs.append(h)
        layer_in = jnp.stack(outs, axis=1)
    return layer_in @ params["w_out"] + params["b_out"]


if __name__ == "__main__":
    B, T = 2, 8
    key = jax.random.PRNGKey(0)
    key, xkey = jax.random.split(key)
    x = jax.random.normal(xkey, (B, T, INPUT_SIZE), jnp.float32)
    params = init_params(key)

    out = lstm_forward(x, params)
    out = jax.block_until_ready(out)

    ref = jax.block_until_ready(lstm_forward_ref(x, params))
    np.testing.assert_allclose(np.asarray(out), np.asarray(ref),
                               rtol=2e-2, atol=2e-2)
    assert out.shape == (B, T, NUM_LABEL)
    print("KERNEL_OK")
</pallas_src>

<mosaic_0001>
module attributes {stable_mosaic.version = 11 : i64} {
  func.func @_lstm_kernel(%arg0: i32, %arg1: memref<8x8x49xf32, #tpu.memory_space<vmem>>, %arg2: memref<49x128xf32, #tpu.memory_space<vmem>>, %arg3: memref<32x128xf32, #tpu.memory_space<vmem>>, %arg4: memref<1x128xf32, #tpu.memory_space<vmem>>, %arg5: memref<32x128xf32, #tpu.memory_space<vmem>>, %arg6: memref<32x128xf32, #tpu.memory_space<vmem>>, %arg7: memref<1x128xf32, #tpu.memory_space<vmem>>, %arg8: memref<32x128xf32, #tpu.memory_space<vmem>>, %arg9: memref<32x128xf32, #tpu.memory_space<vmem>>, %arg10: memref<1x128xf32, #tpu.memory_space<vmem>>, %arg11: memref<32x128xf32, #tpu.memory_space<vmem>>, %arg12: memref<32x128xf32, #tpu.memory_space<vmem>>, %arg13: memref<1x128xf32, #tpu.memory_space<vmem>>, %arg14: memref<32x128xf32, #tpu.memory_space<vmem>>, %arg15: memref<1x128xf32, #tpu.memory_space<vmem>>, %arg16: memref<8x8x128xf32, #tpu.memory_space<vmem>>, %arg17: memref<8x8x32xf32, #tpu.memory_space<vmem>>, %arg18: memref<8x8x32xf32, #tpu.memory_space<vmem>>, %arg19: memref<8x8x128xf32, #tpu.memory_space<vmem>>) attributes {dimension_semantics = [#tpu.dimension_semantics<parallel>], iteration_bounds = array<i64: 1>, scalar_prefetch = 0 : i64, scratch_operands = 3 : i64, tpu.core_type = #tpu.core_type<tc>, window_params = [{transform_indices = @transform_0, window_bounds = array<i64: 8, 8, 49>}, {pipeline_mode = #tpu.pipeline_mode<synchronous>, transform_indices = @transform_1, window_bounds = array<i64: 49, 128>}, {pipeline_mode = #tpu.pipeline_mode<synchronous>, transform_indices = @transform_2, window_bounds = array<i64: 32, 128>}, {pipeline_mode = #tpu.pipeline_mode<synchronous>, transform_indices = @transform_3, window_bounds = array<i64: 1, 128>}, {pipeline_mode = #tpu.pipeline_mode<synchronous>, transform_indices = @transform_4, window_bounds = array<i64: 32, 128>}, {pipeline_mode = #tpu.pipeline_mode<synchronous>, transform_indices = @transform_5, window_bounds = array<i64: 32, 128>}, {pipeline_mode = #tpu.pipeline_mode<synchronous>, transform_indices = @transform_6, window_bounds = array<i64: 1, 128>}, {pipeline_mode = #tpu.pipeline_mode<synchronous>, transform_indices = @transform_7, window_bounds = array<i64: 32, 128>}, {pipeline_mode = #tpu.pipeline_mode<synchronous>, transform_indices = @transform_8, window_bounds = array<i64: 32, 128>}, {pipeline_mode = #tpu.pipeline_mode<synchronous>, transform_indices = @transform_9, window_bounds = array<i64: 1, 128>}, {pipeline_mode = #tpu.pipeline_mode<synchronous>, transform_indices = @transform_10, window_bounds = array<i64: 32, 128>}, {pipeline_mode = #tpu.pipeline_mode<synchronous>, transform_indices = @transform_11, window_bounds = array<i64: 32, 128>}, {pipeline_mode = #tpu.pipeline_mode<synchronous>, transform_indices = @transform_12, window_bounds = array<i64: 1, 128>}, {pipeline_mode = #tpu.pipeline_mode<synchronous>, transform_indices = @transform_13, window_bounds = array<i64: 32, 128>}, {pipeline_mode = #tpu.pipeline_mode<synchronous>, transform_indices = @transform_14, window_bounds = array<i64: 1, 128>}, {transform_indices = @transform_15, window_bounds = array<i64: 8, 8, 128>}]} {
    %c0 = arith.constant 0 : index
    %c0_0 = arith.constant 0 : index
    %c0_1 = arith.constant 0 : index
    %0 = vector.load %arg1[%c0, %c0_0, %c0_1] : memref<8x8x49xf32, #tpu.memory_space<vmem>>, vector<8x8x49xf32>
    %1 = vector.shape_cast %0 : vector<8x8x49xf32> to vector<64x49xf32>
    %c0_2 = arith.constant 0 : index
    %c0_3 = arith.constant 0 : index
    %2 = vector.load %arg2[%c0_2, %c0_3] : memref<49x128xf32, #tpu.memory_space<vmem>>, vector<49x128xf32>
    %cst = arith.constant dense<0.000000e+00> : vector<64x128xf32>
    %3 = tpu.matmul %1, %2, %cst {dimension_numbers = #tpu.dot_dimension_numbers<[1], [0], [0], [1], [0, 0, 1, 1], [], []>} : vector<64x49xf32>, vector<49x128xf32>, vector<64x128xf32> -> vector<64x128xf32>
    %c0_4 = arith.constant 0 : index
    %c0_5 = arith.constant 0 : index
    %4 = vector.load %arg4[%c0_4, %c0_5] : memref<1x128xf32, #tpu.memory_space<vmem>>, vector<1x128xf32>
    %5 = vector.broadcast %4 : vector<1x128xf32> to vector<64x128xf32>
    %6 = arith.addf %3, %5 : vector<64x128xf32>
    %7 = vector.shape_cast %6 : vector<64x128xf32> to vector<8x8x128xf32>
    %c0_6 = arith.constant 0 : index
    %c0_7 = arith.constant 0 : index
    %c0_8 = arith.constant 0 : index
    %8 = vector.load %arg19[%c0_6, %c0_7, %c0_8] : memref<8x8x128xf32, #tpu.memory_space<vmem>>, vector<8x8x128xf32>
    tpu.vector_store %arg19[%c0_6, %c0_7, %c0_8], %7 {strides = array<i32>} : memref<8x8x128xf32, #tpu.memory_space<vmem>>, vector<8x8x128xf32>,
    %c0_9 = arith.constant 0 : index
    %c0_10 = arith.constant 0 : index
    %9 = vector.load %arg3[%c0_9, %c0_10] : memref<32x128xf32, #tpu.memory_space<vmem>>, vector<32x128xf32>
    %cst_11 = arith.constant 0.000000e+00 : f32
    %10 = vector.broadcast %cst_11 : f32 to vector<8x32xf32>
    %cst_12 = arith.constant 0.000000e+00 : f32
    %11 = vector.broadcast %cst_12 : f32 to vector<8x32xf32>
    %c0_i32 = arith.constant 0 : i32
    %12 = arith.index_cast %c0_i32 : i32 to index
    %c0_13 = arith.constant 0 : index
    %c0_14 = arith.constant 0 : index
    %13 = vector.load %arg19[%12, %c0_13, %c0_14] : memref<8x8x128xf32, #tpu.memory_space<vmem>>, vector<1x8x128xf32>
    %14 = vector.shape_cast %13 : vector<1x8x128xf32> to vector<8x128xf32>
    %cst_15 = arith.constant dense<0.000000e+00> : vector<8x128xf32>
    %15 = tpu.matmul %10, %9, %cst_15 {dimension_numbers = #tpu.dot_dimension_numbers<[1], [0], [0], [1], [0, 0, 1, 1], [], []>} : vector<8x32xf32>, vector<32x128xf32>, vector<8x128xf32> -> vector<8x128xf32>
    %16 = arith.addf %14, %15 : vector<8x128xf32>
    %17 = arith.negf %16 : vector<8x128xf32>
    %18 = math.exp %17 : vector<8x128xf32>
    %cst_16 = arith.constant 1.000000e+00 : f32
    %19 = vector.broadcast %cst_16 : f32 to vector<8x128xf32>
    %20 = arith.addf %19, %18 : vector<8x128xf32>
    %21 = arith.divf %19, %20 : vector<8x128xf32>
    %22 = math.tanh %16 : vector<8x128xf32>
    %23 = vector.extract_strided_slice %21 {offsets = [0, 0], sizes = [8, 32], strides = [1, 1]} : vector<8x128xf32> to vector<8x32xf32>
    %24 = vector.extract_strided_slice %21 {offsets = [0, 32], sizes = [8, 32], strides = [1, 1]} : vector<8x128xf32> to vector<8x32xf32>
    %25 = vector.extract_strided_slice %22 {offsets = [0, 64], sizes = [8, 32], strides = [1, 1]} : vector<8x128xf32> to vector<8x32xf32>
    %26 = vector.extract_strided_slice %21 {offsets = [0, 96], sizes = [8, 32], strides = [1, 1]} : vector<8x128xf32> to vector<8x32xf32>
    %27 = arith.mulf %24, %11 : vector<8x32xf32>
    %28 = arith.mulf %23, %25 : vector<8x32xf32>
    %29 = arith.addf %27, %28 : vector<8x32xf32>
    %30 = math.tanh %29 : vector<8x32xf32>
    %31 = arith.mulf %26, %30 : vector<8x32xf32>
    %32 = arith.index_cast %c0_i32 : i32 to index
    %c0_17 = arith.constant 0 : index
    %c0_18 = arith.constant 0 : index
    %33 = vector.load %arg17[%32, %c0_17, %c0_18] : memref<8x8x32xf32, #tpu.memory_space<vmem>>, vector<1x8x32xf32>
    %34 = vector.shape_cast %33 : vector<1x8x32xf32> to vector<8x32xf32>
    %35 = vector.shape_cast %31 : vector<8x32xf32> to vector<1x8x32xf32>
    tpu.vector_store %arg17[%32, %c0_17, %c0_18], %35 {strides = array<i32>} : memref<8x8x32xf32, #tpu.memory_space<vmem>>, vector<1x8x32xf32>,
    %c1_i32 = arith.constant 1 : i32
    %36 = arith.index_cast %c1_i32 : i32 to index
    %c0_19 = arith.constant 0 : index
    %c0_20 = arith.constant 0 : index
    %37 = vector.load %arg19[%36, %c0_19, %c0_20] : memref<8x8x128xf32, #tpu.memory_space<vmem>>, vector<1x8x128xf32>
    %38 = vector.shape_cast %37 : vector<1x8x128xf32> to vector<8x128xf32>
    %cst_21 = arith.constant dense<0.000000e+00> : vector<8x128xf32>
    %39 = tpu.matmul %31, %9, %cst_21 {dimension_numbers = #tpu.dot_dimension_numbers<[1], [0], [0], [1], [0, 0, 1, 1], [], []>} : vector<8x32xf32>, vector<32x128xf32>, vector<8x128xf32> -> vector<8x128xf32>
    %40 = arith.addf %38, %39 : vector<8x128xf32>
    %41 = arith.negf %40 : vector<8x128xf32>
    %42 = math.exp %41 : vector<8x128xf32>
    %cst_22 = arith.constant 1.000000e+00 : f32
    %43 = vector.broadcast %cst_22 : f32 to vector<8x128xf32>
    %44 = arith.addf %43, %42 : vector<8x128xf32>
    %45 = arith.divf %43, %44 : vector<8x128xf32>
    %46 = math.tanh %40 : vector<8x128xf32>
    %47 = vector.extract_strided_slice %45 {offsets = [0, 0], sizes = [8, 32], strides = [1, 1]} : vector<8x128xf32> to vector<8x32xf32>
    %48 = vector.extract_strided_slice %45 {offsets = [0, 32], sizes = [8, 32], strides = [1, 1]} : vector<8x128xf32> to vector<8x32xf32>
    %49 = vector.extract_strided_slice %46 {offsets = [0, 64], sizes = [8, 32], strides = [1, 1]} : vector<8x128xf32> to vector<8x32xf32>
    %50 = vector.extract_strided_slice %45 {offsets = [0, 96], sizes = [8, 32], strides = [1, 1]} : vector<8x128xf32> to vector<8x32xf32>
    %51 = arith.mulf %48, %29 : vector<8x32xf32>
    %52 = arith.mulf %47, %49 : vector<8x32xf32>
    %53 = arith.addf %51, %52 : vector<8x32xf32>
    %54 = math.tanh %53 : vector<8x32xf32>
    %55 = arith.mulf %50, %54 : vector<8x32xf32>
    %56 = arith.index_cast %c1_i32 : i32 to index
    %c0_23 = arith.constant 0 : index
    %c0_24 = arith.constant 0 : index
    %57 = vector.load %arg17[%56, %c0_23, %c0_24] : memref<8x8x32xf32, #tpu.memory_space<vmem>>, vector<1x8x32xf32>
    %58 = vector.shape_cast %57 : vector<1x8x32xf32> to vector<8x32xf32>
    %59 = vector.shape_cast %55 : vector<8x32xf32> to vector<1x8x32xf32>
    tpu.vector_store %arg17[%56, %c0_23, %c0_24], %59 {strides = array<i32>} : memref<8x8x32xf32, #tpu.memory_space<vmem>>, vector<1x8x32xf32>,
    %c2_i32 = arith.constant 2 : i32
    %60 = arith.index_cast %c2_i32 : i32 to index
    %c0_25 = arith.constant 0 : index
    %c0_26 = arith.constant 0 : index
    %61 = vector.load %arg19[%60, %c0_25, %c0_26] : memref<8x8x128xf32, #tpu.memory_space<vmem>>, vector<1x8x128xf32>
    %62 = vector.shape_cast %61 : vector<1x8x128xf32> to vector<8x128xf32>
    %cst_27 = arith.constant dense<0.000000e+00> : vector<8x128xf32>
    %63 = tpu.matmul %55, %9, %cst_27 {dimension_numbers = #tpu.dot_dimension_numbers<[1], [0], [0], [1], [0, 0, 1, 1], [], []>} : vector<8x32xf32>, vector<32x128xf32>, vector<8x128xf32> -> vector<8x128xf32>
    %64 = arith.addf %62, %63 : vector<8x128xf32>
    %65 = arith.negf %64 : vector<8x128xf32>
    %66 = math.exp %65 : vector<8x128xf32>
    %cst_28 = arith.constant 1.000000e+00 : f32
    %67 = vector.broadcast %cst_28 : f32 to vector<8x128xf32>
    %68 = arith.addf %67, %66 : vector<8x128xf32>
    %69 = arith.divf %67, %68 : vector<8x128xf32>
    %70 = math.tanh %64 : vector<8x128xf32>
    %71 = vector.extract_strided_slice %69 {offsets = [0, 0], sizes = [8, 32], strides = [1, 1]} : vector<8x128xf32> to vector<8x32xf32>
    %72 = vector.extract_strided_slice %69 {offsets = [0, 32], sizes = [8, 32], strides = [1, 1]} : vector<8x128xf32> to vector<8x32xf32>
    %73 = vector.extract_strided_slice %70 {offsets = [0, 64], sizes = [8, 32], strides = [1, 1]} : vector<8x128xf32> to vector<8x32xf32>
    %74 = vector.extract_strided_slice %69 {offsets = [0, 96], sizes = [8, 32], strides = [1, 1]} : vector<8x128xf32> to vector<8x32xf32>
    %75 = arith.mulf %72, %53 : vector<8x32xf32>
    %76 = arith.mulf %71, %73 : vector<8x32xf32>
    %77 = arith.addf %75, %76 : vector<8x32xf32>
    %78 = math.tanh %77 : vector<8x32xf32>
    %79 = arith.mulf %74, %78 : vector<8x32xf32>
    %80 = arith.index_cast %c2_i32 : i32 to index
    %c0_29 = arith.constant 0 : index
    %c0_30 = arith.constant 0 : index
    %81 = vector.load %arg17[%80, %c0_29, %c0_30] : memref<8x8x32xf32, #tpu.memory_space<vmem>>, vector<1x8x32xf32>
    %82 = vector.shape_cast %81 : vector<1x8x32xf32> to vector<8x32xf32>
    %83 = vector.shape_cast %79 : vector<8x32xf32> to vector<1x8x32xf32>
    tpu.vector_store %arg17[%80, %c0_29, %c0_30], %83 {strides = array<i32>} : memref<8x8x32xf32, #tpu.memory_space<vmem>>, vector<1x8x32xf32>,
    %c3_i32 = arith.constant 3 : i32
    %84 = arith.index_cast %c3_i32 : i32 to index
    %c0_31 = arith.constant 0 : index
    %c0_32 = arith.constant 0 : index
    %85 = vector.load %arg19[%84, %c0_31, %c0_32] : memref<8x8x128xf32, #tpu.memory_space<vmem>>, vector<1x8x128xf32>
    %86 = vector.shape_cast %85 : vector<1x8x128xf32> to vector<8x128xf32>
    %cst_33 = arith.constant dense<0.000000e+00> : vector<8x128xf32>
    %87 = tpu.matmul %79, %9, %cst_33 {dimension_numbers = #tpu.dot_dimension_numbers<[1], [0], [0], [1], [0, 0, 1, 1], [], []>} : vector<8x32xf32>, vector<32x128xf32>, vector<8x128xf32> -> vector<8x128xf32>
    %88 = arith.addf %86, %87 : vector<8x128xf32>
    %89 = arith.negf %88 : vector<8x128xf32>
    %90 = math.exp %89 : vector<8x128xf32>
    %cst_34 = arith.constant 1.000000e+00 : f32
    %91 = vector.broadcast %cst_34 : f32 to vector<8x128xf32>
    %92 = arith.addf %91, %90 : vector<8x128xf32>
    %93 = arith.divf %91, %92 : vector<8x128xf32>
    %94 = math.tanh %88 : vector<8x128xf32>
    %95 = vector.extract_strided_slice %93 {offsets = [0, 0], sizes = [8, 32], strides = [1, 1]} : vector<8x128xf32> to vector<8x32xf32>
    %96 = vector.extract_strided_slice %93 {offsets = [0, 32], sizes = [8, 32], strides = [1, 1]} : vector<8x128xf32> to vector<8x32xf32>
    %97 = vector.extract_strided_slice %94 {offsets = [0, 64], sizes = [8, 32], strides = [1, 1]} : vector<8x128xf32> to vector<8x32xf32>
    %98 = vector.extract_strided_slice %93 {offsets = [0, 96], sizes = [8, 32], strides = [1, 1]} : vector<8x128xf32> to vector<8x32xf32>
    %99 = arith.mulf %96, %77 : vector<8x32xf32>
    %100 = arith.mulf %95, %97 : vector<8x32xf32>
    %101 = arith.addf %99, %100 : vector<8x32xf32>
    %102 = math.tanh %101 : vector<8x32xf32>
    %103 = arith.mulf %98, %102 : vector<8x32xf32>
    %104 = arith.index_cast %c3_i32 : i32 to index
    %c0_35 = arith.constant 0 : index
    %c0_36 = arith.constant 0 : index
    %105 = vector.load %arg17[%104, %c0_35, %c0_36] : memref<8x8x32xf32, #tpu.memory_space<vmem>>, vector<1x8x32xf32>
    %106 = vector.shape_cast %105 : vector<1x8x32xf32> to vector<8x32xf32>
    %107 = vector.shape_cast %103 : vector<8x32xf32> to vector<1x8x32xf32>
    tpu.vector_store %arg17[%104, %c0_35, %c0_36], %107 {strides = array<i32>} : memref<8x8x32xf32, #tpu.memory_space<vmem>>, vector<1x8x32xf32>,
    %c4_i32 = arith.constant 4 : i32
    %108 = arith.index_cast %c4_i32 : i32 to index
    %c0_37 = arith.constant 0 : index
    %c0_38 = arith.constant 0 : index
    %109 = vector.load %arg19[%108, %c0_37, %c0_38] : memref<8x8x128xf32, #tpu.memory_space<vmem>>, vector<1x8x128xf32>
    %110 = vector.shape_cast %109 : vector<1x8x128xf32> to vector<8x128xf32>
    %cst_39 = arith.constant dense<0.000000e+00> : vector<8x128xf32>
    %111 = tpu.matmul %103, %9, %cst_39 {dimension_numbers = #tpu.dot_dimension_numbers<[1], [0], [0], [1], [0, 0, 1, 1], [], []>} : vector<8x32xf32>, vector<32x128xf32>, vector<8x128xf32> -> vector<8x128xf32>
    %112 = arith.addf %110, %111 : vector<8x128xf32>
    %113 = arith.negf %112 : vector<8x128xf32>
    %114 = math.exp %113 : vector<8x128xf32>
    %cst_40 = arith.constant 1.000000e+00 : f32
    %115 = vector.broadcast %cst_40 : f32 to vector<8x128xf32>
    %116 = arith.addf %115, %114 : vector<8x128xf32>
    %117 = arith.divf %115, %116 : vector<8x128xf32>
    %118 = math.tanh %112 : vector<8x128xf32>
    %119 = vector.extract_strided_slice %117 {offsets = [0, 0], sizes = [8, 32], strides = [1, 1]} : vector<8x128xf32> to vector<8x32xf32>
    %120 = vector.extract_strided_slice %117 {offsets = [0, 32], sizes = [8, 32], strides = [1, 1]} : vector<8x128xf32> to vector<8x32xf32>
    %121 = vector.extract_strided_slice %118 {offsets = [0, 64], sizes = [8, 32], strides = [1, 1]} : vector<8x128xf32> to vector<8x32xf32>
    %122 = vector.extract_strided_slice %117 {offsets = [0, 96], sizes = [8, 32], strides = [1, 1]} : vector<8x128xf32> to vector<8x32xf32>
    %123 = arith.mulf %120, %101 : vector<8x32xf32>
    %124 = arith.mulf %119, %121 : vector<8x32xf32>
    %125 = arith.addf %123, %124 : vector<8x32xf32>
    %126 = math.tanh %125 : vector<8x32xf32>
    %127 = arith.mulf %122, %126 : vector<8x32xf32>
    %128 = arith.index_cast %c4_i32 : i32 to index
    %c0_41 = arith.constant 0 : index
    %c0_42 = arith.constant 0 : index
    %129 = vector.load %arg17[%128, %c0_41, %c0_42] : memref<8x8x32xf32, #tpu.memory_space<vmem>>, vector<1x8x32xf32>
    %130 = vector.shape_cast %129 : vector<1x8x32xf32> to vector<8x32xf32>
    %131 = vector.shape_cast %127 : vector<8x32xf32> to vector<1x8x32xf32>
    tpu.vector_store %arg17[%128, %c0_41, %c0_42], %131 {strides = array<i32>} : memref<8x8x32xf32, #tpu.memory_space<vmem>>, vector<1x8x32xf32>,
    %c5_i32 = arith.constant 5 : i32
    %132 = arith.index_cast %c5_i32 : i32 to index
    %c0_43 = arith.constant 0 : index
    %c0_44 = arith.constant 0 : index
    %133 = vector.load %arg19[%132, %c0_43, %c0_44] : memref<8x8x128xf32, #tpu.memory_space<vmem>>, vector<1x8x128xf32>
    %134 = vector.shape_cast %133 : vector<1x8x128xf32> to vector<8x128xf32>
    %cst_45 = arith.constant dense<0.000000e+00> : vector<8x128xf32>
    %135 = tpu.matmul %127, %9, %cst_45 {dimension_numbers = #tpu.dot_dimension_numbers<[1], [0], [0], [1], [0, 0, 1, 1], [], []>} : vector<8x32xf32>, vector<32x128xf32>, vector<8x128xf32> -> vector<8x128xf32>
    %136 = arith.addf %134, %135 : vector<8x128xf32>
    %137 = arith.negf %136 : vector<8x128xf32>
    %138 = math.exp %137 : vector<8x128xf32>
    %cst_46 = arith.constant 1.000000e+00 : f32
    %139 = vector.broadcast %cst_46 : f32 to vector<8x128xf32>
    %140 = arith.addf %139, %138 : vector<8x128xf32>
    %141 = arith.divf %139, %140 : vector<8x128xf32>
    %142 = math.tanh %136 : vector<8x128xf32>
    %143 = vector.extract_strided_slice %141 {offsets = [0, 0], sizes = [8, 32], strides = [1, 1]} : vector<8x128xf32> to vector<8x32xf32>
    %144 = vector.extract_strided_slice %141 {offsets = [0, 32], sizes = [8, 32], strides = [1, 1]} : vector<8x128xf32> to vector<8x32xf32>
    %145 = vector.extract_strided_slice %142 {offsets = [0, 64], sizes = [8, 32], strides = [1, 1]} : vector<8x128xf32> to vector<8x32xf32>
    %146 = vector.extract_strided_slice %141 {offsets = [0, 96], sizes = [8, 32], strides = [1, 1]} : vector<8x128xf32> to vector<8x32xf32>
    %147 = arith.mulf %144, %125 : vector<8x32xf32>
    %148 = arith.mulf %143, %145 : vector<8x32xf32>
    %149 = arith.addf %147, %148 : vector<8x32xf32>
    %150 = math.tanh %149 : vector<8x32xf32>
    %151 = arith.mulf %146, %150 : vector<8x32xf32>
    %152 = arith.index_cast %c5_i32 : i32 to index
    %c0_47 = arith.constant 0 : index
    %c0_48 = arith.constant 0 : index
    %153 = vector.load %arg17[%152, %c0_47, %c0_48] : memref<8x8x32xf32, #tpu.memory_space<vmem>>, vector<1x8x32xf32>
    %154 = vector.shape_cast %153 : vector<1x8x32xf32> to vector<8x32xf32>
    %155 = vector.shape_cast %151 : vector<8x32xf32> to vector<1x8x32xf32>
    tpu.vector_store %arg17[%152, %c0_47, %c0_48], %155 {strides = array<i32>} : memref<8x8x32xf32, #tpu.memory_space<vmem>>, vector<1x8x32xf32>,
    %c6_i32 = arith.constant 6 : i32
    %156 = arith.index_cast %c6_i32 : i32 to index
    %c0_49 = arith.constant 0 : index
    %c0_50 = arith.constant 0 : index
    %157 = vector.load %arg19[%156, %c0_49, %c0_50] : memref<8x8x128xf32, #tpu.memory_space<vmem>>, vector<1x8x128xf32>
    %158 = vector.shape_cast %157 : vector<1x8x128xf32> to vector<8x128xf32>
    %cst_51 = arith.constant dense<0.000000e+00> : vector<8x128xf32>
    %159 = tpu.matmul %151, %9, %cst_51 {dimension_numbers = #tpu.dot_dimension_numbers<[1], [0], [0], [1], [0, 0, 1, 1], [], []>} : vector<8x32xf32>, vector<32x128xf32>, vector<8x128xf32> -> vector<8x128xf32>
    %160 = arith.addf %158, %159 : vector<8x128xf32>
    %161 = arith.negf %160 : vector<8x128xf32>
    %162 = math.exp %161 : vector<8x128xf32>
    %cst_52 = arith.constant 1.000000e+00 : f32
    %163 = vector.broadcast %cst_52 : f32 to vector<8x128xf32>
    %164 = arith.addf %163, %162 : vector<8x128xf32>
    %165 = arith.divf %163, %164 : vector<8x128xf32>
    %166 = math.tanh %160 : vector<8x128xf32>
    %167 = vector.extract_strided_slice %165 {offsets = [0, 0], sizes = [8, 32], strides = [1, 1]} : vector<8x128xf32> to vector<8x32xf32>
    %168 = vector.extract_strided_slice %165 {offsets = [0, 32], sizes = [8, 32], strides = [1, 1]} : vector<8x128xf32> to vector<8x32xf32>
    %169 = vector.extract_strided_slice %166 {offsets = [0, 64], sizes = [8, 32], strides = [1, 1]} : vector<8x128xf32> to vector<8x32xf32>
    %170 = vector.extract_strided_slice %165 {offsets = [0, 96], sizes = [8, 32], strides = [1, 1]} : vector<8x128xf32> to vector<8x32xf32>
    %171 = arith.mulf %168, %149 : vector<8x32xf32>
    %172 = arith.mulf %167, %169 : vector<8x32xf32>
    %173 = arith.addf %171, %172 : vector<8x32xf32>
    %174 = math.tanh %173 : vector<8x32xf32>
    %175 = arith.mulf %170, %174 : vector<8x32xf32>
    %176 = arith.index_cast %c6_i32 : i32 to index
    %c0_53 = arith.constant 0 : index
    %c0_54 = arith.constant 0 : index
    %177 = vector.load %arg17[%176, %c0_53, %c0_54] : memref<8x8x32xf32, #tpu.memory_space<vmem>>, vector<1x8x32xf32>
    %178 = vector.shape_cast %177 : vector<1x8x32xf32> to vector<8x32xf32>
    %179 = vector.shape_cast %175 : vector<8x32xf32> to vector<1x8x32xf32>
    tpu.vector_store %arg17[%176, %c0_53, %c0_54], %179 {strides = array<i32>} : memref<8x8x32xf32, #tpu.memory_space<vmem>>, vector<1x8x32xf32>,
    %c7_i32 = arith.constant 7 : i32
    %180 = arith.index_cast %c7_i32 : i32 to index
    %c0_55 = arith.constant 0 : index
    %c0_56 = arith.constant 0 : index
    %181 = vector.load %arg19[%180, %c0_55, %c0_56] : memref<8x8x128xf32, #tpu.memory_space<vmem>>, vector<1x8x128xf32>
    %182 = vector.shape_cast %181 : vector<1x8x128xf32> to vector<8x128xf32>
    %cst_57 = arith.constant dense<0.000000e+00> : vector<8x128xf32>
    %183 = tpu.matmul %175, %9, %cst_57 {dimension_numbers = #tpu.dot_dimension_numbers<[1], [0], [0], [1], [0, 0, 1, 1], [], []>} : vector<8x32xf32>, vector<32x128xf32>, vector<8x128xf32> -> vector<8x128xf32>
    %184 = arith.addf %182, %183 : vector<8x128xf32>
    %185 = arith.negf %184 : vector<8x128xf32>
    %186 = math.exp %185 : vector<8x128xf32>
    %cst_58 = arith.constant 1.000000e+00 : f32
    %187 = vector.broadcast %cst_58 : f32 to vector<8x128xf32>
    %188 = arith.addf %187, %186 : vector<8x128xf32>
    %189 = arith.divf %187, %188 : vector<8x128xf32>
    %190 = math.tanh %184 : vector<8x128xf32>
    %191 = vector.extract_strided_slice %189 {offsets = [0, 0], sizes = [8, 32], strides = [1, 1]} : vector<8x128xf32> to vector<8x32xf32>
    %192 = vector.extract_strided_slice %189 {offsets = [0, 32], sizes = [8, 32], strides = [1, 1]} : vector<8x128xf32> to vector<8x32xf32>
    %193 = vector.extract_strided_slice %190 {offsets = [0, 64], sizes = [8, 32], strides = [1, 1]} : vector<8x128xf32> to vector<8x32xf32>
    %194 = vector.extract_strided_slice %189 {offsets = [0, 96], sizes = [8, 32], strides = [1, 1]} : vector<8x128xf32> to vector<8x32xf32>
    %195 = arith.mulf %192, %173 : vector<8x32xf32>
    %196 = arith.mulf %191, %193 : vector<8x32xf32>
    %197 = arith.addf %195, %196 : vector<8x32xf32>
    %198 = math.tanh %197 : vector<8x32xf32>
    %199 = arith.mulf %194, %198 : vector<8x32xf32>
    %200 = arith.index_cast %c7_i32 : i32 to index
    %c0_59 = arith.constant 0 : index
    %c0_60 = arith.constant 0 : index
    %201 = vector.load %arg17[%200, %c0_59, %c0_60] : memref<8x8x32xf32, #tpu.memory_space<vmem>>, vector<1x8x32xf32>
    %202 = vector.shape_cast %201 : vector<1x8x32xf32> to vector<8x32xf32>
    %203 = vector.shape_cast %199 : vector<8x32xf32> to vector<1x8x32xf32>
    tpu.vector_store %arg17[%200, %c0_59, %c0_60], %203 {strides = array<i32>} : memref<8x8x32xf32, #tpu.memory_space<vmem>>, vector<1x8x32xf32>,
    %c8_i32 = arith.constant 8 : i32
    %c0_61 = arith.constant 0 : index
    %c0_62 = arith.constant 0 : index
    %c0_63 = arith.constant 0 : index
    %204 = vector.load %arg17[%c0_61, %c0_62, %c0_63] : memref<8x8x32xf32, #tpu.memory_space<vmem>>, vector<8x8x32xf32>
    %205 = vector.shape_cast %204 : vector<8x8x32xf32> to vector<64x32xf32>
    %c0_64 = arith.constant 0 : index
    %c0_65 = arith.constant 0 : index
    %206 = vector.load %arg5[%c0_64, %c0_65] : memref<32x128xf32, #tpu.memory_space<vmem>>, vector<32x128xf32>
    %cst_66 = arith.constant dense<0.000000e+00> : vector<64x128xf32>
    %207 = tpu.matmul %205, %206, %cst_66 {dimension_numbers = #tpu.dot_dimension_numbers<[1], [0], [0], [1], [0, 0, 1, 1], [], []>} : vector<64x32xf32>, vector<32x128xf32>, vector<64x128xf32> -> vector<64x128xf32>
    %c0_67 = arith.constant 0 : index
    %c0_68 = arith.constant 0 : index
    %208 = vector.load %arg7[%c0_67, %c0_68] : memref<1x128xf32, #tpu.memory_space<vmem>>, vector<1x128xf32>
    %209 = vector.broadcast %208 : vector<1x128xf32> to vector<64x128xf32>
    %210 = arith.addf %207, %209 : vector<64x128xf32>
    %211 = vector.shape_cast %210 : vector<64x128xf32> to vector<8x8x128xf32>
    %c0_69 = arith.constant 0 : index
    %c0_70 = arith.constant 0 : index
    %c0_71 = arith.constant 0 : index
    %212 = vector.load %arg19[%c0_69, %c0_70, %c0_71] : memref<8x8x128xf32, #tpu.memory_space<vmem>>, vector<8x8x128xf32>
    tpu.vector_store %arg19[%c0_69, %c0_70, %c0_71], %211 {strides = array<i32>} : memref<8x8x128xf32, #tpu.memory_space<vmem>>, vector<8x8x128xf32>,
    %c0_72 = arith.constant 0 : index
    %c0_73 = arith.constant 0 : index
    %213 = vector.load %arg6[%c0_72, %c0_73] : memref<32x128xf32, #tpu.memory_space<vmem>>, vector<32x128xf32>
    %cst_74 = arith.constant 0.000000e+00 : f32
    %214 = vector.broadcast %cst_74 : f32 to vector<8x32xf32>
    %cst_75 = arith.constant 0.000000e+00 : f32
    %215 = vector.broadcast %cst_75 : f32 to vector<8x32xf32>
    %c0_i32_76 = arith.constant 0 : i32
    %216 = arith.index_cast %c0_i32_76 : i32 to index
    %c0_77 = arith.constant 0 : index
    %c0_78 = arith.constant 0 : index
    %217 = vector.load %arg19[%216, %c0_77, %c0_78] : memref<8x8x128xf32, #tpu.memory_space<vmem>>, vector<1x8x128xf32>
    %218 = vector.shape_cast %217 : vector<1x8x128xf32> to vector<8x128xf32>
    %cst_79 = arith.constant dense<0.000000e+00> : vector<8x128xf32>
    %219 = tpu.matmul %214, %213, %cst_79 {dimension_numbers = #tpu.dot_dimension_numbers<[1], [0], [0], [1], [0, 0, 1, 1], [], []>} : vector<8x32xf32>, vector<32x128xf32>, vector<8x128xf32> -> vector<8x128xf32>
    %220 = arith.addf %218, %219 : vector<8x128xf32>
    %221 = arith.negf %220 : vector<8x128xf32>
    %222 = math.exp %221 : vector<8x128xf32>
    %cst_80 = arith.constant 1.000000e+00 : f32
    %223 = vector.broadcast %cst_80 : f32 to vector<8x128xf32>
    %224 = arith.addf %223, %222 : vector<8x128xf32>
    %225 = arith.divf %223, %224 : vector<8x128xf32>
    %226 = math.tanh %220 : vector<8x128xf32>
    %227 = vector.extract_strided_slice %225 {offsets = [0, 0], sizes = [8, 32], strides = [1, 1]} : vector<8x128xf32> to vector<8x32xf32>
    %228 = vector.extract_strided_slice %225 {offsets = [0, 32], sizes = [8, 32], strides = [1, 1]} : vector<8x128xf32> to vector<8x32xf32>
    %229 = vector.extract_strided_slice %226 {offsets = [0, 64], sizes = [8, 32], strides = [1, 1]} : vector<8x128xf32> to vector<8x32xf32>
    %230 = vector.extract_strided_slice %225 {offsets = [0, 96], sizes = [8, 32], strides = [1, 1]} : vector<8x128xf32> to vector<8x32xf32>
    %231 = arith.mulf %228, %215 : vector<8x32xf32>
    %232 = arith.mulf %227, %229 : vector<8x32xf32>
    %233 = arith.addf %231, %232 : vector<8x32xf32>
    %234 = math.tanh %233 : vector<8x32xf32>
    %235 = arith.mulf %230, %234 : vector<8x32xf32>
    %236 = arith.index_cast %c0_i32_76 : i32 to index
    %c0_81 = arith.constant 0 : index
    %c0_82 = arith.constant 0 : index
    %237 = vector.load %arg18[%236, %c0_81, %c0_82] : memref<8x8x32xf32, #tpu.memory_space<vmem>>, vector<1x8x32xf32>
    %238 = vector.shape_cast %237 : vector<1x8x32xf32> to vector<8x32xf32>
    %239 = vector.shape_cast %235 : vector<8x32xf32> to vector<1x8x32xf32>
    tpu.vector_store %arg18[%236, %c0_81, %c0_82], %239 {strides = array<i32>} : memref<8x8x32xf32, #tpu.memory_space<vmem>>, vector<1x8x32xf32>,
    %c1_i32_83 = arith.constant 1 : i32
    %240 = arith.index_cast %c1_i32_83 : i32 to index
    %c0_84 = arith.constant 0 : index
    %c0_85 = arith.constant 0 : index
    %241 = vector.load %arg19[%240, %c0_84, %c0_85] : memref<8x8x128xf32, #tpu.memory_space<vmem>>, vector<1x8x128xf32>
    %242 = vector.shape_cast %241 : vector<1x8x128xf32> to vector<8x128xf32>
    %cst_86 = arith.constant dense<0.000000e+00> : vector<8x128xf32>
    %243 = tpu.matmul %235, %213, %cst_86 {dimension_numbers = #tpu.dot_dimension_numbers<[1], [0], [0], [1], [0, 0, 1, 1], [], []>} : vector<8x32xf32>, vector<32x128xf32>, vector<8x128xf32> -> vector<8x128xf32>
    %244 = arith.addf %242, %243 : vector<8x128xf32>
    %245 = arith.negf %244 : vector<8x128xf32>
    %246 = math.exp %245 : vector<8x128xf32>
    %cst_87 = arith.constant 1.000000e+00 : f32
    %247 = vector.broadcast %cst_87 : f32 to vector<8x128xf32>
    %248 = arith.addf %247, %246 : vector<8x128xf32>
    %249 = arith.divf %247, %248 : vector<8x128xf32>
    %250 = math.tanh %244 : vector<8x128xf32>
    %251 = vector.extract_strided_slice %249 {offsets = [0, 0], sizes = [8, 32], strides = [1, 1]} : vector<8x128xf32> to vector<8x32xf32>
    %252 = vector.extract_strided_slice %249 {offsets = [0, 32], sizes = [8, 32], strides = [1, 1]} : vector<8x128xf32> to vector<8x32xf32>
    %253 = vector.extract_strided_slice %250 {offsets = [0, 64], sizes = [8, 32], strides = [1, 1]} : vector<8x128xf32> to vector<8x32xf32>
    %254 = vector.extract_strided_slice %249 {offsets = [0, 96], sizes = [8, 32], strides = [1, 1]} : vector<8x128xf32> to vector<8x32xf32>
    %255 = arith.mulf %252, %233 : vector<8x32xf32>
    %256 = arith.mulf %251, %253 : vector<8x32xf32>
    %257 = arith.addf %255, %256 : vector<8x32xf32>
    %258 = math.tanh %257 : vector<8x32xf32>
    %259 = arith.mulf %254, %258 : vector<8x32xf32>
    %260 = arith.index_cast %c1_i32_83 : i32 to index
    %c0_88 = arith.constant 0 : index
    %c0_89 = arith.constant 0 : index
    %261 = vector.load %arg18[%260, %c0_88, %c0_89] : memref<8x8x32xf32, #tpu.memory_space<vmem>>, vector<1x8x32xf32>
    %262 = vector.shape_cast %261 : vector<1x8x32xf32> to vector<8x32xf32>
    %263 = vector.shape_cast %259 : vector<8x32xf32> to vector<1x8x32xf32>
    tpu.vector_store %arg18[%260, %c0_88, %c0_89], %263 {strides = array<i32>} : memref<8x8x32xf32, #tpu.memory_space<vmem>>, vector<1x8x32xf32>,
    %c2_i32_90 = arith.constant 2 : i32
    %264 = arith.index_cast %c2_i32_90 : i32 to index
    %c0_91 = arith.constant 0 : index
    %c0_92 = arith.constant 0 : index
    %265 = vector.load %arg19[%264, %c0_91, %c0_92] : memref<8x8x128xf32, #tpu.memory_space<vmem>>, vector<1x8x128xf32>
    %266 = vector.shape_cast %265 : vector<1x8x128xf32> to vector<8x128xf32>
    %cst_93 = arith.constant dense<0.000000e+00> : vector<8x128xf32>
    %267 = tpu.matmul %259, %213, %cst_93 {dimension_numbers = #tpu.dot_dimension_numbers<[1], [0], [0], [1], [0, 0, 1, 1], [], []>} : vector<8x32xf32>, vector<32x128xf32>, vector<8x128xf32> -> vector<8x128xf32>
    %268 = arith.addf %266, %267 : vector<8x128xf32>
    %269 = arith.negf %268 : vector<8x128xf32>
    %270 = math.exp %269 : vector<8x128xf32>
    %cst_94 = arith.constant 1.000000e+00 : f32
    %271 = vector.broadcast %cst_94 : f32 to vector<8x128xf32>
    %272 = arith.addf %271, %270 : vector<8x128xf32>
    %273 = arith.divf %271, %272 : vector<8x128xf32>
    %274 = math.tanh %268 : vector<8x128xf32>
    %275 = vector.extract_strided_slice %273 {offsets = [0, 0], sizes = [8, 32], strides = [1, 1]} : vector<8x128xf32> to vector<8x32xf32>
    %276 = vector.extract_strided_slice %273 {offsets = [0, 32], sizes = [8, 32], strides = [1, 1]} : vector<8x128xf32> to vector<8x32xf32>
    %277 = vector.extract_strided_slice %274 {offsets = [0, 64], sizes = [8, 32], strides = [1, 1]} : vector<8x128xf32> to vector<8x32xf32>
    %278 = vector.extract_strided_slice %273 {offsets = [0, 96], sizes = [8, 32], strides = [1, 1]} : vector<8x128xf32> to vector<8x32xf32>
    %279 = arith.mulf %276, %257 : vector<8x32xf32>
    %280 = arith.mulf %275, %277 : vector<8x32xf32>
    %281 = arith.addf %279, %280 : vector<8x32xf32>
    %282 = math.tanh %281 : vector<8x32xf32>
    %283 = arith.mulf %278, %282 : vector<8x32xf32>
    %284 = arith.index_cast %c2_i32_90 : i32 to index
    %c0_95 = arith.constant 0 : index
    %c0_96 = arith.constant 0 : index
    %285 = vector.load %arg18[%284, %c0_95, %c0_96] : memref<8x8x32xf32, #tpu.memory_space<vmem>>, vector<1x8x32xf32>
    %286 = vector.shape_cast %285 : vector<1x8x32xf32> to vector<8x32xf32>
    %287 = vector.shape_cast %283 : vector<8x32xf32> to vector<1x8x32xf32>
    tpu.vector_store %arg18[%284, %c0_95, %c0_96], %287 {strides = array<i32>} : memref<8x8x32xf32, #tpu.memory_space<vmem>>, vector<1x8x32xf32>,
    %c3_i32_97 = arith.constant 3 : i32
    %288 = arith.index_cast %c3_i32_97 : i32 to index
    %c0_98 = arith.constant 0 : index
    %c0_99 = arith.constant 0 : index
    %289 = vector.load %arg19[%288, %c0_98, %c0_99] : memref<8x8x128xf32, #tpu.memory_space<vmem>>, vector<1x8x128xf32>
    %290 = vector.shape_cast %289 : vector<1x8x128xf32> to vector<8x128xf32>
    %cst_100 = arith.constant dense<0.000000e+00> : vector<8x128xf32>
    %291 = tpu.matmul %283, %213, %cst_100 {dimension_numbers = #tpu.dot_dimension_numbers<[1], [0], [0], [1], [0, 0, 1, 1], [], []>} : vector<8x32xf32>, vector<32x128xf32>, vector<8x128xf32> -> vector<8x128xf32>
    %292 = arith.addf %290, %291 : vector<8x128xf32>
    %293 = arith.negf %292 : vector<8x128xf32>
    %294 = math.exp %293 : vector<8x128xf32>
    %cst_101 = arith.constant 1.000000e+00 : f32
    %295 = vector.broadcast %cst_101 : f32 to vector<8x128xf32>
    %296 = arith.addf %295, %294 : vector<8x128xf32>
    %297 = arith.divf %295, %296 : vector<8x128xf32>
    %298 = math.tanh %292 : vector<8x128xf32>
    %299 = vector.extract_strided_slice %297 {offsets = [0, 0], sizes = [8, 32], strides = [1, 1]} : vector<8x128xf32> to vector<8x32xf32>
    %300 = vector.extract_strided_slice %297 {offsets = [0, 32], sizes = [8, 32], strides = [1, 1]} : vector<8x128xf32> to vector<8x32xf32>
    %301 = vector.extract_strided_slice %298 {offsets = [0, 64], sizes = [8, 32], strides = [1, 1]} : vector<8x128xf32> to vector<8x32xf32>
    %302 = vector.extract_strided_slice %297 {offsets = [0, 96], sizes = [8, 32], strides = [1, 1]} : vector<8x128xf32> to vector<8x32xf32>
    %303 = arith.mulf %300, %281 : vector<8x32xf32>
    %304 = arith.mulf %299, %301 : vector<8x32xf32>
    %305 = arith.addf %303, %304 : vector<8x32xf32>
    %306 = math.tanh %305 : vector<8x32xf32>
    %307 = arith.mulf %302, %306 : vector<8x32xf32>
    %308 = arith.index_cast %c3_i32_97 : i32 to index
    %c0_102 = arith.constant 0 : index
    %c0_103 = arith.constant 0 : index
    %309 = vector.load %arg18[%308, %c0_102, %c0_103] : memref<8x8x32xf32, #tpu.memory_space<vmem>>, vector<1x8x32xf32>
    %310 = vector.shape_cast %309 : vector<1x8x32xf32> to vector<8x32xf32>
    %311 = vector.shape_cast %307 : vector<8x32xf32> to vector<1x8x32xf32>
    tpu.vector_store %arg18[%308, %c0_102, %c0_103], %311 {strides = array<i32>} : memref<8x8x32xf32, #tpu.memory_space<vmem>>, vector<1x8x32xf32>,
    %c4_i32_104 = arith.constant 4 : i32
    %312 = arith.index_cast %c4_i32_104 : i32 to index
    %c0_105 = arith.constant 0 : index
    %c0_106 = arith.constant 0 : index
    %313 = vector.load %arg19[%312, %c0_105, %c0_106] : memref<8x8x128xf32, #tpu.memory_space<vmem>>, vector<1x8x128xf32>
    %314 = vector.shape_cast %313 : vector<1x8x128xf32> to vector<8x128xf32>
    %cst_107 = arith.constant dense<0.000000e+00> : vector<8x128xf32>
    %315 = tpu.matmul %307, %213, %cst_107 {dimension_numbers = #tpu.dot_dimension_numbers<[1], [0], [0], [1], [0, 0, 1, 1], [], []>} : vector<8x32xf32>, vector<32x128xf32>, vector<8x128xf32> -> vector<8x128xf32>
    %316 = arith.addf %314, %315 : vector<8x128xf32>
    %317 = arith.negf %316 : vector<8x128xf32>
    %318 = math.exp %317 : vector<8x128xf32>
    %cst_108 = arith.constant 1.000000e+00 : f32
    %319 = vector.broadcast %cst_108 : f32 to vector<8x128xf32>
    %320 = arith.addf %319, %318 : vector<8x128xf32>
    %321 = arith.divf %319, %320 : vector<8x128xf32>
    %322 = math.tanh %316 : vector<8x128xf32>
    %323 = vector.extract_strided_slice %321 {offsets = [0, 0], sizes = [8, 32], strides = [1, 1]} : vector<8x128xf32> to vector<8x32xf32>
    %324 = vector.extract_strided_slice %321 {offsets = [0, 32], sizes = [8, 32], strides = [1, 1]} : vector<8x128xf32> to vector<8x32xf32>
    %325 = vector.extract_strided_slice %322 {offsets = [0, 64], sizes = [8, 32], strides = [1, 1]} : vector<8x128xf32> to vector<8x32xf32>
    %326 = vector.extract_strided_slice %321 {offsets = [0, 96], sizes = [8, 32], strides = [1, 1]} : vector<8x128xf32> to vector<8x32xf32>
    %327 = arith.mulf %324, %305 : vector<8x32xf32>
    %328 = arith.mulf %323, %325 : vector<8x32xf32>
    %329 = arith.addf %327, %328 : vector<8x32xf32>
    %330 = math.tanh %329 : vector<8x32xf32>
    %331 = arith.mulf %326, %330 : vector<8x32xf32>
    %332 = arith.index_cast %c4_i32_104 : i32 to index
    %c0_109 = arith.constant 0 : index
    %c0_110 = arith.constant 0 : index
    %333 = vector.load %arg18[%332, %c0_109, %c0_110] : memref<8x8x32xf32, #tpu.memory_space<vmem>>, vector<1x8x32xf32>
    %334 = vector.shape_cast %333 : vector<1x8x32xf32> to vector<8x32xf32>
    %335 = vector.shape_cast %331 : vector<8x32xf32> to vector<1x8x32xf32>
    tpu.vector_store %arg18[%332, %c0_109, %c0_110], %335 {strides = array<i32>} : memref<8x8x32xf32, #tpu.memory_space<vmem>>, vector<1x8x32xf32>,
    %c5_i32_111 = arith.constant 5 : i32
    %336 = arith.index_cast %c5_i32_111 : i32 to index
    %c0_112 = arith.constant 0 : index
    %c0_113 = arith.constant 0 : index
    %337 = vector.load %arg19[%336, %c0_112, %c0_113] : memref<8x8x128xf32, #tpu.memory_space<vmem>>, vector<1x8x128xf32>
    %338 = vector.shape_cast %337 : vector<1x8x128xf32> to vector<8x128xf32>
    %cst_114 = arith.constant dense<0.000000e+00> : vector<8x128xf32>
    %339 = tpu.matmul %331, %213, %cst_114 {dimension_numbers = #tpu.dot_dimension_numbers<[1], [0], [0], [1], [0, 0, 1, 1], [], []>} : vector<8x32xf32>, vector<32x128xf32>, vector<8x128xf32> -> vector<8x128xf32>
    %340 = arith.addf %338, %339 : vector<8x128xf32>
    %341 = arith.negf %340 : vector<8x128xf32>
    %342 = math.exp %341 : vector<8x128xf32>
    %cst_115 = arith.constant 1.000000e+00 : f32
    %343 = vector.broadcast %cst_115 : f32 to vector<8x128xf32>
    %344 = arith.addf %343, %342 : vector<8x128xf32>
    %345 = arith.divf %343, %344 : vector<8x128xf32>
    %346 = math.tanh %340 : vector<8x128xf32>
    %347 = vector.extract_strided_slice %345 {offsets = [0, 0], sizes = [8, 32], strides = [1, 1]} : vector<8x128xf32> to vector<8x32xf32>
    %348 = vector.extract_strided_slice %345 {offsets = [0, 32], sizes = [8, 32], strides = [1, 1]} : vector<8x128xf32> to vector<8x32xf32>
    %349 = vector.extract_strided_slice %346 {offsets = [0, 64], sizes = [8, 32], strides = [1, 1]} : vector<8x128xf32> to vector<8x32xf32>
    %350 = vector.extract_strided_slice %345 {offsets = [0, 96], sizes = [8, 32], strides = [1, 1]} : vector<8x128xf32> to vector<8x32xf32>
    %351 = arith.mulf %348, %329 : vector<8x32xf32>
    %352 = arith.mulf %347, %349 : vector<8x32xf32>
    %353 = arith.addf %351, %352 : vector<8x32xf32>
    %354 = math.tanh %353 : vector<8x32xf32>
    %355 = arith.mulf %350, %354 : vector<8x32xf32>
    %356 = arith.index_cast %c5_i32_111 : i32 to index
    %c0_116 = arith.constant 0 : index
    %c0_117 = arith.constant 0 : index
    %357 = vector.load %arg18[%356, %c0_116, %c0_117] : memref<8x8x32xf32, #tpu.memory_space<vmem>>, vector<1x8x32xf32>
    %358 = vector.shape_cast %357 : vector<1x8x32xf32> to vector<8x32xf32>
    %359 = vector.shape_cast %355 : vector<8x32xf32> to vector<1x8x32xf32>
    tpu.vector_store %arg18[%356, %c0_116, %c0_117], %359 {strides = array<i32>} : memref<8x8x32xf32, #tpu.memory_space<vmem>>, vector<1x8x32xf32>,
    %c6_i32_118 = arith.constant 6 : i32
    %360 = arith.index_cast %c6_i32_118 : i32 to index
    %c0_119 = arith.constant 0 : index
    %c0_120 = arith.constant 0 : index
    %361 = vector.load %arg19[%360, %c0_119, %c0_120] : memref<8x8x128xf32, #tpu.memory_space<vmem>>, vector<1x8x128xf32>
    %362 = vector.shape_cast %361 : vector<1x8x128xf32> to vector<8x128xf32>
    %cst_121 = arith.constant dense<0.000000e+00> : vector<8x128xf32>
    %363 = tpu.matmul %355, %213, %cst_121 {dimension_numbers = #tpu.dot_dimension_numbers<[1], [0], [0], [1], [0, 0, 1, 1], [], []>} : vector<8x32xf32>, vector<32x128xf32>, vector<8x128xf32> -> vector<8x128xf32>
    %364 = arith.addf %362, %363 : vector<8x128xf32>
    %365 = arith.negf %364 : vector<8x128xf32>
    %366 = math.exp %365 : vector<8x128xf32>
    %cst_122 = arith.constant 1.000000e+00 : f32
    %367 = vector.broadcast %cst_122 : f32 to vector<8x128xf32>
    %368 = arith.addf %367, %366 : vector<8x128xf32>
    %369 = arith.divf %367, %368 : vector<8x128xf32>
    %370 = math.tanh %364 : vector<8x128xf32>
    %371 = vector.extract_strided_slice %369 {offsets = [0, 0], sizes = [8, 32], strides = [1, 1]} : vector<8x128xf32> to vector<8x32xf32>
    %372 = vector.extract_strided_slice %369 {offsets = [0, 32], sizes = [8, 32], strides = [1, 1]} : vector<8x128xf32> to vector<8x32xf32>
    %373 = vector.extract_strided_slice %370 {offsets = [0, 64], sizes = [8, 32], strides = [1, 1]} : vector<8x128xf32> to vector<8x32xf32>
    %374 = vector.extract_strided_slice %369 {offsets = [0, 96], sizes = [8, 32], strides = [1, 1]} : vector<8x128xf32> to vector<8x32xf32>
    %375 = arith.mulf %372, %353 : vector<8x32xf32>
    %376 = arith.mulf %371, %373 : vector<8x32xf32>
    %377 = arith.addf %375, %376 : vector<8x32xf32>
    %378 = math.tanh %377 : vector<8x32xf32>
    %379 = arith.mulf %374, %378 : vector<8x32xf32>
    %380 = arith.index_cast %c6_i32_118 : i32 to index
    %c0_123 = arith.constant 0 : index
    %c0_124 = arith.constant 0 : index
    %381 = vector.load %arg18[%380, %c0_123, %c0_124] : memref<8x8x32xf32, #tpu.memory_space<vmem>>, vector<1x8x32xf32>
    %382 = vector.shape_cast %381 : vector<1x8x32xf32> to vector<8x32xf32>
    %383 = vector.shape_cast %379 : vector<8x32xf32> to vector<1x8x32xf32>
    tpu.vector_store %arg18[%380, %c0_123, %c0_124], %383 {strides = array<i32>} : memref<8x8x32xf32, #tpu.memory_space<vmem>>, vector<1x8x32xf32>,
    %c7_i32_125 = arith.constant 7 : i32
    %384 = arith.index_cast %c7_i32_125 : i32 to index
    %c0_126 = arith.constant 0 : index
    %c0_127 = arith.constant 0 : index
    %385 = vector.load %arg19[%384, %c0_126, %c0_127] : memref<8x8x128xf32, #tpu.memory_space<vmem>>, vector<1x8x128xf32>
    %386 = vector.shape_cast %385 : vector<1x8x128xf32> to vector<8x128xf32>
    %cst_128 = arith.constant dense<0.000000e+00> : vector<8x128xf32>
    %387 = tpu.matmul %379, %213, %cst_128 {dimension_numbers = #tpu.dot_dimension_numbers<[1], [0], [0], [1], [0, 0, 1, 1], [], []>} : vector<8x32xf32>, vector<32x128xf32>, vector<8x128xf32> -> vector<8x128xf32>
    %388 = arith.addf %386, %387 : vector<8x128xf32>
    %389 = arith.negf %388 : vector<8x128xf32>
    %390 = math.exp %389 : vector<8x128xf32>
    %cst_129 = arith.constant 1.000000e+00 : f32
    %391 = vector.broadcast %cst_129 : f32 to vector<8x128xf32>
    %392 = arith.addf %391, %390 : vector<8x128xf32>
    %393 = arith.divf %391, %392 : vector<8x128xf32>
    %394 = math.tanh %388 : vector<8x128xf32>
    %395 = vector.extract_strided_slice %393 {offsets = [0, 0], sizes = [8, 32], strides = [1, 1]} : vector<8x128xf32> to vector<8x32xf32>
    %396 = vector.extract_strided_slice %393 {offsets = [0, 32], sizes = [8, 32], strides = [1, 1]} : vector<8x128xf32> to vector<8x32xf32>
    %397 = vector.extract_strided_slice %394 {offsets = [0, 64], sizes = [8, 32], strides = [1, 1]} : vector<8x128xf32> to vector<8x32xf32>
    %398 = vector.extract_strided_slice %393 {offsets = [0, 96], sizes = [8, 32], strides = [1, 1]} : vector<8x128xf32> to vector<8x32xf32>
    %399 = arith.mulf %396, %377 : vector<8x32xf32>
    %400 = arith.mulf %395, %397 : vector<8x32xf32>
    %401 = arith.addf %399, %400 : vector<8x32xf32>
    %402 = math.tanh %401 : vector<8x32xf32>
    %403 = arith.mulf %398, %402 : vector<8x32xf32>
    %404 = arith.index_cast %c7_i32_125 : i32 to index
    %c0_130 = arith.constant 0 : index
    %c0_131 = arith.constant 0 : index
    %405 = vector.load %arg18[%404, %c0_130, %c0_131] : memref<8x8x32xf32, #tpu.memory_space<vmem>>, vector<1x8x32xf32>
    %406 = vector.shape_cast %405 : vector<1x8x32xf32> to vector<8x32xf32>
    %407 = vector.shape_cast %403 : vector<8x32xf32> to vector<1x8x32xf32>
    tpu.vector_store %arg18[%404, %c0_130, %c0_131], %407 {strides = array<i32>} : memref<8x8x32xf32, #tpu.memory_space<vmem>>, vector<1x8x32xf32>,
    %c8_i32_132 = arith.constant 8 : i32
    %c0_133 = arith.constant 0 : index
    %c0_134 = arith.constant 0 : index
    %c0_135 = arith.constant 0 : index
    %408 = vector.load %arg18[%c0_133, %c0_134, %c0_135] : memref<8x8x32xf32, #tpu.memory_space<vmem>>, vector<8x8x32xf32>
    %409 = vector.shape_cast %408 : vector<8x8x32xf32> to vector<64x32xf32>
    %c0_136 = arith.constant 0 : index
    %c0_137 = arith.constant 0 : index
    %410 = vector.load %arg8[%c0_136, %c0_137] : memref<32x128xf32, #tpu.memory_space<vmem>>, vector<32x128xf32>
    %cst_138 = arith.constant dense<0.000000e+00> : vector<64x128xf32>
    %411 = tpu.matmul %409, %410, %cst_138 {dimension_numbers = #tpu.dot_dimension_numbers<[1], [0], [0], [1], [0, 0, 1, 1], [], []>} : vector<64x32xf32>, vector<32x128xf32>, vector<64x128xf32> -> vector<64x128xf32>
    %c0_139 = arith.constant 0 : index
    %c0_140 = arith.constant 0 : index
    %412 = vector.load %arg10[%c0_139, %c0_140] : memref<1x128xf32, #tpu.memory_space<vmem>>, vector<1x128xf32>
    %413 = vector.broadcast %412 : vector<1x128xf32> to vector<64x128xf32>
    %414 = arith.addf %411, %413 : vector<64x128xf32>
    %415 = vector.shape_cast %414 : vector<64x128xf32> to vector<8x8x128xf32>
    %c0_141 = arith.constant 0 : index
    %c0_142 = arith.constant 0 : index
    %c0_143 = arith.constant 0 : index
    %416 = vector.load %arg19[%c0_141, %c0_142, %c0_143] : memref<8x8x128xf32, #tpu.memory_space<vmem>>, vector<8x8x128xf32>
    tpu.vector_store %arg19[%c0_141, %c0_142, %c0_143], %415 {strides = array<i32>} : memref<8x8x128xf32, #tpu.memory_space<vmem>>, vector<8x8x128xf32>,
    %c0_144 = arith.constant 0 : index
    %c0_145 = arith.constant 0 : index
    %417 = vector.load %arg9[%c0_144, %c0_145] : memref<32x128xf32, #tpu.memory_space<vmem>>, vector<32x128xf32>
    %cst_146 = arith.constant 0.000000e+00 : f32
    %418 = vector.broadcast %cst_146 : f32 to vector<8x32xf32>
    %cst_147 = arith.constant 0.000000e+00 : f32
    %419 = vector.broadcast %cst_147 : f32 to vector<8x32xf32>
    %c0_i32_148 = arith.constant 0 : i32
    %420 = arith.index_cast %c0_i32_148 : i32 to index
    %c0_149 = arith.constant 0 : index
    %c0_150 = arith.constant 0 : index
    %421 = vector.load %arg19[%420, %c0_149, %c0_150] : memref<8x8x128xf32, #tpu.memory_space<vmem>>, vector<1x8x128xf32>
    %422 = vector.shape_cast %421 : vector<1x8x128xf32> to vector<8x128xf32>
    %cst_151 = arith.constant dense<0.000000e+00> : vector<8x128xf32>
    %423 = tpu.matmul %418, %417, %cst_151 {dimension_numbers = #tpu.dot_dimension_numbers<[1], [0], [0], [1], [0, 0, 1, 1], [], []>} : vector<8x32xf32>, vector<32x128xf32>, vector<8x128xf32> -> vector<8x128xf32>
    %424 = arith.addf %422, %423 : vector<8x128xf32>
    %425 = arith.negf %424 : vector<8x128xf32>
    %426 = math.exp %425 : vector<8x128xf32>
    %cst_152 = arith.constant 1.000000e+00 : f32
    %427 = vector.broadcast %cst_152 : f32 to vector<8x128xf32>
    %428 = arith.addf %427, %426 : vector<8x128xf32>
    %429 = arith.divf %427, %428 : vector<8x128xf32>
    %430 = math.tanh %424 : vector<8x128xf32>
    %431 = vector.extract_strided_slice %429 {offsets = [0, 0], sizes = [8, 32], strides = [1, 1]} : vector<8x128xf32> to vector<8x32xf32>
    %432 = vector.extract_strided_slice %429 {offsets = [0, 32], sizes = [8, 32], strides = [1, 1]} : vector<8x128xf32> to vector<8x32xf32>
    %433 = vector.extract_strided_slice %430 {offsets = [0, 64], sizes = [8, 32], strides = [1, 1]} : vector<8x128xf32> to vector<8x32xf32>
    %434 = vector.extract_strided_slice %429 {offsets = [0, 96], sizes = [8, 32], strides = [1, 1]} : vector<8x128xf32> to vector<8x32xf32>
    %435 = arith.mulf %432, %419 : vector<8x32xf32>
    %436 = arith.mulf %431, %433 : vector<8x32xf32>
    %437 = arith.addf %435, %436 : vector<8x32xf32>
    %438 = math.tanh %437 : vector<8x32xf32>
    %439 = arith.mulf %434, %438 : vector<8x32xf32>
    %440 = arith.index_cast %c0_i32_148 : i32 to index
    %c0_153 = arith.constant 0 : index
    %c0_154 = arith.constant 0 : index
    %441 = vector.load %arg17[%440, %c0_153, %c0_154] : memref<8x8x32xf32, #tpu.memory_space<vmem>>, vector<1x8x32xf32>
    %442 = vector.shape_cast %441 : vector<1x8x32xf32> to vector<8x32xf32>
    %443 = vector.shape_cast %439 : vector<8x32xf32> to vector<1x8x32xf32>
    tpu.vector_store %arg17[%440, %c0_153, %c0_154], %443 {strides = array<i32>} : memref<8x8x32xf32, #tpu.memory_space<vmem>>, vector<1x8x32xf32>,
    %c1_i32_155 = arith.constant 1 : i32
    %444 = arith.index_cast %c1_i32_155 : i32 to index
    %c0_156 = arith.constant 0 : index
    %c0_157 = arith.constant 0 : index
    %445 = vector.load %arg19[%444, %c0_156, %c0_157] : memref<8x8x128xf32, #tpu.memory_space<vmem>>, vector<1x8x128xf32>
    %446 = vector.shape_cast %445 : vector<1x8x128xf32> to vector<8x128xf32>
    %cst_158 = arith.constant dense<0.000000e+00> : vector<8x128xf32>
    %447 = tpu.matmul %439, %417, %cst_158 {dimension_numbers = #tpu.dot_dimension_numbers<[1], [0], [0], [1], [0, 0, 1, 1], [], []>} : vector<8x32xf32>, vector<32x128xf32>, vector<8x128xf32> -> vector<8x128xf32>
    %448 = arith.addf %446, %447 : vector<8x128xf32>
    %449 = arith.negf %448 : vector<8x128xf32>
    %450 = math.exp %449 : vector<8x128xf32>
    %cst_159 = arith.constant 1.000000e+00 : f32
    %451 = vector.broadcast %cst_159 : f32 to vector<8x128xf32>
    %452 = arith.addf %451, %450 : vector<8x128xf32>
    %453 = arith.divf %451, %452 : vector<8x128xf32>
    %454 = math.tanh %448 : vector<8x128xf32>
    %455 = vector.extract_strided_slice %453 {offsets = [0, 0], sizes = [8, 32], strides = [1, 1]} : vector<8x128xf32> to vector<8x32xf32>
    %456 = vector.extract_strided_slice %453 {offsets = [0, 32], sizes = [8, 32], strides = [1, 1]} : vector<8x128xf32> to vector<8x32xf32>
    %457 = vector.extract_strided_slice %454 {offsets = [0, 64], sizes = [8, 32], strides = [1, 1]} : vector<8x128xf32> to vector<8x32xf32>
    %458 = vector.extract_strided_slice %453 {offsets = [0, 96], sizes = [8, 32], strides = [1, 1]} : vector<8x128xf32> to vector<8x32xf32>
    %459 = arith.mulf %456, %437 : vector<8x32xf32>
    %460 = arith.mulf %455, %457 : vector<8x32xf32>
    %461 = arith.addf %459, %460 : vector<8x32xf32>
    %462 = math.tanh %461 : vector<8x32xf32>
    %463 = arith.mulf %458, %462 : vector<8x32xf32>
    %464 = arith.index_cast %c1_i32_155 : i32 to index
    %c0_160 = arith.constant 0 : index
    %c0_161 = arith.constant 0 : index
    %465 = vector.load %arg17[%464, %c0_160, %c0_161] : memref<8x8x32xf32, #tpu.memory_space<vmem>>, vector<1x8x32xf32>
    %466 = vector.shape_cast %465 : vector<1x8x32xf32> to vector<8x32xf32>
    %467 = vector.shape_cast %463 : vector<8x32xf32> to vector<1x8x32xf32>
    tpu.vector_store %arg17[%464, %c0_160, %c0_161], %467 {strides = array<i32>} : memref<8x8x32xf32, #tpu.memory_space<vmem>>, vector<1x8x32xf32>,
    %c2_i32_162 = arith.constant 2 : i32
    %468 = arith.index_cast %c2_i32_162 : i32 to index
    %c0_163 = arith.constant 0 : index
    %c0_164 = arith.constant 0 : index
    %469 = vector.load %arg19[%468, %c0_163, %c0_164] : memref<8x8x128xf32, #tpu.memory_space<vmem>>, vector<1x8x128xf32>
    %470 = vector.shape_cast %469 : vector<1x8x128xf32> to vector<8x128xf32>
    %cst_165 = arith.constant dense<0.000000e+00> : vector<8x128xf32>
    %471 = tpu.matmul %463, %417, %cst_165 {dimension_numbers = #tpu.dot_dimension_numbers<[1], [0], [0], [1], [0, 0, 1, 1], [], []>} : vector<8x32xf32>, vector<32x128xf32>, vector<8x128xf32> -> vector<8x128xf32>
    %472 = arith.addf %470, %471 : vector<8x128xf32>
    %473 = arith.negf %472 : vector<8x128xf32>
    %474 = math.exp %473 : vector<8x128xf32>
    %cst_166 = arith.constant 1.000000e+00 : f32
    %475 = vector.broadcast %cst_166 : f32 to vector<8x128xf32>
    %476 = arith.addf %475, %474 : vector<8x128xf32>
    %477 = arith.divf %475, %476 : vector<8x128xf32>
    %478 = math.tanh %472 : vector<8x128xf32>
    %479 = vector.extract_strided_slice %477 {offsets = [0, 0], sizes = [8, 32], strides = [1, 1]} : vector<8x128xf32> to vector<8x32xf32>
    %480 = vector.extract_strided_slice %477 {offsets = [0, 32], sizes = [8, 32], strides = [1, 1]} : vector<8x128xf32> to vector<8x32xf32>
    %481 = vector.extract_strided_slice %478 {offsets = [0, 64], sizes = [8, 32], strides = [1, 1]} : vector<8x128xf32> to vector<8x32xf32>
    %482 = vector.extract_strided_slice %477 {offsets = [0, 96], sizes = [8, 32], strides = [1, 1]} : vector<8x128xf32> to vector<8x32xf32>
    %483 = arith.mulf %480, %461 : vector<8x32xf32>
    %484 = arith.mulf %479, %481 : vector<8x32xf32>
    %485 = arith.addf %483, %484 : vector<8x32xf32>
    %486 = math.tanh %485 : vector<8x32xf32>
    %487 = arith.mulf %482, %486 : vector<8x32xf32>
    %488 = arith.index_cast %c2_i32_162 : i32 to index
    %c0_167 = arith.constant 0 : index
    %c0_168 = arith.constant 0 : index
    %489 = vector.load %arg17[%488, %c0_167, %c0_168] : memref<8x8x32xf32, #tpu.memory_space<vmem>>, vector<1x8x32xf32>
    %490 = vector.shape_cast %489 : vector<1x8x32xf32> to vector<8x32xf32>
    %491 = vector.shape_cast %487 : vector<8x32xf32> to vector<1x8x32xf32>
    tpu.vector_store %arg17[%488, %c0_167, %c0_168], %491 {strides = array<i32>} : memref<8x8x32xf32, #tpu.memory_space<vmem>>, vector<1x8x32xf32>,
    %c3_i32_169 = arith.constant 3 : i32
    %492 = arith.index_cast %c3_i32_169 : i32 to index
    %c0_170 = arith.constant 0 : index
    %c0_171 = arith.constant 0 : index
    %493 = vector.load %arg19[%492, %c0_170, %c0_171] : memref<8x8x128xf32, #tpu.memory_space<vmem>>, vector<1x8x128xf32>
    %494 = vector.shape_cast %493 : vector<1x8x128xf32> to vector<8x128xf32>
    %cst_172 = arith.constant dense<0.000000e+00> : vector<8x128xf32>
    %495 = tpu.matmul %487, %417, %cst_172 {dimension_numbers = #tpu.dot_dimension_numbers<[1], [0], [0], [1], [0, 0, 1, 1], [], []>} : vector<8x32xf32>, vector<32x128xf32>, vector<8x128xf32> -> vector<8x128xf32>
    %496 = arith.addf %494, %495 : vector<8x128xf32>
    %497 = arith.negf %496 : vector<8x128xf32>
    %498 = math.exp %497 : vector<8x128xf32>
    %cst_173 = arith.constant 1.000000e+00 : f32
    %499 = vector.broadcast %cst_173 : f32 to vector<8x128xf32>
    %500 = arith.addf %499, %498 : vector<8x128xf32>
    %501 = arith.divf %499, %500 : vector<8x128xf32>
    %502 = math.tanh %496 : vector<8x128xf32>
    %503 = vector.extract_strided_slice %501 {offsets = [0, 0], sizes = [8, 32], strides = [1, 1]} : vector<8x128xf32> to vector<8x32xf32>
    %504 = vector.extract_strided_slice %501 {offsets = [0, 32], sizes = [8, 32], strides = [1, 1]} : vector<8x128xf32> to vector<8x32xf32>
    %505 = vector.extract_strided_slice %502 {offsets = [0, 64], sizes = [8, 32], strides = [1, 1]} : vector<8x128xf32> to vector<8x32xf32>
    %506 = vector.extract_strided_slice %501 {offsets = [0, 96], sizes = [8, 32], strides = [1, 1]} : vector<8x128xf32> to vector<8x32xf32>
    %507 = arith.mulf %504, %485 : vector<8x32xf32>
    %508 = arith.mulf %503, %505 : vector<8x32xf32>
    %509 = arith.addf %507, %508 : vector<8x32xf32>
    %510 = math.tanh %509 : vector<8x32xf32>
    %511 = arith.mulf %506, %510 : vector<8x32xf32>
    %512 = arith.index_cast %c3_i32_169 : i32 to index
    %c0_174 = arith.constant 0 : index
    %c0_175 = arith.constant 0 : index
    %513 = vector.load %arg17[%512, %c0_174, %c0_175] : memref<8x8x32xf32, #tpu.memory_space<vmem>>, vector<1x8x32xf32>
    %514 = vector.shape_cast %513 : vector<1x8x32xf32> to vector<8x32xf32>
    %515 = vector.shape_cast %511 : vector<8x32xf32> to vector<1x8x32xf32>
    tpu.vector_store %arg17[%512, %c0_174, %c0_175], %515 {strides = array<i32>} : memref<8x8x32xf32, #tpu.memory_space<vmem>>, vector<1x8x32xf32>,
    %c4_i32_176 = arith.constant 4 : i32
    %516 = arith.index_cast %c4_i32_176 : i32 to index
    %c0_177 = arith.constant 0 : index
    %c0_178 = arith.constant 0 : index
    %517 = vector.load %arg19[%516, %c0_177, %c0_178] : memref<8x8x128xf32, #tpu.memory_space<vmem>>, vector<1x8x128xf32>
    %518 = vector.shape_cast %517 : vector<1x8x128xf32> to vector<8x128xf32>
    %cst_179 = arith.constant dense<0.000000e+00> : vector<8x128xf32>
    %519 = tpu.matmul %511, %417, %cst_179 {dimension_numbers = #tpu.dot_dimension_numbers<[1], [0], [0], [1], [0, 0, 1, 1], [], []>} : vector<8x32xf32>, vector<32x128xf32>, vector<8x128xf32> -> vector<8x128xf32>
    %520 = arith.addf %518, %519 : vector<8x128xf32>
    %521 = arith.negf %520 : vector<8x128xf32>
    %522 = math.exp %521 : vector<8x128xf32>
    %cst_180 = arith.constant 1.000000e+00 : f32
    %523 = vector.broadcast %cst_180 : f32 to vector<8x128xf32>
    %524 = arith.addf %523, %522 : vector<8x128xf32>
    %525 = arith.divf %523, %524 : vector<8x128xf32>
    %526 = math.tanh %520 : vector<8x128xf32>
    %527 = vector.extract_strided_slice %525 {offsets = [0, 0], sizes = [8, 32], strides = [1, 1]} : vector<8x128xf32> to vector<8x32xf32>
    %528 = vector.extract_strided_slice %525 {offsets = [0, 32], sizes = [8, 32], strides = [1, 1]} : vector<8x128xf32> to vector<8x32xf32>
    %529 = vector.extract_strided_slice %526 {offsets = [0, 64], sizes = [8, 32], strides = [1, 1]} : vector<8x128xf32> to vector<8x32xf32>
    %530 = vector.extract_strided_slice %525 {offsets = [0, 96], sizes = [8, 32], strides = [1, 1]} : vector<8x128xf32> to vector<8x32xf32>
    %531 = arith.mulf %528, %509 : vector<8x32xf32>
    %532 = arith.mulf %527, %529 : vector<8x32xf32>
    %533 = arith.addf %531, %532 : vector<8x32xf32>
    %534 = math.tanh %533 : vector<8x32xf32>
    %535 = arith.mulf %530, %534 : vector<8x32xf32>
    %536 = arith.index_cast %c4_i32_176 : i32 to index
    %c0_181 = arith.constant 0 : index
    %c0_182 = arith.constant 0 : index
    %537 = vector.load %arg17[%536, %c0_181, %c0_182] : memref<8x8x32xf32, #tpu.memory_space<vmem>>, vector<1x8x32xf32>
    %538 = vector.shape_cast %537 : vector<1x8x32xf32> to vector<8x32xf32>
    %539 = vector.shape_cast %535 : vector<8x32xf32> to vector<1x8x32xf32>
    tpu.vector_store %arg17[%536, %c0_181, %c0_182], %539 {strides = array<i32>} : memref<8x8x32xf32, #tpu.memory_space<vmem>>, vector<1x8x32xf32>,
    %c5_i32_183 = arith.constant 5 : i32
    %540 = arith.index_cast %c5_i32_183 : i32 to index
    %c0_184 = arith.constant 0 : index
    %c0_185 = arith.constant 0 : index
    %541 = vector.load %arg19[%540, %c0_184, %c0_185] : memref<8x8x128xf32, #tpu.memory_space<vmem>>, vector<1x8x128xf32>
    %542 = vector.shape_cast %541 : vector<1x8x128xf32> to vector<8x128xf32>
    %cst_186 = arith.constant dense<0.000000e+00> : vector<8x128xf32>
    %543 = tpu.matmul %535, %417, %cst_186 {dimension_numbers = #tpu.dot_dimension_numbers<[1], [0], [0], [1], [0, 0, 1, 1], [], []>} : vector<8x32xf32>, vector<32x128xf32>, vector<8x128xf32> -> vector<8x128xf32>
    %544 = arith.addf %542, %543 : vector<8x128xf32>
    %545 = arith.negf %544 : vector<8x128xf32>
    %546 = math.exp %545 : vector<8x128xf32>
    %cst_187 = arith.constant 1.000000e+00 : f32
    %547 = vector.broadcast %cst_187 : f32 to vector<8x128xf32>
    %548 = arith.addf %547, %546 : vector<8x128xf32>
    %549 = arith.divf %547, %548 : vector<8x128xf32>
    %550 = math.tanh %544 : vector<8x128xf32>
    %551 = vector.extract_strided_slice %549 {offsets = [0, 0], sizes = [8, 32], strides = [1, 1]} : vector<8x128xf32> to vector<8x32xf32>
    %552 = vector.extract_strided_slice %549 {offsets = [0, 32], sizes = [8, 32], strides = [1, 1]} : vector<8x128xf32> to vector<8x32xf32>
    %553 = vector.extract_strided_slice %550 {offsets = [0, 64], sizes = [8, 32], strides = [1, 1]} : vector<8x128xf32> to vector<8x32xf32>
    %554 = vector.extract_strided_slice %549 {offsets = [0, 96], sizes = [8, 32], strides = [1, 1]} : vector<8x128xf32> to vector<8x32xf32>
    %555 = arith.mulf %552, %533 : vector<8x32xf32>
    %556 = arith.mulf %551, %553 : vector<8x32xf32>
    %557 = arith.addf %555, %556 : vector<8x32xf32>
    %558 = math.tanh %557 : vector<8x32xf32>
    %559 = arith.mulf %554, %558 : vector<8x32xf32>
    %560 = arith.index_cast %c5_i32_183 : i32 to index
    %c0_188 = arith.constant 0 : index
    %c0_189 = arith.constant 0 : index
    %561 = vector.load %arg17[%560, %c0_188, %c0_189] : memref<8x8x32xf32, #tpu.memory_space<vmem>>, vector<1x8x32xf32>
    %562 = vector.shape_cast %561 : vector<1x8x32xf32> to vector<8x32xf32>
    %563 = vector.shape_cast %559 : vector<8x32xf32> to vector<1x8x32xf32>
    tpu.vector_store %arg17[%560, %c0_188, %c0_189], %563 {strides = array<i32>} : memref<8x8x32xf32, #tpu.memory_space<vmem>>, vector<1x8x32xf32>,
    %c6_i32_190 = arith.constant 6 : i32
    %564 = arith.index_cast %c6_i32_190 : i32 to index
    %c0_191 = arith.constant 0 : index
    %c0_192 = arith.constant 0 : index
    %565 = vector.load %arg19[%564, %c0_191, %c0_192] : memref<8x8x128xf32, #tpu.memory_space<vmem>>, vector<1x8x128xf32>
    %566 = vector.shape_cast %565 : vector<1x8x128xf32> to vector<8x128xf32>
    %cst_193 = arith.constant dense<0.000000e+00> : vector<8x128xf32>
    %567 = tpu.matmul %559, %417, %cst_193 {dimension_numbers = #tpu.dot_dimension_numbers<[1], [0], [0], [1], [0, 0, 1, 1], [], []>} : vector<8x32xf32>, vector<32x128xf32>, vector<8x128xf32> -> vector<8x128xf32>
    %568 = arith.addf %566, %567 : vector<8x128xf32>
    %569 = arith.negf %568 : vector<8x128xf32>
    %570 = math.exp %569 : vector<8x128xf32>
    %cst_194 = arith.constant 1.000000e+00 : f32
    %571 = vector.broadcast %cst_194 : f32 to vector<8x128xf32>
    %572 = arith.addf %571, %570 : vector<8x128xf32>
    %573 = arith.divf %571, %572 : vector<8x128xf32>
    %574 = math.tanh %568 : vector<8x128xf32>
    %575 = vector.extract_strided_slice %573 {offsets = [0, 0], sizes = [8, 32], strides = [1, 1]} : vector<8x128xf32> to vector<8x32xf32>
    %576 = vector.extract_strided_slice %573 {offsets = [0, 32], sizes = [8, 32], strides = [1, 1]} : vector<8x128xf32> to vector<8x32xf32>
    %577 = vector.extract_strided_slice %574 {offsets = [0, 64], sizes = [8, 32], strides = [1, 1]} : vector<8x128xf32> to vector<8x32xf32>
    %578 = vector.extract_strided_slice %573 {offsets = [0, 96], sizes = [8, 32], strides = [1, 1]} : vector<8x128xf32> to vector<8x32xf32>
    %579 = arith.mulf %576, %557 : vector<8x32xf32>
    %580 = arith.mulf %575, %577 : vector<8x32xf32>
    %581 = arith.addf %579, %580 : vector<8x32xf32>
    %582 = math.tanh %581 : vector<8x32xf32>
    %583 = arith.mulf %578, %582 : vector<8x32xf32>
    %584 = arith.index_cast %c6_i32_190 : i32 to index
    %c0_195 = arith.constant 0 : index
    %c0_196 = arith.constant 0 : index
    %585 = vector.load %arg17[%584, %c0_195, %c0_196] : memref<8x8x32xf32, #tpu.memory_space<vmem>>, vector<1x8x32xf32>
    %586 = vector.shape_cast %585 : vector<1x8x32xf32> to vector<8x32xf32>
    %587 = vector.shape_cast %583 : vector<8x32xf32> to vector<1x8x32xf32>
    tpu.vector_store %arg17[%584, %c0_195, %c0_196], %587 {strides = array<i32>} : memref<8x8x32xf32, #tpu.memory_space<vmem>>, vector<1x8x32xf32>,
    %c7_i32_197 = arith.constant 7 : i32
    %588 = arith.index_cast %c7_i32_197 : i32 to index
    %c0_198 = arith.constant 0 : index
    %c0_199 = arith.constant 0 : index
    %589 = vector.load %arg19[%588, %c0_198, %c0_199] : memref<8x8x128xf32, #tpu.memory_space<vmem>>, vector<1x8x128xf32>
    %590 = vector.shape_cast %589 : vector<1x8x128xf32> to vector<8x128xf32>
    %cst_200 = arith.constant dense<0.000000e+00> : vector<8x128xf32>
    %591 = tpu.matmul %583, %417, %cst_200 {dimension_numbers = #tpu.dot_dimension_numbers<[1], [0], [0], [1], [0, 0, 1, 1], [], []>} : vector<8x32xf32>, vector<32x128xf32>, vector<8x128xf32> -> vector<8x128xf32>
    %592 = arith.addf %590, %591 : vector<8x128xf32>
    %593 = arith.negf %592 : vector<8x128xf32>
    %594 = math.exp %593 : vector<8x128xf32>
    %cst_201 = arith.constant 1.000000e+00 : f32
    %595 = vector.broadcast %cst_201 : f32 to vector<8x128xf32>
    %596 = arith.addf %595, %594 : vector<8x128xf32>
    %597 = arith.divf %595, %596 : vector<8x128xf32>
    %598 = math.tanh %592 : vector<8x128xf32>
    %599 = vector.extract_strided_slice %597 {offsets = [0, 0], sizes = [8, 32], strides = [1, 1]} : vector<8x128xf32> to vector<8x32xf32>
    %600 = vector.extract_strided_slice %597 {offsets = [0, 32], sizes = [8, 32], strides = [1, 1]} : vector<8x128xf32> to vector<8x32xf32>
    %601 = vector.extract_strided_slice %598 {offsets = [0, 64], sizes = [8, 32], strides = [1, 1]} : vector<8x128xf32> to vector<8x32xf32>
    %602 = vector.extract_strided_slice %597 {offsets = [0, 96], sizes = [8, 32], strides = [1, 1]} : vector<8x128xf32> to vector<8x32xf32>
    %603 = arith.mulf %600, %581 : vector<8x32xf32>
    %604 = arith.mulf %599, %601 : vector<8x32xf32>
    %605 = arith.addf %603, %604 : vector<8x32xf32>
    %606 = math.tanh %605 : vector<8x32xf32>
    %607 = arith.mulf %602, %606 : vector<8x32xf32>
    %608 = arith.index_cast %c7_i32_197 : i32 to index
    %c0_202 = arith.constant 0 : index
    %c0_203 = arith.constant 0 : index
    %609 = vector.load %arg17[%608, %c0_202, %c0_203] : memref<8x8x32xf32, #tpu.memory_space<vmem>>, vector<1x8x32xf32>
    %610 = vector.shape_cast %609 : vector<1x8x32xf32> to vector<8x32xf32>
    %611 = vector.shape_cast %607 : vector<8x32xf32> to vector<1x8x32xf32>
    tpu.vector_store %arg17[%608, %c0_202, %c0_203], %611 {strides = array<i32>} : memref<8x8x32xf32, #tpu.memory_space<vmem>>, vector<1x8x32xf32>,
    %c8_i32_204 = arith.constant 8 : i32
    %c0_205 = arith.constant 0 : index
    %c0_206 = arith.constant 0 : index
    %c0_207 = arith.constant 0 : index
    %612 = vector.load %arg17[%c0_205, %c0_206, %c0_207] : memref<8x8x32xf32, #tpu.memory_space<vmem>>, vector<8x8x32xf32>
    %613 = vector.shape_cast %612 : vector<8x8x32xf32> to vector<64x32xf32>
    %c0_208 = arith.constant 0 : index
    %c0_209 = arith.constant 0 : index
    %614 = vector.load %arg11[%c0_208, %c0_209] : memref<32x128xf32, #tpu.memory_space<vmem>>, vector<32x128xf32>
    %cst_210 = arith.constant dense<0.000000e+00> : vector<64x128xf32>
    %615 = tpu.matmul %613, %614, %cst_210 {dimension_numbers = #tpu.dot_dimension_numbers<[1], [0], [0], [1], [0, 0, 1, 1], [], []>} : vector<64x32xf32>, vector<32x128xf32>, vector<64x128xf32> -> vector<64x128xf32>
    %c0_211 = arith.constant 0 : index
    %c0_212 = arith.constant 0 : index
    %616 = vector.load %arg13[%c0_211, %c0_212] : memref<1x128xf32, #tpu.memory_space<vmem>>, vector<1x128xf32>
    %617 = vector.broadcast %616 : vector<1x128xf32> to vector<64x128xf32>
    %618 = arith.addf %615, %617 : vector<64x128xf32>
    %619 = vector.shape_cast %618 : vector<64x128xf32> to vector<8x8x128xf32>
    %c0_213 = arith.constant 0 : index
    %c0_214 = arith.constant 0 : index
    %c0_215 = arith.constant 0 : index
    %620 = vector.load %arg19[%c0_213, %c0_214, %c0_215] : memref<8x8x128xf32, #tpu.memory_space<vmem>>, vector<8x8x128xf32>
    tpu.vector_store %arg19[%c0_213, %c0_214, %c0_215], %619 {strides = array<i32>} : memref<8x8x128xf32, #tpu.memory_space<vmem>>, vector<8x8x128xf32>,
    %c0_216 = arith.constant 0 : index
    %c0_217 = arith.constant 0 : index
    %621 = vector.load %arg12[%c0_216, %c0_217] : memref<32x128xf32, #tpu.memory_space<vmem>>, vector<32x128xf32>
    %cst_218 = arith.constant 0.000000e+00 : f32
    %622 = vector.broadcast %cst_218 : f32 to vector<8x32xf32>
    %cst_219 = arith.constant 0.000000e+00 : f32
    %623 = vector.broadcast %cst_219 : f32 to vector<8x32xf32>
    %c0_i32_220 = arith.constant 0 : i32
    %624 = arith.index_cast %c0_i32_220 : i32 to index
    %c0_221 = arith.constant 0 : index
    %c0_222 = arith.constant 0 : index
    %625 = vector.load %arg19[%624, %c0_221, %c0_222] : memref<8x8x128xf32, #tpu.memory_space<vmem>>, vector<1x8x128xf32>
    %626 = vector.shape_cast %625 : vector<1x8x128xf32> to vector<8x128xf32>
    %cst_223 = arith.constant dense<0.000000e+00> : vector<8x128xf32>
    %627 = tpu.matmul %622, %621, %cst_223 {dimension_numbers = #tpu.dot_dimension_numbers<[1], [0], [0], [1], [0, 0, 1, 1], [], []>} : vector<8x32xf32>, vector<32x128xf32>, vector<8x128xf32> -> vector<8x128xf32>
    %628 = arith.addf %626, %627 : vector<8x128xf32>
    %629 = arith.negf %628 : vector<8x128xf32>
    %630 = math.exp %629 : vector<8x128xf32>
    %cst_224 = arith.constant 1.000000e+00 : f32
    %631 = vector.broadcast %cst_224 : f32 to vector<8x128xf32>
    %632 = arith.addf %631, %630 : vector<8x128xf32>
    %633 = arith.divf %631, %632 : vector<8x128xf32>
    %634 = math.tanh %628 : vector<8x128xf32>
    %635 = vector.extract_strided_slice %633 {offsets = [0, 0], sizes = [8, 32], strides = [1, 1]} : vector<8x128xf32> to vector<8x32xf32>
    %636 = vector.extract_strided_slice %633 {offsets = [0, 32], sizes = [8, 32], strides = [1, 1]} : vector<8x128xf32> to vector<8x32xf32>
    %637 = vector.extract_strided_slice %634 {offsets = [0, 64], sizes = [8, 32], strides = [1, 1]} : vector<8x128xf32> to vector<8x32xf32>
    %638 = vector.extract_strided_slice %633 {offsets = [0, 96], sizes = [8, 32], strides = [1, 1]} : vector<8x128xf32> to vector<8x32xf32>
    %639 = arith.mulf %636, %623 : vector<8x32xf32>
    %640 = arith.mulf %635, %637 : vector<8x32xf32>
    %641 = arith.addf %639, %640 : vector<8x32xf32>
    %642 = math.tanh %641 : vector<8x32xf32>
    %643 = arith.mulf %638, %642 : vector<8x32xf32>
    %644 = arith.index_cast %c0_i32_220 : i32 to index
    %c0_225 = arith.constant 0 : index
    %c0_226 = arith.constant 0 : index
    %645 = vector.load %arg18[%644, %c0_225, %c0_226] : memref<8x8x32xf32, #tpu.memory_space<vmem>>, vector<1x8x32xf32>
    %646 = vector.shape_cast %645 : vector<1x8x32xf32> to vector<8x32xf32>
    %647 = vector.shape_cast %643 : vector<8x32xf32> to vector<1x8x32xf32>
    tpu.vector_store %arg18[%644, %c0_225, %c0_226], %647 {strides = array<i32>} : memref<8x8x32xf32, #tpu.memory_space<vmem>>, vector<1x8x32xf32>,
    %c1_i32_227 = arith.constant 1 : i32
    %648 = arith.index_cast %c1_i32_227 : i32 to index
    %c0_228 = arith.constant 0 : index
    %c0_229 = arith.constant 0 : index
    %649 = vector.load %arg19[%648, %c0_228, %c0_229] : memref<8x8x128xf32, #tpu.memory_space<vmem>>, vector<1x8x128xf32>
    %650 = vector.shape_cast %649 : vector<1x8x128xf32> to vector<8x128xf32>
    %cst_230 = arith.constant dense<0.000000e+00> : vector<8x128xf32>
    %651 = tpu.matmul %643, %621, %cst_230 {dimension_numbers = #tpu.dot_dimension_numbers<[1], [0], [0], [1], [0, 0, 1, 1], [], []>} : vector<8x32xf32>, vector<32x128xf32>, vector<8x128xf32> -> vector<8x128xf32>
    %652 = arith.addf %650, %651 : vector<8x128xf32>
    %653 = arith.negf %652 : vector<8x128xf32>
    %654 = math.exp %653 : vector<8x128xf32>
    %cst_231 = arith.constant 1.000000e+00 : f32
    %655 = vector.broadcast %cst_231 : f32 to vector<8x128xf32>
    %656 = arith.addf %655, %654 : vector<8x128xf32>
    %657 = arith.divf %655, %656 : vector<8x128xf32>
    %658 = math.tanh %652 : vector<8x128xf32>
    %659 = vector.extract_strided_slice %657 {offsets = [0, 0], sizes = [8, 32], strides = [1, 1]} : vector<8x128xf32> to vector<8x32xf32>
    %660 = vector.extract_strided_slice %657 {offsets = [0, 32], sizes = [8, 32], strides = [1, 1]} : vector<8x128xf32> to vector<8x32xf32>
    %661 = vector.extract_strided_slice %658 {offsets = [0, 64], sizes = [8, 32], strides = [1, 1]} : vector<8x128xf32> to vector<8x32xf32>
    %662 = vector.extract_strided_slice %657 {offsets = [0, 96], sizes = [8, 32], strides = [1, 1]} : vector<8x128xf32> to vector<8x32xf32>
    %663 = arith.mulf %660, %641 : vector<8x32xf32>
    %664 = arith.mulf %659, %661 : vector<8x32xf32>
    %665 = arith.addf %663, %664 : vector<8x32xf32>
    %666 = math.tanh %665 : vector<8x32xf32>
    %667 = arith.mulf %662, %666 : vector<8x32xf32>
    %668 = arith.index_cast %c1_i32_227 : i32 to index
    %c0_232 = arith.constant 0 : index
    %c0_233 = arith.constant 0 : index
    %669 = vector.load %arg18[%668, %c0_232, %c0_233] : memref<8x8x32xf32, #tpu.memory_space<vmem>>, vector<1x8x32xf32>
    %670 = vector.shape_cast %669 : vector<1x8x32xf32> to vector<8x32xf32>
    %671 = vector.shape_cast %667 : vector<8x32xf32> to vector<1x8x32xf32>
    tpu.vector_store %arg18[%668, %c0_232, %c0_233], %671 {strides = array<i32>} : memref<8x8x32xf32, #tpu.memory_space<vmem>>, vector<1x8x32xf32>,
    %c2_i32_234 = arith.constant 2 : i32
    %672 = arith.index_cast %c2_i32_234 : i32 to index
    %c0_235 = arith.constant 0 : index
    %c0_236 = arith.constant 0 : index
    %673 = vector.load %arg19[%672, %c0_235, %c0_236] : memref<8x8x128xf32, #tpu.memory_space<vmem>>, vector<1x8x128xf32>
    %674 = vector.shape_cast %673 : vector<1x8x128xf32> to vector<8x128xf32>
    %cst_237 = arith.constant dense<0.000000e+00> : vector<8x128xf32>
    %675 = tpu.matmul %667, %621, %cst_237 {dimension_numbers = #tpu.dot_dimension_numbers<[1], [0], [0], [1], [0, 0, 1, 1], [], []>} : vector<8x32xf32>, vector<32x128xf32>, vector<8x128xf32> -> vector<8x128xf32>
    %676 = arith.addf %674, %675 : vector<8x128xf32>
    %677 = arith.negf %676 : vector<8x128xf32>
    %678 = math.exp %677 : vector<8x128xf32>
    %cst_238 = arith.constant 1.000000e+00 : f32
    %679 = vector.broadcast %cst_238 : f32 to vector<8x128xf32>
    %680 = arith.addf %679, %678 : vector<8x128xf32>
    %681 = arith.divf %679, %680 : vector<8x128xf32>
    %682 = math.tanh %676 : vector<8x128xf32>
    %683 = vector.extract_strided_slice %681 {offsets = [0, 0], sizes = [8, 32], strides = [1, 1]} : vector<8x128xf32> to vector<8x32xf32>
    %684 = vector.extract_strided_slice %681 {offsets = [0, 32], sizes = [8, 32], strides = [1, 1]} : vector<8x128xf32> to vector<8x32xf32>
    %685 = vector.extract_strided_slice %682 {offsets = [0, 64], sizes = [8, 32], strides = [1, 1]} : vector<8x128xf32> to vector<8x32xf32>
    %686 = vector.extract_strided_slice %681 {offsets = [0, 96], sizes = [8, 32], strides = [1, 1]} : vector<8x128xf32> to vector<8x32xf32>
    %687 = arith.mulf %684, %665 : vector<8x32xf32>
    %688 = arith.mulf %683, %685 : vector<8x32xf32>
    %689 = arith.addf %687, %688 : vector<8x32xf32>
    %690 = math.tanh %689 : vector<8x32xf32>
    %691 = arith.mulf %686, %690 : vector<8x32xf32>
    %692 = arith.index_cast %c2_i32_234 : i32 to index
    %c0_239 = arith.constant 0 : index
    %c0_240 = arith.constant 0 : index
    %693 = vector.load %arg18[%692, %c0_239, %c0_240] : memref<8x8x32xf32, #tpu.memory_space<vmem>>, vector<1x8x32xf32>
    %694 = vector.shape_cast %693 : vector<1x8x32xf32> to vector<8x32xf32>
    %695 = vector.shape_cast %691 : vector<8x32xf32> to vector<1x8x32xf32>
    tpu.vector_store %arg18[%692, %c0_239, %c0_240], %695 {strides = array<i32>} : memref<8x8x32xf32, #tpu.memory_space<vmem>>, vector<1x8x32xf32>,
    %c3_i32_241 = arith.constant 3 : i32
    %696 = arith.index_cast %c3_i32_241 : i32 to index
    %c0_242 = arith.constant 0 : index
    %c0_243 = arith.constant 0 : index
    %697 = vector.load %arg19[%696, %c0_242, %c0_243] : memref<8x8x128xf32, #tpu.memory_space<vmem>>, vector<1x8x128xf32>
    %698 = vector.shape_cast %697 : vector<1x8x128xf32> to vector<8x128xf32>
    %cst_244 = arith.constant dense<0.000000e+00> : vector<8x128xf32>
    %699 = tpu.matmul %691, %621, %cst_244 {dimension_numbers = #tpu.dot_dimension_numbers<[1], [0], [0], [1], [0, 0, 1, 1], [], []>} : vector<8x32xf32>, vector<32x128xf32>, vector<8x128xf32> -> vector<8x128xf32>
    %700 = arith.addf %698, %699 : vector<8x128xf32>
    %701 = arith.negf %700 : vector<8x128xf32>
    %702 = math.exp %701 : vector<8x128xf32>
    %cst_245 = arith.constant 1.000000e+00 : f32
    %703 = vector.broadcast %cst_245 : f32 to vector<8x128xf32>
    %704 = arith.addf %703, %702 : vector<8x128xf32>
    %705 = arith.divf %703, %704 : vector<8x128xf32>
    %706 = math.tanh %700 : vector<8x128xf32>
    %707 = vector.extract_strided_slice %705 {offsets = [0, 0], sizes = [8, 32], strides = [1, 1]} : vector<8x128xf32> to vector<8x32xf32>
    %708 = vector.extract_strided_slice %705 {offsets = [0, 32], sizes = [8, 32], strides = [1, 1]} : vector<8x128xf32> to vector<8x32xf32>
    %709 = vector.extract_strided_slice %706 {offsets = [0, 64], sizes = [8, 32], strides = [1, 1]} : vector<8x128xf32> to vector<8x32xf32>
    %710 = vector.extract_strided_slice %705 {offsets = [0, 96], sizes = [8, 32], strides = [1, 1]} : vector<8x128xf32> to vector<8x32xf32>
    %711 = arith.mulf %708, %689 : vector<8x32xf32>
    %712 = arith.mulf %707, %709 : vector<8x32xf32>
    %713 = arith.addf %711, %712 : vector<8x32xf32>
    %714 = math.tanh %713 : vector<8x32xf32>
    %715 = arith.mulf %710, %714 : vector<8x32xf32>
    %716 = arith.index_cast %c3_i32_241 : i32 to index
    %c0_246 = arith.constant 0 : index
    %c0_247 = arith.constant 0 : index
    %717 = vector.load %arg18[%716, %c0_246, %c0_247] : memref<8x8x32xf32, #tpu.memory_space<vmem>>, vector<1x8x32xf32>
    %718 = vector.shape_cast %717 : vector<1x8x32xf32> to vector<8x32xf32>
    %719 = vector.shape_cast %715 : vector<8x32xf32> to vector<1x8x32xf32>
    tpu.vector_store %arg18[%716, %c0_246, %c0_247], %719 {strides = array<i32>} : memref<8x8x32xf32, #tpu.memory_space<vmem>>, vector<1x8x32xf32>,
    %c4_i32_248 = arith.constant 4 : i32
    %720 = arith.index_cast %c4_i32_248 : i32 to index
    %c0_249 = arith.constant 0 : index
    %c0_250 = arith.constant 0 : index
    %721 = vector.load %arg19[%720, %c0_249, %c0_250] : memref<8x8x128xf32, #tpu.memory_space<vmem>>, vector<1x8x128xf32>
    %722 = vector.shape_cast %721 : vector<1x8x128xf32> to vector<8x128xf32>
    %cst_251 = arith.constant dense<0.000000e+00> : vector<8x128xf32>
    %723 = tpu.matmul %715, %621, %cst_251 {dimension_numbers = #tpu.dot_dimension_numbers<[1], [0], [0], [1], [0, 0, 1, 1], [], []>} : vector<8x32xf32>, vector<32x128xf32>, vector<8x128xf32> -> vector<8x128xf32>
    %724 = arith.addf %722, %723 : vector<8x128xf32>
    %725 = arith.negf %724 : vector<8x128xf32>
    %726 = math.exp %725 : vector<8x128xf32>
    %cst_252 = arith.constant 1.000000e+00 : f32
    %727 = vector.broadcast %cst_252 : f32 to vector<8x128xf32>
    %728 = arith.addf %727, %726 : vector<8x128xf32>
    %729 = arith.divf %727, %728 : vector<8x128xf32>
    %730 = math.tanh %724 : vector<8x128xf32>
    %731 = vector.extract_strided_slice %729 {offsets = [0, 0], sizes = [8, 32], strides = [1, 1]} : vector<8x128xf32> to vector<8x32xf32>
    %732 = vector.extract_strided_slice %729 {offsets = [0, 32], sizes = [8, 32], strides = [1, 1]} : vector<8x128xf32> to vector<8x32xf32>
    %733 = vector.extract_strided_slice %730 {offsets = [0, 64], sizes = [8, 32], strides = [1, 1]} : vector<8x128xf32> to vector<8x32xf32>
    %734 = vector.extract_strided_slice %729 {offsets = [0, 96], sizes = [8, 32], strides = [1, 1]} : vector<8x128xf32> to vector<8x32xf32>
    %735 = arith.mulf %732, %713 : vector<8x32xf32>
    %736 = arith.mulf %731, %733 : vector<8x32xf32>
    %737 = arith.addf %735, %736 : vector<8x32xf32>
    %738 = math.tanh %737 : vector<8x32xf32>
    %739 = arith.mulf %734, %738 : vector<8x32xf32>
    %740 = arith.index_cast %c4_i32_248 : i32 to index
    %c0_253 = arith.constant 0 : index
    %c0_254 = arith.constant 0 : index
    %741 = vector.load %arg18[%740, %c0_253, %c0_254] : memref<8x8x32xf32, #tpu.memory_space<vmem>>, vector<1x8x32xf32>
    %742 = vector.shape_cast %741 : vector<1x8x32xf32> to vector<8x32xf32>
    %743 = vector.shape_cast %739 : vector<8x32xf32> to vector<1x8x32xf32>
    tpu.vector_store %arg18[%740, %c0_253, %c0_254], %743 {strides = array<i32>} : memref<8x8x32xf32, #tpu.memory_space<vmem>>, vector<1x8x32xf32>,
    %c5_i32_255 = arith.constant 5 : i32
    %744 = arith.index_cast %c5_i32_255 : i32 to index
    %c0_256 = arith.constant 0 : index
    %c0_257 = arith.constant 0 : index
    %745 = vector.load %arg19[%744, %c0_256, %c0_257] : memref<8x8x128xf32, #tpu.memory_space<vmem>>, vector<1x8x128xf32>
    %746 = vector.shape_cast %745 : vector<1x8x128xf32> to vector<8x128xf32>
    %cst_258 = arith.constant dense<0.000000e+00> : vector<8x128xf32>
    %747 = tpu.matmul %739, %621, %cst_258 {dimension_numbers = #tpu.dot_dimension_numbers<[1], [0], [0], [1], [0, 0, 1, 1], [], []>} : vector<8x32xf32>, vector<32x128xf32>, vector<8x128xf32> -> vector<8x128xf32>
    %748 = arith.addf %746, %747 : vector<8x128xf32>
    %749 = arith.negf %748 : vector<8x128xf32>
    %750 = math.exp %749 : vector<8x128xf32>
    %cst_259 = arith.constant 1.000000e+00 : f32
    %751 = vector.broadcast %cst_259 : f32 to vector<8x128xf32>
    %752 = arith.addf %751, %750 : vector<8x128xf32>
    %753 = arith.divf %751, %752 : vector<8x128xf32>
    %754 = math.tanh %748 : vector<8x128xf32>
    %755 = vector.extract_strided_slice %753 {offsets = [0, 0], sizes = [8, 32], strides = [1, 1]} : vector<8x128xf32> to vector<8x32xf32>
    %756 = vector.extract_strided_slice %753 {offsets = [0, 32], sizes = [8, 32], strides = [1, 1]} : vector<8x128xf32> to vector<8x32xf32>
    %757 = vector.extract_strided_slice %754 {offsets = [0, 64], sizes = [8, 32], strides = [1, 1]} : vector<8x128xf32> to vector<8x32xf32>
    %758 = vector.extract_strided_slice %753 {offsets = [0, 96], sizes = [8, 32], strides = [1, 1]} : vector<8x128xf32> to vector<8x32xf32>
    %759 = arith.mulf %756, %737 : vector<8x32xf32>
    %760 = arith.mulf %755, %757 : vector<8x32xf32>
    %761 = arith.addf %759, %760 : vector<8x32xf32>
    %762 = math.tanh %761 : vector<8x32xf32>
    %763 = arith.mulf %758, %762 : vector<8x32xf32>
    %764 = arith.index_cast %c5_i32_255 : i32 to index
    %c0_260 = arith.constant 0 : index
    %c0_261 = arith.constant 0 : index
    %765 = vector.load %arg18[%764, %c0_260, %c0_261] : memref<8x8x32xf32, #tpu.memory_space<vmem>>, vector<1x8x32xf32>
    %766 = vector.shape_cast %765 : vector<1x8x32xf32> to vector<8x32xf32>
    %767 = vector.shape_cast %763 : vector<8x32xf32> to vector<1x8x32xf32>
    tpu.vector_store %arg18[%764, %c0_260, %c0_261], %767 {strides = array<i32>} : memref<8x8x32xf32, #tpu.memory_space<vmem>>, vector<1x8x32xf32>,
    %c6_i32_262 = arith.constant 6 : i32
    %768 = arith.index_cast %c6_i32_262 : i32 to index
    %c0_263 = arith.constant 0 : index
    %c0_264 = arith.constant 0 : index
    %769 = vector.load %arg19[%768, %c0_263, %c0_264] : memref<8x8x128xf32, #tpu.memory_space<vmem>>, vector<1x8x128xf32>
    %770 = vector.shape_cast %769 : vector<1x8x128xf32> to vector<8x128xf32>
    %cst_265 = arith.constant dense<0.000000e+00> : vector<8x128xf32>
    %771 = tpu.matmul %763, %621, %cst_265 {dimension_numbers = #tpu.dot_dimension_numbers<[1], [0], [0], [1], [0, 0, 1, 1], [], []>} : vector<8x32xf32>, vector<32x128xf32>, vector<8x128xf32> -> vector<8x128xf32>
    %772 = arith.addf %770, %771 : vector<8x128xf32>
    %773 = arith.negf %772 : vector<8x128xf32>
    %774 = math.exp %773 : vector<8x128xf32>
    %cst_266 = arith.constant 1.000000e+00 : f32
    %775 = vector.broadcast %cst_266 : f32 to vector<8x128xf32>
    %776 = arith.addf %775, %774 : vector<8x128xf32>
    %777 = arith.divf %775, %776 : vector<8x128xf32>
    %778 = math.tanh %772 : vector<8x128xf32>
    %779 = vector.extract_strided_slice %777 {offsets = [0, 0], sizes = [8, 32], strides = [1, 1]} : vector<8x128xf32> to vector<8x32xf32>
    %780 = vector.extract_strided_slice %777 {offsets = [0, 32], sizes = [8, 32], strides = [1, 1]} : vector<8x128xf32> to vector<8x32xf32>
    %781 = vector.extract_strided_slice %778 {offsets = [0, 64], sizes = [8, 32], strides = [1, 1]} : vector<8x128xf32> to vector<8x32xf32>
    %782 = vector.extract_strided_slice %777 {offsets = [0, 96], sizes = [8, 32], strides = [1, 1]} : vector<8x128xf32> to vector<8x32xf32>
    %783 = arith.mulf %780, %761 : vector<8x32xf32>
    %784 = arith.mulf %779, %781 : vector<8x32xf32>
    %785 = arith.addf %783, %784 : vector<8x32xf32>
    %786 = math.tanh %785 : vector<8x32xf32>
    %787 = arith.mulf %782, %786 : vector<8x32xf32>
    %788 = arith.index_cast %c6_i32_262 : i32 to index
    %c0_267 = arith.constant 0 : index
    %c0_268 = arith.constant 0 : index
    %789 = vector.load %arg18[%788, %c0_267, %c0_268] : memref<8x8x32xf32, #tpu.memory_space<vmem>>, vector<1x8x32xf32>
    %790 = vector.shape_cast %789 : vector<1x8x32xf32> to vector<8x32xf32>
    %791 = vector.shape_cast %787 : vector<8x32xf32> to vector<1x8x32xf32>
    tpu.vector_store %arg18[%788, %c0_267, %c0_268], %791 {strides = array<i32>} : memref<8x8x32xf32, #tpu.memory_space<vmem>>, vector<1x8x32xf32>,
    %c7_i32_269 = arith.constant 7 : i32
    %792 = arith.index_cast %c7_i32_269 : i32 to index
    %c0_270 = arith.constant 0 : index
    %c0_271 = arith.constant 0 : index
    %793 = vector.load %arg19[%792, %c0_270, %c0_271] : memref<8x8x128xf32, #tpu.memory_space<vmem>>, vector<1x8x128xf32>
    %794 = vector.shape_cast %793 : vector<1x8x128xf32> to vector<8x128xf32>
    %cst_272 = arith.constant dense<0.000000e+00> : vector<8x128xf32>
    %795 = tpu.matmul %787, %621, %cst_272 {dimension_numbers = #tpu.dot_dimension_numbers<[1], [0], [0], [1], [0, 0, 1, 1], [], []>} : vector<8x32xf32>, vector<32x128xf32>, vector<8x128xf32> -> vector<8x128xf32>
    %796 = arith.addf %794, %795 : vector<8x128xf32>
    %797 = arith.negf %796 : vector<8x128xf32>
    %798 = math.exp %797 : vector<8x128xf32>
    %cst_273 = arith.constant 1.000000e+00 : f32
    %799 = vector.broadcast %cst_273 : f32 to vector<8x128xf32>
    %800 = arith.addf %799, %798 : vector<8x128xf32>
    %801 = arith.divf %799, %800 : vector<8x128xf32>
    %802 = math.tanh %796 : vector<8x128xf32>
    %803 = vector.extract_strided_slice %801 {offsets = [0, 0], sizes = [8, 32], strides = [1, 1]} : vector<8x128xf32> to vector<8x32xf32>
    %804 = vector.extract_strided_slice %801 {offsets = [0, 32], sizes = [8, 32], strides = [1, 1]} : vector<8x128xf32> to vector<8x32xf32>
    %805 = vector.extract_strided_slice %802 {offsets = [0, 64], sizes = [8, 32], strides = [1, 1]} : vector<8x128xf32> to vector<8x32xf32>
    %806 = vector.extract_strided_slice %801 {offsets = [0, 96], sizes = [8, 32], strides = [1, 1]} : vector<8x128xf32> to vector<8x32xf32>
    %807 = arith.mulf %804, %785 : vector<8x32xf32>
    %808 = arith.mulf %803, %805 : vector<8x32xf32>
    %809 = arith.addf %807, %808 : vector<8x32xf32>
    %810 = math.tanh %809 : vector<8x32xf32>
    %811 = arith.mulf %806, %810 : vector<8x32xf32>
    %812 = arith.index_cast %c7_i32_269 : i32 to index
    %c0_274 = arith.constant 0 : index
    %c0_275 = arith.constant 0 : index
    %813 = vector.load %arg18[%812, %c0_274, %c0_275] : memref<8x8x32xf32, #tpu.memory_space<vmem>>, vector<1x8x32xf32>
    %814 = vector.shape_cast %813 : vector<1x8x32xf32> to vector<8x32xf32>
    %815 = vector.shape_cast %811 : vector<8x32xf32> to vector<1x8x32xf32>
    tpu.vector_store %arg18[%812, %c0_274, %c0_275], %815 {strides = array<i32>} : memref<8x8x32xf32, #tpu.memory_space<vmem>>, vector<1x8x32xf32>,
    %c8_i32_276 = arith.constant 8 : i32
    %c0_277 = arith.constant 0 : index
    %c0_278 = arith.constant 0 : index
    %c0_279 = arith.constant 0 : index
    %816 = vector.load %arg18[%c0_277, %c0_278, %c0_279] : memref<8x8x32xf32, #tpu.memory_space<vmem>>, vector<8x8x32xf32>
    %817 = vector.shape_cast %816 : vector<8x8x32xf32> to vector<64x32xf32>
    %c0_280 = arith.constant 0 : index
    %c0_281 = arith.constant 0 : index
    %818 = vector.load %arg14[%c0_280, %c0_281] : memref<32x128xf32, #tpu.memory_space<vmem>>, vector<32x128xf32>
    %cst_282 = arith.constant dense<0.000000e+00> : vector<64x128xf32>
    %819 = tpu.matmul %817, %818, %cst_282 {dimension_numbers = #tpu.dot_dimension_numbers<[1], [0], [0], [1], [0, 0, 1, 1], [], []>} : vector<64x32xf32>, vector<32x128xf32>, vector<64x128xf32> -> vector<64x128xf32>
    %c0_283 = arith.constant 0 : index
    %c0_284 = arith.constant 0 : index
    %820 = vector.load %arg15[%c0_283, %c0_284] : memref<1x128xf32, #tpu.memory_space<vmem>>, vector<1x128xf32>
    %821 = vector.broadcast %820 : vector<1x128xf32> to vector<64x128xf32>
    %822 = arith.addf %819, %821 : vector<64x128xf32>
    %823 = vector.shape_cast %822 : vector<64x128xf32> to vector<8x8x128xf32>
    %c0_285 = arith.constant 0 : index
    %c0_286 = arith.constant 0 : index
    %c0_287 = arith.constant 0 : index
    %824 = vector.load %arg16[%c0_285, %c0_286, %c0_287] : memref<8x8x128xf32, #tpu.memory_space<vmem>>, vector<8x8x128xf32>
    tpu.vector_store %arg16[%c0_285, %c0_286, %c0_287], %823 {strides = array<i32>} : memref<8x8x128xf32, #tpu.memory_space<vmem>>, vector<8x8x128xf32>,
    return
  }
  func.func @transform_0(%arg0: i32) -> (i32, i32, i32) {
    %c0_i32 = arith.constant 0 : i32
    %c0_i32_0 = arith.constant 0 : i32
    %c0_i32_1 = arith.constant 0 : i32
    return %c0_i32, %arg0, %c0_i32_0 : i32, i32, i32
  }
  func.func @transform_1(%arg0: i32) -> (i32, i32) {
    %c0_i32 = arith.constant 0 : i32
    %c0_i32_0 = arith.constant 0 : i32
    %c0_i32_1 = arith.constant 0 : i32
    return %c0_i32, %c0_i32_0 : i32, i32
  }
  func.func @transform_2(%arg0: i32) -> (i32, i32) {
    %c0_i32 = arith.constant 0 : i32
    %c0_i32_0 = arith.constant 0 : i32
    %c0_i32_1 = arith.constant 0 : i32
    return %c0_i32, %c0_i32_0 : i32, i32
  }
  func.func @transform_3(%arg0: i32) -> (i32, i32) {
    %c0_i32 = arith.constant 0 : i32
    %c0_i32_0 = arith.constant 0 : i32
    %c0_i32_1 = arith.constant 0 : i32
    return %c0_i32, %c0_i32_0 : i32, i32
  }
  func.func @transform_4(%arg0: i32) -> (i32, i32) {
    %c0_i32 = arith.constant 0 : i32
    %c0_i32_0 = arith.constant 0 : i32
    %c0_i32_1 = arith.constant 0 : i32
    return %c0_i32, %c0_i32_0 : i32, i32
  }
  func.func @transform_5(%arg0: i32) -> (i32, i32) {
    %c0_i32 = arith.constant 0 : i32
    %c0_i32_0 = arith.constant 0 : i32
    %c0_i32_1 = arith.constant 0 : i32
    return %c0_i32, %c0_i32_0 : i32, i32
  }
  func.func @transform_6(%arg0: i32) -> (i32, i32) {
    %c0_i32 = arith.constant 0 : i32
    %c0_i32_0 = arith.constant 0 : i32
    %c0_i32_1 = arith.constant 0 : i32
    return %c0_i32, %c0_i32_0 : i32, i32
  }
  func.func @transform_7(%arg0: i32) -> (i32, i32) {
    %c0_i32 = arith.constant 0 : i32
    %c0_i32_0 = arith.constant 0 : i32
    %c0_i32_1 = arith.constant 0 : i32
    return %c0_i32, %c0_i32_0 : i32, i32
  }
  func.func @transform_8(%arg0: i32) -> (i32, i32) {
    %c0_i32 = arith.constant 0 : i32
    %c0_i32_0 = arith.constant 0 : i32
    %c0_i32_1 = arith.constant 0 : i32
    return %c0_i32, %c0_i32_0 : i32, i32
  }
  func.func @transform_9(%arg0: i32) -> (i32, i32) {
    %c0_i32 = arith.constant 0 : i32
    %c0_i32_0 = arith.constant 0 : i32
    %c0_i32_1 = arith.constant 0 : i32
    return %c0_i32, %c0_i32_0 : i32, i32
  }
  func.func @transform_10(%arg0: i32) -> (i32, i32) {
    %c0_i32 = arith.constant 0 : i32
    %c0_i32_0 = arith.constant 0 : i32
    %c0_i32_1 = arith.constant 0 : i32
    return %c0_i32, %c0_i32_0 : i32, i32
  }
  func.func @transform_11(%arg0: i32) -> (i32, i32) {
    %c0_i32 = arith.constant 0 : i32
    %c0_i32_0 = arith.constant 0 : i32
    %c0_i32_1 = arith.constant 0 : i32
    return %c0_i32, %c0_i32_0 : i32, i32
  }
  func.func @transform_12(%arg0: i32) -> (i32, i32) {
    %c0_i32 = arith.constant 0 : i32
    %c0_i32_0 = arith.constant 0 : i32
    %c0_i32_1 = arith.constant 0 : i32
    return %c0_i32, %c0_i32_0 : i32, i32
  }
  func.func @transform_13(%arg0: i32) -> (i32, i32) {
    %c0_i32 = arith.constant 0 : i32
    %c0_i32_0 = arith.constant 0 : i32
    %c0_i32_1 = arith.constant 0 : i32
    return %c0_i32, %c0_i32_0 : i32, i32
  }
  func.func @transform_14(%arg0: i32) -> (i32, i32) {
    %c0_i32 = arith.constant 0 : i32
    %c0_i32_0 = arith.constant 0 : i32
    %c0_i32_1 = arith.constant 0 : i32
    return %c0_i32, %c0_i32_0 : i32, i32
  }
  func.func @transform_15(%arg0: i32) -> (i32, i32, i32) {
    %c0_i32 = arith.constant 0 : i32
    %c0_i32_0 = arith.constant 0 : i32
    %c0_i32_1 = arith.constant 0 : i32
    return %c0_i32, %arg0, %c0_i32_0 : i32, i32, i32
  }
}

</mosaic_0001>

<bundles_post_ra>
// kernel: tpu_custom_call.1
= control target key start
LH: loop header
LB: loop body
LE: loop exit
PB: predicated region body
PF: predicated region fallthrough
CT: control target
= control target key end

     0   :  { %20 = vsyncpa [#allocation6], 0  ;;  %s4131_s0 = inlined_call_operand.hbm [shape: f32[8,8,49], index: 0, kind: input, shape index: {}]   ;;  %s4132_s1 = inlined_call_operand.hbm [shape: f32[49,128], index: 1, kind: input, shape index: {}]   ;;  %s4133_s2 = inlined_call_operand.hbm [shape: f32[32,128], index: 2, kind: input, shape index: {}]   ;;  %s4134_s3 = inlined_call_operand.vmem [shape: f32[1,128], index: 3, kind: input, shape index: {}]   ;;  %s4135_s4 = inlined_call_operand.hbm [shape: f32[32,128], index: 4, kind: input, shape index: {}]   ;;  %s4136_s5 = inlined_call_operand.hbm [shape: f32[32,128], index: 5, kind: input, shape index: {}]   ;;  %s4137_s6 = inlined_call_operand.vmem [shape: f32[1,128], index: 6, kind: input, shape index: {}]   ;;  %s4138_s7 = inlined_call_operand.hbm [shape: f32[32,128], index: 7, kind: input, shape index: {}]   ;;  %s4139_s8 = inlined_call_operand.hbm [shape: f32[32,128], index: 8, kind: input, shape index: {}]   ;;  %s4140_s9 = inlined_call_operand.vmem [shape: f32[1,128], index: 9, kind: input, shape index: {}]   ;;  %s4141_s10 = inlined_call_operand.hbm [shape: f32[32,128], index: 10, kind: input, shape index: {}]   ;;  %s4142_s11 = inlined_call_operand.hbm [shape: f32[32,128], index: 11, kind: input, shape index: {}]   ;;  %s4143_s12 = inlined_call_operand.vmem [shape: f32[1,128], index: 12, kind: input, shape index: {}]   ;;  %s4144_s13 = inlined_call_operand.hbm [shape: f32[32,128], index: 13, kind: input, shape index: {}]   ;;  %s4145_s14 = inlined_call_operand.vmem [shape: f32[1,128], index: 14, kind: input, shape index: {}]   ;;  %s4146_s15 = inlined_call_operand.hbm [shape: f32[8,8,128], index: 15, kind: output, shape index: {}]  }
   0x1   :  { %21 = vsyncpa [#allocation9], 0 }
   0x2   :  { %22 = vsyncpa [#allocation12], 0 }
   0x3   :  { %23 = vsyncpa [#allocation15], 0 }
   0x4   :  { %24 = vsyncpa [#allocation18], 0 }
   0x5   :  { %25 = vsyncpa [#allocation21], 0 }
   0x6   :  { %26 = vsyncpa [#allocation7], 0  ;;  %s44_s20 = sshll.u32 %s4132_s1, 4  ;;  %s3491_s21 = smov [#allocation8]   ;;  %s45_s20 = int_to_ptr.hbm [resolvable:$true] %s44_s20 }
   0x7   :  { %s46_s22 = sshll.u32 %s3491_s21, 4  ;;  %s72_s25 = sshll.u32 %s4135_s4, 4  ;;  %s47_s22 = int_to_ptr.vmem [resolvable:$true] %s46_s22  ;;  %s73_s25 = int_to_ptr.hbm [resolvable:$true] %s72_s25 }
   0x8   :  { %s3492_s26 = smov 128   ;;  %s3493_s27 = smov 8  }
   0x9   :  { %52 = dma.hbm_to_vmem [thread:$0]  %s45_s20, 896, %s47_s22, [#allocation9], %s3492_s26, %s3492_s26, %s3493_s27  }
   0xa   :  { %s3494_s28 = smov [#allocation11]   ;;  %s100_s1 = sshll.u32 %s4138_s7, 4  ;;  %s101_s1 = int_to_ptr.hbm [resolvable:$true] %s100_s1 }
   0xb   :  { %s74_s29 = sshll.u32 %s3494_s28, 4  ;;  %s128_s18 = sshll.u32 %s4141_s10, 4  ;;  %s75_s29 = int_to_ptr.vmem [resolvable:$true] %s74_s29  ;;  %s129_s18 = int_to_ptr.hbm [resolvable:$true] %s128_s18 }
   0xc   :  { %80 = dma.hbm_to_vmem [thread:$0]  %s73_s25, 512, %s75_s29, [#allocation12], %s3492_s26, %s3492_s26, %s3493_s27  }
   0xd   :  { %s3495_s19 = smov [#allocation14]   ;;  %s3496_s20 = smov [#allocation17]  }
   0xe   :  { %s102_s21 = sshll.u32 %s3495_s19, 4  ;;  %s130_s7 = sshll.u32 %s3496_s20, 4  ;;  %s103_s21 = int_to_ptr.vmem [resolvable:$true] %s102_s21  ;;  %s131_s7 = int_to_ptr.vmem [resolvable:$true] %s130_s7 }
   0xf   :  { %108 = dma.hbm_to_vmem [thread:$0]  %s101_s1, 512, %s103_s21, [#allocation15], %s3492_s26, %s3492_s26, %s3493_s27  }
  0x10   :  { %s31_s24 = sshll.u32 %s4131_s0, 4  ;;  %s57_s28 = sshll.u32 %s4133_s2, 4  ;;  %s32_s24 = int_to_ptr.hbm [resolvable:$true] %s31_s24  ;;  %s58_s28 = int_to_ptr.hbm [resolvable:$true] %s57_s28 }
  0x11   :  { %136 = dma.hbm_to_vmem [thread:$0]  %s129_s18, 512, %s131_s7, [#allocation18], %s3492_s26, %s3492_s26, %s3493_s27  }
  0x12   :  { %s3497_s29 = smov [#allocation5]   ;;  %s3498_s16 = smov [#allocation10]  }
  0x13   :  { %s33_s30 = sshll.u32 %s3497_s29, 4  ;;  %s59_s0 = sshll.u32 %s3498_s16, 4  ;;  %s34_s30 = int_to_ptr.vmem [resolvable:$true] %s33_s30  ;;  %s60_s0 = int_to_ptr.vmem [resolvable:$true] %s59_s0 }
  0x14   :  { %39 = dma.hbm_to_vmem [thread:$0]  %s32_s24, 1024, %s34_s30, [#allocation6], %s3492_s26, %s3492_s26, %s3493_s27  }
  0x15   :  { %s85_s17 = sshll.u32 %s4136_s5, 4  ;;  %s113_s19 = sshll.u32 %s4139_s8, 4  ;;  %s86_s17 = int_to_ptr.hbm [resolvable:$true] %s85_s17  ;;  %s114_s19 = int_to_ptr.hbm [resolvable:$true] %s113_s19 }
  0x16   :  { %65 = dma.hbm_to_vmem [thread:$0]  %s58_s28, 512, %s60_s0, [#allocation9], %s3492_s26, %s3492_s26, %s3493_s27  }
  0x17   :  { %s3499_s21 = smov [#allocation13]   ;;  %s3500_s7 = smov [#allocation16]  }
  0x18   :  { %s87_s20 = sshll.u32 %s3499_s21, 4  ;;  %s115_s5 = sshll.u32 %s3500_s7, 4  ;;  %s88_s20 = int_to_ptr.vmem [resolvable:$true] %s87_s20  ;;  %s116_s5 = int_to_ptr.vmem [resolvable:$true] %s115_s5 }
  0x19   :  { %93 = dma.hbm_to_vmem [thread:$0]  %s86_s17, 512, %s88_s20, [#allocation12], %s3492_s26, %s3492_s26, %s3493_s27  }
  0x1a   :  { %s141_s24 = sshll.u32 %s4142_s11, 4  ;;  %s156_s25 = sshll.u32 %s4144_s13, 4  ;;  %s142_s24 = int_to_ptr.hbm [resolvable:$true] %s141_s24  ;;  %s157_s25 = int_to_ptr.hbm [resolvable:$true] %s156_s25 }
  0x1b   :  { %121 = dma.hbm_to_vmem [thread:$0]  %s114_s19, 512, %s116_s5, [#allocation15], %s3492_s26, %s3492_s26, %s3493_s27  }
  0x1c   :  { %s3501_s28 = smov [#allocation19]   ;;  %s3502_s30 = smov [#allocation20]  }
  0x1d   :  { %s143_s29 = sshll.u32 %s3501_s28, 4  ;;  %s158_s11 = sshll.u32 %s3502_s30, 4  ;;  %s144_s29 = int_to_ptr.vmem [resolvable:$true] %s143_s29  ;;  %s159_s11 = int_to_ptr.vmem [resolvable:$true] %s158_s11 }
  0x1e   :  { %149 = dma.hbm_to_vmem [thread:$0]  %s142_s24, 512, %s144_s29, [#allocation18], %s3492_s26, %s3492_s26, %s3493_s27  }
  0x1f   :  { %164 = dma.hbm_to_vmem [thread:$0]  %s157_s25, 512, %s159_s11, [#allocation21], %s3492_s26, %s3492_s26, %s3493_s27  }
  0x20   :  { %3477 = dma.done.wait [#allocation6], 1024  }
  0x21   :  { %3478 = vsyncadd [#allocation6], 4294966272 }
  0x22   :  { %3479 = dma.done.wait [#allocation9], 1408  }
  0x23   :  { %3480 = vsyncadd [#allocation9], 4294965888 }
  0x24   :  { %3481 = dma.done.wait [#allocation12], 1024  }
  0x25   :  { %3482 = vsyncadd [#allocation12], 4294966272 }
  0x26   :  { %3483 = dma.done.wait [#allocation15], 1024  }
  0x27   :  { %3484 = vsyncadd [#allocation15], 4294966272 }
  0x28   :  { %3485 = dma.done.wait [#allocation18], 1024  }
  0x29   :  { %3486 = vsyncadd [#allocation18], 4294966272 }
  0x2a   :  { %3487 = dma.done.wait [#allocation21], 512  }
  0x2b   :  { %3488 = vsyncadd [#allocation21], 4294966784  ;;  %vm251_vm0 = vcmask 1040384   ;;  %v221_v0 = vld [vmem:[#allocation8 + $0x30] sm:$0x1]  ;;  %v220_v1 = vld [vmem:[#allocation8 + $0x28] sm:$0xff] }
  0x2c   :  { %2829 = vmatpush.msk.msra.mxu0 %vm251_vm0, %v221_v0  ;;  %v219_v2 = vld [vmem:[#allocation8 + $0x20] sm:$0xff]  ;;  %v307_v3 = vld [vmem:[#allocation10 + $0x18] sm:$0xff]  ;;  %v218_v4 = vld [vmem:[#allocation8 + $0x18] sm:$0xff]  ;;  %vm226_vm1 = vcmask 400384   ;;  %v3503_v19 = vmov 0.0   ;;  %s3505_s0 = smov 32  }
  0x2d   :  { %528 = vmatpush.msra.mxu1 %v307_v3  ;;  %v306_v5 = vld [vmem:[#allocation10 + $0x10] sm:$0xff]  ;;  %596 = vmatpush.msra.mxu2 %v307_v3  ;;  %v217_v6 = vld [vmem:[#allocation8 + $0x10] sm:$0xff]  ;;  %v215_v8 = vld [vmem:[#allocation8] sm:$0xff]  ;;  %vm309_vm6 = vcmask 261120   ;;  %s2811_s24 = sshll.u32 %s4146_s15, 4  ;;  %s2812_s24 = int_to_ptr.hbm [resolvable:$true] %s2811_s24 }
  0x2e   :  { %265 = vmatpush.msra.mxu0 %v220_v1  ;;  %664 = vmatpush.msra.mxu3 %v307_v3  ;;  %v216_v7 = vld [vmem:[#allocation8 + $0x8] sm:$0xff]  ;;  %v207_v9 = vld [vmem:[#allocation5] sm:$0xff]  ;;  %v209_v12 = vld [vmem:[#allocation5 + $0x10] sm:$0xff] }
  0x2f   :  { %529 = vmatpush.msra.mxu1 %v306_v5  ;;  %597 = vmatpush.msra.mxu2 %v306_v5  ;;  %v305_v10 = vld [vmem:[#allocation10 + $0x8] sm:$0xff]  ;;  %v208_v11 = vld [vmem:[#allocation5 + $0x8] sm:$0xff]  ;;  %v304_v13 = vld [vmem:[#allocation10] sm:$0xff] }
  0x30   :  { %266 = vmatpush.msra.mxu0 %v219_v2  ;;  %665 = vmatpush.msra.mxu3 %v306_v5  ;;  %v210_v14 = vld [vmem:[#allocation5 + $0x18] sm:$0xff]  ;;  %v211_v15 = vld [vmem:[#allocation5 + $0x20] sm:$0xff]  ;;  %v212_v16 = vld [vmem:[#allocation5 + $0x28] sm:$0xff] }
  0x31   :  { %530 = vmatpush.msra.mxu1 %v305_v10  ;;  %598 = vmatpush.msra.mxu2 %v305_v10  ;;  %v213_v17 = vld [vmem:[#allocation5 + $0x30] sm:$0xff]  ;;  %v214_v18 = vld [vmem:[#allocation5 + $0x38] sm:$0xff]  ;;  %v2950_v21 = vld [vmem:[%s4134_s3] ss:$0 sm:$0xff]  ;;  %s3504_s3 = smov 64  }
  0x32   :  { %267 = vmatpush.msra.mxu0 %v218_v4  ;;  %666 = vmatpush.msra.mxu3 %v305_v10 }
  0x33   :  { %531 = vmatpush.msra.mxu1 %v304_v13  ;;  %599 = vmatpush.msra.mxu2 %v304_v13 }
  0x34   :  { %268 = vmatpush.msra.mxu0 %v217_v6  ;;  %667 = vmatpush.msra.mxu3 %v304_v13 }
  0x35   :  { %732 = vmatpush.msrb.mxu1 %v307_v3  ;;  %800 = vmatpush.msrb.mxu2 %v307_v3 }
  0x36   :  { %269 = vmatpush.msra.mxu0 %v216_v7 }
  0x37   :  { %733 = vmatpush.msrb.mxu1 %v306_v5  ;;  %801 = vmatpush.msrb.mxu2 %v306_v5 }
  0x38   :  { %270 = vmatpush.msra.mxu0 %v215_v8 }
  0x39   :  { %2830 = vmatmul.msk.f32.vlgmr.msra.gmra.mxu0 %vm226_vm1, %v207_v9  ;;  %734 = vmatpush.msrb.mxu1 %v305_v10 }
  0x3a   :  { %325 = vmatpush.msrb.mxu0 %v307_v3  ;;  %802 = vmatpush.msrb.mxu2 %v305_v10 }
  0x3b   :  { %735 = vmatpush.msrb.mxu1 %v304_v13 }
  0x3c   :  { %326 = vmatpush.msrb.mxu0 %v306_v5  ;;  %803 = vmatpush.msrb.mxu2 %v304_v13 }
  0x3e   :  { %327 = vmatpush.msrb.mxu0 %v305_v10 }
  0x40   :  { %328 = vmatpush.msrb.mxu0 %v304_v13 }
  0x41   :  { %2831 = vmatmul.msk.f32.gmra.mxu0 %vm226_vm1, %v208_v11 }
  0x42   :  { %392 = vmatpush.msra.mxu0 %v307_v3 }
  0x44   :  { %393 = vmatpush.msra.mxu0 %v306_v5 }
  0x46   :  { %394 = vmatpush.msra.mxu0 %v305_v10 }
  0x48   :  { %395 = vmatpush.msra.mxu0 %v304_v13 }
  0x49   :  { %2832 = vmatmul.msk.f32.gmra.mxu0 %vm226_vm1, %v209_v12 }
  0x51   :  { %2833 = vmatmul.msk.f32.gmra.mxu0 %vm226_vm1, %v210_v14 }
  0x59   :  { %2834 = vmatmul.msk.f32.gmra.mxu0 %vm226_vm1, %v211_v15 }
  0x61   :  { %2835 = vmatmul.msk.f32.gmra.mxu0 %vm226_vm1, %v212_v16 }
  0x69   :  { %2836 = vmatmul.msk.f32.gmra.mxu0 %vm226_vm1, %v213_v17 }
  0x71   :  { %2837 = vmatmul.msk.f32.gmra.mxu0 %vm226_vm1, %v214_v18 }
  0x79   :  { %329 = vmatmul.f32.vlgmr.msrb.gmra.mxu0 %v3503_v19 }
  0x7a   :  { %460 = vmatpush.msrb.mxu0 %v307_v3 }
  0x7c   :  { %461 = vmatpush.msrb.mxu0 %v306_v5 }
  0x7e   :  { %462 = vmatpush.msrb.mxu0 %v305_v10 }
  0x80   :  { %463 = vmatpush.msrb.mxu0 %v304_v13 }
  0xb6   :  { %v272_v20 = vpop.f32.mrf.mxu0 }
  0xb7   :  { %v273_v36 = vadd.f32 %v2950_v21, %v272_v20 }
  0xbe   :  { %v275_v22 = vpop.f32.mrf.mxu0 }
  0xbf   :  { %v276_v23 = vadd.f32 %v2950_v21, %v275_v22 }
  0xc6   :  { %v278_v24 = vpop.f32.mrf.mxu0 }
  0xc7   :  { %v3659_v25 = vadd.f32 %v2950_v21, %v278_v24 }
  0xce   :  { %v281_v26 = vpop.f32.mrf.mxu0 }
  0xcf   :  { %v3661_v27 = vadd.f32 %v2950_v21, %v281_v26 }
  0xd6   :  { %v284_v28 = vpop.f32.mrf.mxu0 }
  0xd7   :  { %v3663_v29 = vadd.f32 %v2950_v21, %v284_v28 }
  0xde   :  { %v287_v30 = vpop.f32.mrf.mxu0 }
  0xdf   :  { %v3665_v31 = vadd.f32 %v2950_v21, %v287_v30 }
  0xe6   :  { %v290_v32 = vpop.f32.mrf.mxu0 }
  0xe7   :  { %v3667_v33 = vadd.f32 %v2950_v21, %v290_v32 }
  0xee   :  { %v293_v34 = vpop.f32.mrf.mxu0 }
  0xef   :  { %v3669_v35 = vadd.f32 %v2950_v21, %v293_v34 }
  0xf6   :  { %v330_v37 = vpop.f32.mrf.mxu0 }
  0xf7   :  { %v333_v38 = vadd.f32 %v330_v37, %v273_v36 }
  0xf9   :  { %2955 = vtanh.f32 %v333_v38  ;;  %v2838_v40 = vmul.f32 -1.442695, %v333_v38 }
  0xfb   :  { %2957 = vpow2.f32 %v2838_v40 }
  0xff   :  { %v2956_v39 = vpop.eup %2955 }
 0x100   :  { %356 = vrot.lane.b32.xlu0 %v2956_v39, %s3504_s3 }
 0x101   :  { %v2958_v41 = vpop.eup %2957 }
 0x102   :  { %v337_v42 = vadd.f32 1.0, %v2958_v41 }
 0x104   :  { %2959 = vrcp.f32 %v337_v42  ;;  %v349_v48 = vand.u32 2147483648, %v337_v42  ;;  %vm343_vm3 = vweird.f32 %v337_v42  ;;  %v347_v49 = vand.u32 2147483647, %v337_v42 }
 0x106   :  { %v350_v51 = vor.u32 1.1754944e-38, %v349_v48  ;;  %vm348_vm5 = vcmp.eq.f32.partialorder %v347_v49, 8.507059e+37 }
 0x10a   :  { %v2960_v43 = vpop.eup %2959 }
 0x10b   :  { %v339_v44 = vmul.f32 %v2960_v43, %v337_v42  ;;  %vm344_vm2 = vweird.f32 %v2960_v43 }
 0x10c   :  { %vm345_vm4 = vmor %vm343_vm3, %vm344_vm2 }
 0x10d   :  { %v340_v45 = vsub.f32 1.0, %v339_v44 }
 0x10f   :  { %v341_v46 = vmul.f32 %v2960_v43, %v340_v45 }
 0x111   :  { %v342_v47 = vadd.f32 %v2960_v43, %v341_v46 }
 0x113   :  { %v346_v50 = vsel %vm345_vm4, %v2960_v43, %v342_v47 }
 0x114   :  { %v351_v53 = vsel %vm348_vm5, %v350_v51, %v346_v50 }
 0x115   :  { %v354_v55 = vmul.f32 0.0, %v351_v53 }
 0x172   :  { %v357_v52 = vpop.permute.xlu0 %356 }
 0x173   :  { %v359_v54 = vmul.f32 %v357_v52, %v351_v53 }
 0x175   :  { %361 = vrot.lane.b32.xlu0 %v359_v54, %s3505_s0 }
 0x1e7   :  { %v362_v56 = vpop.permute.xlu0 %361 }
 0x1e8   :  { %v364_v57 = vadd.f32 %v362_v56, %v354_v55 }
 0x1ea   :  { %2961 = vtanh.f32 %v364_v57 }
 0x1f0   :  { %v2962_v58 = vpop.eup %2961 }
 0x1f1   :  { %367 = vrot.lane.b32.xlu1 %v2962_v58, %s3504_s3 }
 0x263   :  { %v368_v59 = vpop.permute.xlu1 %367 }
 0x264   :  { %v370_v60 = vmul.f32 %v368_v59, %v351_v53 }
 0x266   :  { %372 = vrot.lane.b32.xlu1 %v370_v60, %s3505_s0 }
 0x2d8   :  { %v373_v61 = vpop.permute.xlu1 %372 }
 0x2d9   :  { %375 = vst.msk [vmem:[#allocation2] sm:$0xff] %vm309_vm6, %v373_v61  ;;  %2839 = vmatmul.msk.f32.vlgmr.msra.gmra.mxu0 %vm309_vm6, %v373_v61 }
 0x356   :  { %v397_v62 = vpop.f32.mrf.mxu0 }
 0x357   :  { %v400_v63 = vadd.f32 %v397_v62, %v276_v23 }
 0x359   :  { %2963 = vtanh.f32 %v400_v63  ;;  %v2840_v1 = vmul.f32 -1.442695, %v400_v63 }
 0x35b   :  { %2965 = vpow2.f32 %v2840_v1 }
 0x35f   :  { %v2964_v0 = vpop.eup %2963 }
 0x360   :  { %423 = vrot.lane.b32.xlu2 %v2964_v0, %s3504_s3 }
 0x361   :  { %v2966_v2 = vpop.eup %2965 }
 0x362   :  { %v404_v3 = vadd.f32 1.0, %v2966_v2 }
 0x364   :  { %2967 = vrcp.f32 %v404_v3  ;;  %v416_v9 = vand.u32 2147483648, %v404_v3  ;;  %vm410_vm8 = vweird.f32 %v404_v3  ;;  %v414_v10 = vand.u32 2147483647, %v404_v3 }
 0x366   :  { %v417_v12 = vor.u32 1.1754944e-38, %v416_v9  ;;  %vm415_vm10 = vcmp.eq.f32.partialorder %v414_v10, 8.507059e+37 }
 0x36a   :  { %v2968_v4 = vpop.eup %2967 }
 0x36b   :  { %v406_v5 = vmul.f32 %v2968_v4, %v404_v3  ;;  %vm411_vm7 = vweird.f32 %v2968_v4 }
 0x36c   :  { %vm412_vm9 = vmor %vm410_vm8, %vm411_vm7 }
 0x36d   :  { %v407_v6 = vsub.f32 1.0, %v406_v5 }
 0x36f   :  { %v408_v7 = vmul.f32 %v2968_v4, %v407_v6 }
 0x371   :  { %v409_v8 = vadd.f32 %v2968_v4, %v408_v7 }
 0x373   :  { %v413_v11 = vsel %vm412_vm9, %v2968_v4, %v409_v8 }
 0x374   :  { %v418_v14 = vsel %vm415_vm10, %v417_v12, %v413_v11 }
 0x375   :  { %v421_v16 = vmul.f32 %v418_v14, %v364_v57 }
 0x3ba   :  { %v424_v13 = vpop.permute.xlu2 %423 }
 0x3bb   :  { %v426_v15 = vmul.f32 %v424_v13, %v418_v14 }
 0x3bd   :  { %428 = vrot.lane.b32.xlu2 %v426_v15, %s3505_s0 }
 0x417   :  { %v429_v17 = vpop.permute.xlu2 %428 }
 0x418   :  { %v431_v18 = vadd.f32 %v429_v17, %v421_v16 }
 0x41a   :  { %2969 = vtanh.f32 %v431_v18 }
 0x420   :  { %v2970_v20 = vpop.eup %2969 }
 0x421   :  { %434 = vrot.lane.b32.xlu0 %v2970_v20, %s3504_s3 }
 0x493   :  { %v435_v21 = vpop.permute.xlu0 %434 }
 0x494   :  { %v437_v22 = vmul.f32 %v435_v21, %v418_v14 }
 0x496   :  { %439 = vrot.lane.b32.xlu1 %v437_v22, %s3505_s0 }
 0x508   :  { %v440_v23 = vpop.permute.xlu1 %439 }
 0x509   :  { %443 = vst.msk [vmem:[#allocation2 + $0x8] sm:$0xff] %vm309_vm6, %v440_v23  ;;  %2841 = vmatmul.msk.f32.vlgmr.msrb.gmra.mxu0 %vm309_vm6, %v440_v23 }
 0x586   :  { %v465_v24 = vpop.f32.mrf.mxu0 }
 0x587   :  { %v468_v26 = vadd.f32 %v465_v24, %v3659_v25 }
 0x589   :  { %2971 = vtanh.f32 %v468_v26  ;;  %v2842_v30 = vmul.f32 -1.442695, %v468_v26 }
 0x58b   :  { %2973 = vpow2.f32 %v2842_v30 }
 0x58f   :  { %v2972_v28 = vpop.eup %2971 }
 0x590   :  { %491 = vrot.lane.b32.xlu2 %v2972_v28, %s3504_s3 }
 0x591   :  { %v2974_v32 = vpop.eup %2973 }
 0x592   :  { %v472_v34 = vadd.f32 1.0, %v2974_v32 }
 0x594   :  { %2975 = vrcp.f32 %v472_v34  ;;  %v484_v41 = vand.u32 2147483648, %v472_v34  ;;  %vm478_vm12 = vweird.f32 %v472_v34  ;;  %v482_v42 = vand.u32 2147483647, %v472_v34 }
 0x596   :  { %v485_v43 = vor.u32 1.1754944e-38, %v484_v41  ;;  %vm483_vm14 = vcmp.eq.f32.partialorder %v482_v42, 8.507059e+37 }
 0x59a   :  { %v2976_v36 = vpop.eup %2975 }
 0x59b   :  { %v474_v37 = vmul.f32 %v2976_v36, %v472_v34  ;;  %vm479_vm11 = vweird.f32 %v2976_v36 }
 0x59c   :  { %vm480_vm13 = vmor %vm478_vm12, %vm479_vm11 }
 0x59d   :  { %v475_v38 = vsub.f32 1.0, %v474_v37 }
 0x59f   :  { %v476_v39 = vmul.f32 %v2976_v36, %v475_v38 }
 0x5a1   :  { %v477_v40 = vadd.f32 %v2976_v36, %v476_v39 }
 0x5a3   :  { %v481_v25 = vsel %vm480_vm13, %v2976_v36, %v477_v40 }
 0x5a4   :  { %v486_v45 = vsel %vm483_vm14, %v485_v43, %v481_v25  ;;  %v863_v43 = vld [vmem:[#allocation11 + $0x18] sm:$0xff] }
 0x5a5   :  { %v489_v47 = vmul.f32 %v486_v45, %v431_v18  ;;  %904 = vmatpush.msrb.mxu3 %v863_v43 }
 0x5ea   :  { %v492_v44 = vpop.permute.xlu2 %491 }
 0x5eb   :  { %v494_v46 = vmul.f32 %v492_v44, %v486_v45  ;;  %v862_v44 = vld [vmem:[#allocation11 + $0x10] sm:$0xff] }
 0x5ec   :  { %905 = vmatpush.msrb.mxu3 %v862_v44 }
 0x5ed   :  { %496 = vrot.lane.b32.xlu0 %v494_v46, %s3505_s0  ;;  %v860_v46 = vld [vmem:[#allocation11] sm:$0xff] }
 0x65f   :  { %v497_v48 = vpop.permute.xlu0 %496 }
 0x660   :  { %v499_v49 = vadd.f32 %v497_v48, %v489_v47  ;;  %v852_v48 = vld [vmem:[#allocation2] sm:$0xff] }
 0x662   :  { %2977 = vtanh.f32 %v499_v49 }
 0x668   :  { %v2978_v50 = vpop.eup %2977 }
 0x669   :  { %502 = vrot.lane.b32.xlu1 %v2978_v50, %s3504_s3 }
 0x6db   :  { %v503_v51 = vpop.permute.xlu1 %502 }
 0x6dc   :  { %v505_v52 = vmul.f32 %v503_v51, %v486_v45  ;;  %v861_v45 = vld [vmem:[#allocation11 + $0x8] sm:$0xff] }
 0x6dd   :  { %906 = vmatpush.msrb.mxu3 %v861_v45 }
 0x6de   :  { %507 = vrot.lane.b32.xlu2 %v505_v52, %s3505_s0 }
 0x6df   :  { %907 = vmatpush.msrb.mxu3 %v860_v46 }
 0x738   :  { %v508_v53 = vpop.permute.xlu2 %507 }
 0x739   :  { %511 = vst.msk [vmem:[#allocation2 + $0x10] sm:$0xff] %vm309_vm6, %v508_v53  ;;  %2843 = vmatmul.msk.f32.vlgmr.msra.gmra.mxu1 %vm309_vm6, %v508_v53 }
 0x740   :  { %v854_v50 = vld [vmem:[#allocation2 + $0x10] sm:$0xff] }
 0x7b6   :  { %v533_v54 = vpop.f32.mrf.mxu1 }
 0x7b7   :  { %v536_v55 = vadd.f32 %v533_v54, %v3661_v27 }
 0x7b9   :  { %2979 = vtanh.f32 %v536_v55  ;;  %v2844_v57 = vmul.f32 -1.442695, %v536_v55 }
 0x7bb   :  { %2981 = vpow2.f32 %v2844_v57 }
 0x7bf   :  { %v2980_v56 = vpop.eup %2979 }
 0x7c0   :  { %559 = vrot.lane.b32.xlu0 %v2980_v56, %s3504_s3 }
 0x7c1   :  { %v2982_v58 = vpop.eup %2981 }
 0x7c2   :  { %v540_v59 = vadd.f32 1.0, %v2982_v58 }
 0x7c4   :  { %2983 = vrcp.f32 %v540_v59  ;;  %v552_v1 = vand.u32 2147483648, %v540_v59  ;;  %vm546_vm0 = vweird.f32 %v540_v59  ;;  %v550_v2 = vand.u32 2147483647, %v540_v59 }
 0x7c6   :  { %v553_v3 = vor.u32 1.1754944e-38, %v552_v1  ;;  %vm551_vm2 = vcmp.eq.f32.partialorder %v550_v2, 8.507059e+37 }
 0x7ca   :  { %v2984_v60 = vpop.eup %2983 }
 0x7cb   :  { %v542_v61 = vmul.f32 %v2984_v60, %v540_v59  ;;  %vm547_vm15 = vweird.f32 %v2984_v60 }
 0x7cc   :  { %vm548_vm1 = vmor %vm546_vm0, %vm547_vm15 }
 0x7cd   :  { %v543_v62 = vsub.f32 1.0, %v542_v61 }
 0x7cf   :  { %v544_v63 = vmul.f32 %v2984_v60, %v543_v62 }
 0x7d1   :  { %v545_v0 = vadd.f32 %v2984_v60, %v544_v63 }
 0x7d3   :  { %v549_v27 = vsel %vm548_vm1, %v2984_v60, %v545_v0 }
 0x7d4   :  { %v554_v5 = vsel %vm551_vm2, %v553_v3, %v549_v27 }
 0x7d5   :  { %v557_v7 = vmul.f32 %v554_v5, %v499_v49  ;;  %v853_v49 = vld [vmem:[#allocation2 + $0x8] sm:$0xff] }
 0x832   :  { %v560_v4 = vpop.permute.xlu0 %559 }
 0x833   :  { %v562_v6 = vmul.f32 %v560_v4, %v554_v5 }
 0x835   :  { %564 = vrot.lane.b32.xlu1 %v562_v6, %s3505_s0 }
 0x8a7   :  { %v565_v8 = vpop.permute.xlu1 %564 }
 0x8a8   :  { %v567_v9 = vadd.f32 %v565_v8, %v557_v7 }
 0x8aa   :  { %2985 = vtanh.f32 %v567_v9 }
 0x8b0   :  { %v2986_v10 = vpop.eup %2985 }
 0x8b1   :  { %570 = vrot.lane.b32.xlu2 %v2986_v10, %s3504_s3 }
 0x90b   :  { %v571_v11 = vpop.permute.xlu2 %570 }
 0x90c   :  { %v573_v12 = vmul.f32 %v571_v11, %v554_v5  ;;  %v3717_v11 = vld [vmem:[#allocation13 + $0x18] sm:$0xff] }
 0x90d   :  { %958 = vmatpush.msra.mxu1 %v3717_v11 }
 0x90e   :  { %575 = vrot.lane.b32.xlu0 %v573_v12, %s3505_s0  ;;  %v3719_v12 = vld [vmem:[#allocation13 + $0x10] sm:$0xff] }
 0x90f   :  { %959 = vmatpush.msra.mxu1 %v3719_v12 }
 0x980   :  { %v576_v13 = vpop.permute.xlu0 %575 }
 0x981   :  { %579 = vst.msk [vmem:[#allocation2 + $0x18] sm:$0xff] %vm309_vm6, %v576_v13  ;;  %2845 = vmatmul.msk.f32.vlgmr.msra.gmra.mxu2 %vm309_vm6, %v576_v13  ;;  %v3723_v13 = vld [vmem:[#allocation13 + $0x8] sm:$0xff] }
 0x982   :  { %1024 = vmatpush.msra.mxu2 %v3717_v11  ;;  %960 = vmatpush.msra.mxu1 %v3723_v13 }
 0x984   :  { %1025 = vmatpush.msra.mxu2 %v3719_v12 }
 0x986   :  { %1026 = vmatpush.msra.mxu2 %v3723_v13 }
 0x988   :  { %v855_v51 = vld [vmem:[#allocation2 + $0x18] sm:$0xff] }
 0xa04   :  { %v601_v14 = vpop.f32.mrf.mxu2 }
 0xa05   :  { %v604_v15 = vadd.f32 %v601_v14, %v3663_v29  ;;  %v3727_v14 = vld [vmem:[#allocation13] sm:$0xff] }
 0xa06   :  { %961 = vmatpush.msra.mxu1 %v3727_v14  ;;  %1027 = vmatpush.msra.mxu2 %v3727_v14 }
 0xa07   :  { %2987 = vtanh.f32 %v604_v15  ;;  %v2846_v17 = vmul.f32 -1.442695, %v604_v15 }
 0xa09   :  { %2989 = vpow2.f32 %v2846_v17 }
 0xa0d   :  { %v2988_v16 = vpop.eup %2987 }
 0xa0e   :  { %627 = vrot.lane.b32.xlu1 %v2988_v16, %s3504_s3 }
 0xa0f   :  { %v2990_v18 = vpop.eup %2989 }
 0xa10   :  { %v608_v20 = vadd.f32 1.0, %v2990_v18 }
 0xa12   :  { %2991 = vrcp.f32 %v608_v20  ;;  %v620_v28 = vand.u32 2147483648, %v608_v20  ;;  %vm614_vm4 = vweird.f32 %v608_v20  ;;  %v618_v30 = vand.u32 2147483647, %v608_v20 }
 0xa14   :  { %v621_v32 = vor.u32 1.1754944e-38, %v620_v28  ;;  %vm619_vm7 = vcmp.eq.f32.partialorder %v618_v30, 8.507059e+37 }
 0xa18   :  { %v2992_v21 = vpop.eup %2991 }
 0xa19   :  { %v610_v22 = vmul.f32 %v2992_v21, %v608_v20  ;;  %vm615_vm3 = vweird.f32 %v2992_v21  ;;  %v3749_v20 = vld [vmem:[%s4137_s6] ss:$0 sm:$0xff] }
 0xa1a   :  { %vm616_vm5 = vmor %vm614_vm4, %vm615_vm3 }
 0xa1b   :  { %v611_v23 = vsub.f32 1.0, %v610_v22 }
 0xa1d   :  { %v612_v24 = vmul.f32 %v2992_v21, %v611_v23 }
 0xa1f   :  { %v613_v26 = vadd.f32 %v2992_v21, %v612_v24 }
 0xa21   :  { %v617_v29 = vsel %vm616_vm5, %v2992_v21, %v613_v26 }
 0xa22   :  { %v622_v36 = vsel %vm619_vm7, %v621_v32, %v617_v29 }
 0xa23   :  { %v625_v38 = vmul.f32 %v622_v36, %v567_v9 }
 0xa80   :  { %v628_v34 = vpop.permute.xlu1 %627 }
 0xa81   :  { %v630_v37 = vmul.f32 %v628_v34, %v622_v36 }
 0xa83   :  { %632 = vrot.lane.b32.xlu2 %v630_v37, %s3505_s0 }
 0xadd   :  { %v633_v39 = vpop.permute.xlu2 %632 }
 0xade   :  { %v635_v40 = vadd.f32 %v633_v39, %v625_v38 }
 0xae0   :  { %2993 = vtanh.f32 %v635_v40 }
 0xae6   :  { %v2994_v41 = vpop.eup %2993 }
 0xae7   :  { %638 = vrot.lane.b32.xlu0 %v2994_v41, %s3504_s3 }
 0xb59   :  { %v639_v42 = vpop.permute.xlu0 %638 }
 0xb5a   :  { %v641_v25 = vmul.f32 %v639_v42, %v622_v36 }
 0xb5c   :  { %643 = vrot.lane.b32.xlu1 %v641_v25, %s3505_s0 }
 0xbce   :  { %v644_v47 = vpop.permute.xlu1 %643 }
 0xbcf   :  { %647 = vst.msk [vmem:[#allocation2 + $0x20] sm:$0xff] %vm309_vm6, %v644_v47  ;;  %2847 = vmatmul.msk.f32.vlgmr.msra.gmra.mxu3 %vm309_vm6, %v644_v47 }
 0xbd6   :  { %v856_v52 = vld [vmem:[#allocation2 + $0x20] sm:$0xff] }
 0xbd7   :  { %2853 = vmatmul.msk.f32.vlgmr.msrb.gmra.mxu3 %vm309_vm6, %v852_v48 }
 0xbdf   :  { %2854 = vmatmul.msk.f32.gmra.mxu3 %vm309_vm6, %v853_v49 }
 0xbe7   :  { %2855 = vmatmul.msk.f32.gmra.mxu3 %vm309_vm6, %v854_v50 }
 0xbef   :  { %2856 = vmatmul.msk.f32.gmra.mxu3 %vm309_vm6, %v855_v51 }
 0xbf7   :  { %2857 = vmatmul.msk.f32.gmra.mxu3 %vm309_vm6, %v856_v52 }
 0xc52   :  { %v669_v53 = vpop.f32.mrf.mxu3 }
 0xc53   :  { %v672_v54 = vadd.f32 %v669_v53, %v3665_v31 }
 0xc55   :  { %2995 = vtanh.f32 %v672_v54  ;;  %v2848_v56 = vmul.f32 -1.442695, %v672_v54 }
 0xc57   :  { %2997 = vpow2.f32 %v2848_v56 }
 0xc5a   :  { %v909_v21 = vpop.f32.mrf.mxu3 }
 0xc5b   :  { %v2996_v55 = vpop.eup %2995  ;;  %v910_v22 = vadd.f32 %v3749_v20, %v909_v21 }
 0xc5c   :  { %695 = vrot.lane.b32.xlu2 %v2996_v55, %s3504_s3 }
 0xc5d   :  { %v2998_v57 = vpop.eup %2997 }
 0xc5e   :  { %v676_v58 = vadd.f32 1.0, %v2998_v57 }
 0xc60   :  { %2999 = vrcp.f32 %v676_v58  ;;  %v688_v0 = vand.u32 2147483648, %v676_v58  ;;  %vm682_vm9 = vweird.f32 %v676_v58  ;;  %v686_v1 = vand.u32 2147483647, %v676_v58 }
 0xc62   :  { %v689_v2 = vor.u32 1.1754944e-38, %v688_v0  ;;  %vm687_vm11 = vcmp.eq.f32.partialorder %v686_v1, 8.507059e+37 }
 0xc66   :  { %v3000_v59 = vpop.eup %2999 }
 0xc67   :  { %v678_v60 = vmul.f32 %v3000_v59, %v676_v58  ;;  %vm683_vm8 = vweird.f32 %v3000_v59 }
 0xc68   :  { %vm684_vm10 = vmor %vm682_vm9, %vm683_vm8 }
 0xc69   :  { %v679_v61 = vsub.f32 1.0, %v678_v60 }
 0xc6b   :  { %v680_v62 = vmul.f32 %v3000_v59, %v679_v61 }
 0xc6d   :  { %v681_v63 = vadd.f32 %v3000_v59, %v680_v62 }
 0xc6f   :  { %v685_v31 = vsel %vm684_vm10, %v3000_v59, %v681_v63 }
 0xc70   :  { %v690_v3 = vsel %vm687_vm11, %v689_v2, %v685_v31 }
 0xc71   :  { %v693_v5 = vmul.f32 %v690_v3, %v635_v40 }
 0xcb6   :  { %v696_v27 = vpop.permute.xlu2 %695 }
 0xcb7   :  { %v698_v4 = vmul.f32 %v696_v27, %v690_v3 }
 0xcb9   :  { %700 = vrot.lane.b32.xlu0 %v698_v4, %s3505_s0 }
 0xd2b   :  { %v701_v6 = vpop.permute.xlu0 %700 }
 0xd2c   :  { %v3712_v7 = vadd.f32 %v701_v6, %v693_v5 }
 0xd2e   :  { %3001 = vtanh.f32 %v3712_v7 }
 0xd34   :  { %v3002_v8 = vpop.eup %3001 }
 0xd35   :  { %706 = vrot.lane.b32.xlu1 %v3002_v8, %s3504_s3 }
 0xda7   :  { %v707_v9 = vpop.permute.xlu1 %706 }
 0xda8   :  { %v709_v10 = vmul.f32 %v707_v9, %v690_v3 }
 0xdaa   :  { %711 = vrot.lane.b32.xlu2 %v709_v10, %s3505_s0 }
 0xe04   :  { %v712_v15 = vpop.permute.xlu2 %711 }
 0xe05   :  { %715 = vst.msk [vmem:[#allocation2 + $0x28] sm:$0xff] %vm309_vm6, %v712_v15  ;;  %2849 = vmatmul.msk.f32.vlgmr.msrb.gmra.mxu1 %vm309_vm6, %v712_v15  ;;  %v912_v15 = vpop.f32.mrf.mxu3 }
 0xe06   :  { %1091 = vmatpush.msrb.mxu1 %v3717_v11 }
 0xe08   :  { %1092 = vmatpush.msrb.mxu1 %v3719_v12 }
 0xe0a   :  { %1093 = vmatpush.msrb.mxu1 %v3723_v13 }
 0xe0c   :  { %v857_v16 = vld [vmem:[#allocation2 + $0x28] sm:$0xff]  ;;  %1094 = vmatpush.msrb.mxu1 %v3727_v14 }
 0xe0d   :  { %2858 = vmatmul.msk.f32.gmra.mxu3 %vm309_vm6, %v857_v16  ;;  %962 = vmatmul.f32.vlgmr.msra.gmra.mxu1 %v3503_v19  ;;  %v913_v16 = vadd.f32 %v3749_v20, %v912_v15 }
 0xe0e   :  { %1225 = vmatpush.msra.mxu1 %v3717_v11 }
 0xe10   :  { %1226 = vmatpush.msra.mxu1 %v3719_v12 }
 0xe12   :  { %1227 = vmatpush.msra.mxu1 %v3723_v13 }
 0xe14   :  { %1228 = vmatpush.msra.mxu1 %v3727_v14 }
 0xe82   :  { %v737_v17 = vpop.f32.mrf.mxu1 }
 0xe83   :  { %v740_v18 = vadd.f32 %v737_v17, %v3667_v33 }
 0xe85   :  { %3003 = vtanh.f32 %v740_v18  ;;  %v2850_v30 = vmul.f32 -1.442695, %v740_v18 }
 0xe8a   :  { %v963_v23 = vpop.f32.mrf.mxu1 }
 0xe8b   :  { %v3004_v24 = vpop.eup %3003  ;;  %v966_v26 = vadd.f32 %v963_v23, %v910_v22 }
 0xe8c   :  { %763 = vrot.lane.b32.xlu0 %v3004_v24, %s3504_s3 }
 0xe8d   :  { %3005 = vtanh.f32 %v966_v26  ;;  %v2861_v33 = vmul.f32 -1.442695, %v966_v26 }
 0xe8e   :  { %3007 = vpow2.f32 %v2850_v30 }
 0xe8f   :  { %3009 = vpow2.f32 %v2861_v33 }
 0xe93   :  { %v3006_v28 = vpop.eup %3005 }
 0xe94   :  { %989 = vrot.lane.b32.xlu1 %v3006_v28, %s3504_s3  ;;  %v3008_v29 = vpop.eup %3007 }
 0xe95   :  { %v744_v32 = vadd.f32 1.0, %v3008_v29  ;;  %v3010_v34 = vpop.eup %3009 }
 0xe96   :  { %v970_v36 = vadd.f32 1.0, %v3010_v34 }
 0xe97   :  { %3011 = vrcp.f32 %v744_v32  ;;  %v756_v44 = vand.u32 2147483648, %v744_v32  ;;  %vm750_vm13 = vweird.f32 %v744_v32  ;;  %v754_v45 = vand.u32 2147483647, %v744_v32 }
 0xe98   :  { %3013 = vrcp.f32 %v970_v36  ;;  %v982_v53 = vand.u32 2147483648, %v970_v36  ;;  %vm976_vm1 = vweird.f32 %v970_v36  ;;  %v980_v54 = vand.u32 2147483647, %v970_v36 }
 0xe99   :  { %v757_v48 = vor.u32 1.1754944e-38, %v756_v44  ;;  %vm755_vm15 = vcmp.eq.f32.partialorder %v754_v45, 8.507059e+37 }
 0xe9a   :  { %v983_v56 = vor.u32 1.1754944e-38, %v982_v53  ;;  %vm981_vm3 = vcmp.eq.f32.partialorder %v980_v54, 8.507059e+37 }
 0xe9d   :  { %v3012_v37 = vpop.eup %3011 }
 0xe9e   :  { %v746_v38 = vmul.f32 %v3012_v37, %v744_v32  ;;  %v3014_v40 = vpop.eup %3013  ;;  %vm751_vm12 = vweird.f32 %v3012_v37 }
 0xe9f   :  { %v972_v42 = vmul.f32 %v3014_v40, %v970_v36  ;;  %vm752_vm14 = vmor %vm750_vm13, %vm751_vm12  ;;  %vm977_vm0 = vweird.f32 %v3014_v40 }
 0xea0   :  { %v747_v39 = vsub.f32 1.0, %v746_v38  ;;  %vm978_vm2 = vmor %vm976_vm1, %vm977_vm0 }
 0xea1   :  { %v973_v43 = vsub.f32 1.0, %v972_v42 }
 0xea2   :  { %v748_v41 = vmul.f32 %v3012_v37, %v747_v39 }
 0xea3   :  { %v974_v47 = vmul.f32 %v3014_v40, %v973_v43 }
 0xea4   :  { %v749_v25 = vadd.f32 %v3012_v37, %v748_v41 }
 0xea5   :  { %v975_v52 = vadd.f32 %v3014_v40, %v974_v47 }
 0xea6   :  { %v753_v46 = vsel %vm752_vm14, %v3012_v37, %v749_v25 }
 0xea7   :  { %v758_v50 = vsel %vm755_vm15, %v757_v48, %v753_v46  ;;  %v979_v55 = vsel %vm978_vm2, %v3014_v40, %v975_v52  ;;  %v915_v46 = vpop.f32.mrf.mxu3 }
 0xea8   :  { %v984_v58 = vsel %vm981_vm3, %v983_v56, %v979_v55  ;;  %v761_v60 = vmul.f32 %v758_v50, %v3712_v7  ;;  %v916_v47 = vadd.f32 %v3749_v20, %v915_v46 }
 0xea9   :  { %v987_v0 = vmul.f32 0.0, %v984_v58 }
 0xefe   :  { %v764_v49 = vpop.permute.xlu0 %763 }
 0xeff   :  { %v766_v51 = vmul.f32 %v764_v49, %v758_v50 }
 0xf01   :  { %768 = vrot.lane.b32.xlu2 %v766_v51, %s3505_s0 }
 0xf06   :  { %v990_v57 = vpop.permute.xlu1 %989 }
 0xf07   :  { %v992_v59 = vmul.f32 %v990_v57, %v984_v58 }
 0xf09   :  { %994 = vrot.lane.b32.xlu0 %v992_v59, %s3505_s0 }
 0xf5b   :  { %v769_v61 = vpop.permute.xlu2 %768 }
 0xf5c   :  { %v3757_v62 = vadd.f32 %v769_v61, %v761_v60 }
 0xf5e   :  { %3015 = vtanh.f32 %v3757_v62 }
 0xf64   :  { %v3016_v63 = vpop.eup %3015 }
 0xf65   :  { %774 = vrot.lane.b32.xlu1 %v3016_v63, %s3504_s3 }
 0xf7b   :  { %v995_v1 = vpop.permute.xlu0 %994 }
 0xf7c   :  { %v997_v31 = vadd.f32 %v995_v1, %v987_v0 }
 0xf7e   :  { %3017 = vtanh.f32 %v997_v31 }
 0xf84   :  { %v3018_v2 = vpop.eup %3017 }
 0xf85   :  { %1000 = vrot.lane.b32.xlu2 %v3018_v2, %s3504_s3 }
 0xfd7   :  { %v775_v27 = vpop.permute.xlu1 %774 }
 0xfd8   :  { %v777_v3 = vmul.f32 %v775_v27, %v758_v50 }
 0xfda   :  { %779 = vrot.lane.b32.xlu0 %v777_v3, %s3505_s0 }
 0xfdf   :  { %v1001_v4 = vpop.permute.xlu2 %1000 }
 0xfe0   :  { %v1003_v5 = vmul.f32 %v1001_v4, %v984_v58 }
 0xfe2   :  { %1005 = vrot.lane.b32.xlu1 %v1003_v5, %s3505_s0 }
0x104c   :  { %v780_v6 = vpop.permute.xlu0 %779 }
0x104d   :  { %783 = vst.msk [vmem:[#allocation2 + $0x30] sm:$0xff] %vm309_vm6, %v780_v6  ;;  %2851 = vmatmul.msk.f32.vlgmr.msrb.gmra.mxu2 %vm309_vm6, %v780_v6 }
0x104e   :  { %1158 = vmatpush.msrb.mxu2 %v3717_v11 }
0x1050   :  { %1159 = vmatpush.msrb.mxu2 %v3719_v12 }
0x1052   :  { %1160 = vmatpush.msrb.mxu2 %v3723_v13 }
0x1054   :  { %v1006_v7 = vpop.permute.xlu1 %1005  ;;  %v858_v8 = vld [vmem:[#allocation2 + $0x30] sm:$0xff]  ;;  %1161 = vmatpush.msrb.mxu2 %v3727_v14 }
0x1055   :  { %1008 = vst.msk [vmem:[#allocation3] sm:$0xff] %vm309_vm6, %v1006_v7  ;;  %2859 = vmatmul.msk.f32.gmra.mxu3 %vm309_vm6, %v858_v8  ;;  %2862 = vmatmul.msk.f32.vlgmr.msra.gmra.mxu2 %vm309_vm6, %v1006_v7  ;;  %v918_v8 = vpop.f32.mrf.mxu3 }
0x1056   :  { %1292 = vmatpush.msra.mxu2 %v3717_v11 }
0x1058   :  { %1293 = vmatpush.msra.mxu2 %v3719_v12 }
0x105a   :  { %1294 = vmatpush.msra.mxu2 %v3723_v13 }
0x105c   :  { %1295 = vmatpush.msra.mxu2 %v3727_v14 }
0x10d0   :  { %v805_v9 = vpop.f32.mrf.mxu2 }
0x10d1   :  { %v3778_v10 = vadd.f32 %v805_v9, %v3669_v35  ;;  %v919_v9 = vadd.f32 %v3749_v20, %v918_v8 }
0x10d8   :  { %v1029_v17 = vpop.f32.mrf.mxu2 }
0x10d9   :  { %v1032_v18 = vadd.f32 %v1029_v17, %v913_v16 }
0x10db   :  { %3019 = vtanh.f32 %v1032_v18  ;;  %v2863_v22 = vmul.f32 -1.442695, %v1032_v18 }
0x10dd   :  { %3021 = vpow2.f32 %v2863_v22 }
0x10e1   :  { %v3020_v21 = vpop.eup %3019 }
0x10e2   :  { %1055 = vrot.lane.b32.xlu2 %v3020_v21, %s3504_s3 }
0x10e3   :  { %v3022_v23 = vpop.eup %3021 }
0x10e4   :  { %v1036_v24 = vadd.f32 1.0, %v3022_v23 }
0x10e6   :  { %3023 = vrcp.f32 %v1036_v24  ;;  %v1048_v29 = vand.u32 2147483648, %v1036_v24  ;;  %vm1042_vm5 = vweird.f32 %v1036_v24  ;;  %v1046_v32 = vand.u32 2147483647, %v1036_v24 }
0x10e8   :  { %v1049_v36 = vor.u32 1.1754944e-38, %v1048_v29  ;;  %vm1047_vm8 = vcmp.eq.f32.partialorder %v1046_v32, 8.507059e+37 }
0x10ec   :  { %v3024_v26 = vpop.eup %3023 }
0x10ed   :  { %v1038_v28 = vmul.f32 %v3024_v26, %v1036_v24  ;;  %vm1043_vm4 = vweird.f32 %v3024_v26 }
0x10ee   :  { %vm1044_vm7 = vmor %vm1042_vm5, %vm1043_vm4 }
0x10ef   :  { %v1039_v30 = vsub.f32 1.0, %v1038_v28 }
0x10f1   :  { %v1040_v33 = vmul.f32 %v3024_v26, %v1039_v30 }
0x10f3   :  { %v1041_v35 = vadd.f32 %v3024_v26, %v1040_v33 }
0x10f5   :  { %v1045_v34 = vsel %vm1044_vm7, %v3024_v26, %v1041_v35 }
0x10f6   :  { %v1050_v38 = vsel %vm1047_vm8, %v1049_v36, %v1045_v34 }
0x10f7   :  { %v1053_v40 = vmul.f32 %v1050_v38, %v997_v31 }
0x113c   :  { %v1056_v37 = vpop.permute.xlu2 %1055 }
0x113d   :  { %v1058_v39 = vmul.f32 %v1056_v37, %v1050_v38 }
0x113f   :  { %1060 = vrot.lane.b32.xlu0 %v1058_v39, %s3505_s0 }
0x11b1   :  { %v1061_v41 = vpop.permute.xlu0 %1060 }
0x11b2   :  { %v1063_v42 = vadd.f32 %v1061_v41, %v1053_v40  ;;  %v921_v41 = vpop.f32.mrf.mxu3 }
0x11b4   :  { %3025 = vtanh.f32 %v1063_v42 }
0x11ba   :  { %v3026_v25 = vpop.eup %3025 }
0x11bb   :  { %1066 = vrot.lane.b32.xlu1 %v3026_v25, %s3504_s3 }
0x122d   :  { %v1067_v43 = vpop.permute.xlu1 %1066 }
0x122e   :  { %v1069_v44 = vmul.f32 %v1067_v43, %v1050_v38 }
0x1230   :  { %1071 = vrot.lane.b32.xlu2 %v1069_v44, %s3505_s0 }
0x128a   :  { %v1072_v45 = vpop.permute.xlu2 %1071 }
0x128b   :  { %1075 = vst.msk [vmem:[#allocation3 + $0x8] sm:$0xff] %vm309_vm6, %v1072_v45  ;;  %2864 = vmatmul.msk.f32.vlgmr.msrb.gmra.mxu1 %vm309_vm6, %v1072_v45 }
0x128c   :  { %1359 = vmatpush.msrb.mxu1 %v3717_v11 }
0x128e   :  { %1360 = vmatpush.msrb.mxu1 %v3719_v12 }
0x1290   :  { %1361 = vmatpush.msrb.mxu1 %v3723_v13 }
0x1292   :  { %1362 = vmatpush.msrb.mxu1 %v3727_v14 }
0x1308   :  { %v1096_v48 = vpop.f32.mrf.mxu1 }
0x1309   :  { %v1099_v49 = vadd.f32 %v1096_v48, %v916_v47 }
0x130b   :  { %3027 = vtanh.f32 %v1099_v49  ;;  %v2865_v51 = vmul.f32 -1.442695, %v1099_v49 }
0x130d   :  { %3029 = vpow2.f32 %v2865_v51 }
0x1311   :  { %v3028_v50 = vpop.eup %3027 }
0x1312   :  { %1122 = vrot.lane.b32.xlu0 %v3028_v50, %s3504_s3 }
0x1313   :  { %v3030_v52 = vpop.eup %3029 }
0x1314   :  { %v1103_v53 = vadd.f32 1.0, %v3030_v52 }
0x1316   :  { %3031 = vrcp.f32 %v1103_v53  ;;  %v1115_v59 = vand.u32 2147483648, %v1103_v53  ;;  %vm1109_vm10 = vweird.f32 %v1103_v53  ;;  %v1113_v60 = vand.u32 2147483647, %v1103_v53 }
0x1318   :  { %v1116_v63 = vor.u32 1.1754944e-38, %v1115_v59  ;;  %vm1114_vm12 = vcmp.eq.f32.partialorder %v1113_v60, 8.507059e+37 }
0x131c   :  { %v3032_v54 = vpop.eup %3031 }
0x131d   :  { %v1105_v55 = vmul.f32 %v3032_v54, %v1103_v53  ;;  %vm1110_vm9 = vweird.f32 %v3032_v54 }
0x131e   :  { %vm1111_vm11 = vmor %vm1109_vm10, %vm1110_vm9 }
0x131f   :  { %v1106_v56 = vsub.f32 1.0, %v1105_v55 }
0x1321   :  { %v1107_v57 = vmul.f32 %v3032_v54, %v1106_v56 }
0x1323   :  { %v1108_v58 = vadd.f32 %v3032_v54, %v1107_v57 }
0x1325   :  { %v1112_v61 = vsel %vm1111_vm11, %v3032_v54, %v1108_v58 }
0x1326   :  { %v1117_v1 = vsel %vm1114_vm12, %v1116_v63, %v1112_v61 }
0x1327   :  { %v1120_v2 = vmul.f32 %v1117_v1, %v1063_v42  ;;  %v922_v42 = vadd.f32 %v3749_v20, %v921_v41 }
0x1384   :  { %v1123_v0 = vpop.permute.xlu0 %1122 }
0x1385   :  { %v1125_v31 = vmul.f32 %v1123_v0, %v1117_v1 }
0x1387   :  { %1127 = vrot.lane.b32.xlu1 %v1125_v31, %s3505_s0 }
0x13f9   :  { %v1128_v27 = vpop.permute.xlu1 %1127 }
0x13fa   :  { %v1130_v3 = vadd.f32 %v1128_v27, %v1120_v2  ;;  %v924_v27 = vpop.f32.mrf.mxu3 }
0x13fc   :  { %3033 = vtanh.f32 %v1130_v3 }
0x1402   :  { %v3034_v4 = vpop.eup %3033 }
0x1403   :  { %1133 = vrot.lane.b32.xlu2 %v3034_v4, %s3504_s3 }
0x145d   :  { %v1134_v5 = vpop.permute.xlu2 %1133 }
0x145e   :  { %v1136_v6 = vmul.f32 %v1134_v5, %v1117_v1 }
0x1460   :  { %1138 = vrot.lane.b32.xlu0 %v1136_v6, %s3505_s0 }
0x14d2   :  { %v1139_v7 = vpop.permute.xlu0 %1138 }
0x14d3   :  { %1142 = vst.msk [vmem:[#allocation3 + $0x10] sm:$0xff] %vm309_vm6, %v1139_v7  ;;  %2866 = vmatmul.msk.f32.vlgmr.msrb.gmra.mxu2 %vm309_vm6, %v1139_v7 }
0x14d4   :  { %1426 = vmatpush.msrb.mxu2 %v3717_v11 }
0x14d6   :  { %1427 = vmatpush.msrb.mxu2 %v3719_v12 }
0x14d8   :  { %1428 = vmatpush.msrb.mxu2 %v3723_v13 }
0x14da   :  { %1429 = vmatpush.msrb.mxu2 %v3727_v14  ;;  %v1480_v41 = vld [vmem:[#allocation3 + $0x10] sm:$0xff] }
0x1556   :  { %v1163_v15 = vpop.f32.mrf.mxu2 }
0x1557   :  { %v1166_v16 = vadd.f32 %v1163_v15, %v919_v9 }
0x1559   :  { %3035 = vtanh.f32 %v1166_v16  ;;  %v2867_v18 = vmul.f32 -1.442695, %v1166_v16 }
0x155b   :  { %3037 = vpow2.f32 %v2867_v18 }
0x155f   :  { %v3036_v17 = vpop.eup %3035 }
0x1560   :  { %1189 = vrot.lane.b32.xlu1 %v3036_v17, %s3504_s3 }
0x1561   :  { %v3038_v21 = vpop.eup %3037 }
0x1562   :  { %v1170_v22 = vadd.f32 1.0, %v3038_v21 }
0x1564   :  { %3039 = vrcp.f32 %v1170_v22  ;;  %v1182_v14 = vand.u32 2147483648, %v1170_v22  ;;  %vm1176_vm14 = vweird.f32 %v1170_v22  ;;  %v1180_v26 = vand.u32 2147483647, %v1170_v22 }
0x1566   :  { %v1183_v30 = vor.u32 1.1754944e-38, %v1182_v14  ;;  %vm1181_vm0 = vcmp.eq.f32.partialorder %v1180_v26, 8.507059e+37 }
0x156a   :  { %v3040_v11 = vpop.eup %3039 }
0x156b   :  { %v1172_v12 = vmul.f32 %v3040_v11, %v1170_v22  ;;  %vm1177_vm13 = vweird.f32 %v3040_v11 }
0x156c   :  { %vm1178_vm15 = vmor %vm1176_vm14, %vm1177_vm13 }
0x156d   :  { %v1173_v23 = vsub.f32 1.0, %v1172_v12 }
0x156f   :  { %v1174_v13 = vmul.f32 %v3040_v11, %v1173_v23 }
0x1571   :  { %v1175_v24 = vadd.f32 %v3040_v11, %v1174_v13 }
0x1573   :  { %v1179_v28 = vsel %vm1178_vm15, %v3040_v11, %v1175_v24 }
0x1574   :  { %v1184_v35 = vsel %vm1181_vm0, %v1183_v30, %v1179_v28 }
0x1575   :  { %v1187_v32 = vmul.f32 %v1184_v35, %v1130_v3  ;;  %v925_v3 = vadd.f32 %v3749_v20, %v924_v27  ;;  %v3835_v27 = vld [vmem:[#allocation16 + $0x18] sm:$0xff] }
0x1576   :  { %1716 = vmatpush.msra.mxu0 %v3835_v27 }
0x15d2   :  { %v1190_v33 = vpop.permute.xlu1 %1189 }
0x15d3   :  { %v1192_v29 = vmul.f32 %v1190_v33, %v1184_v35 }
0x15d5   :  { %1194 = vrot.lane.b32.xlu2 %v1192_v29, %s3505_s0 }
0x162f   :  { %v1195_v34 = vpop.permute.xlu2 %1194 }
0x1630   :  { %v1197_v36 = vadd.f32 %v1195_v34, %v1187_v32  ;;  %v1489_v32 = vld [vmem:[#allocation14 + $0x18] sm:$0xff]  ;;  %v1488_v34 = vld [vmem:[#allocation14 + $0x10] sm:$0xff] }
0x1631   :  { %2930 = vmatpush.msra.mxu3 %v1489_v32 }
0x1632   :  { %3041 = vtanh.f32 %v1197_v36 }
0x1633   :  { %2931 = vmatpush.msra.mxu3 %v1488_v34 }
0x1638   :  { %v3042_v37 = vpop.eup %3041 }
0x1639   :  { %1200 = vrot.lane.b32.xlu0 %v3042_v37, %s3504_s3  ;;  %v1486_v37 = vld [vmem:[#allocation14] sm:$0xff] }
0x16ab   :  { %v1201_v38 = vpop.permute.xlu0 %1200 }
0x16ac   :  { %v1203_v39 = vmul.f32 %v1201_v38, %v1184_v35 }
0x16ae   :  { %1205 = vrot.lane.b32.xlu1 %v1203_v39, %s3505_s0  ;;  %v1478_v39 = vld [vmem:[#allocation3] sm:$0xff] }
0x1720   :  { %v1206_v40 = vpop.permute.xlu1 %1205 }
0x1721   :  { %1209 = vst.msk [vmem:[#allocation3 + $0x18] sm:$0xff] %vm309_vm6, %v1206_v40  ;;  %2868 = vmatmul.msk.f32.vlgmr.msra.gmra.mxu1 %vm309_vm6, %v1206_v40  ;;  %v1479_v40 = vld [vmem:[#allocation3 + $0x8] sm:$0xff] }
0x1722   :  { %1530 = vmatpush.msra.mxu1 %v1489_v32 }
0x1724   :  { %1531 = vmatpush.msra.mxu1 %v1488_v34 }
0x179e   :  { %v1230_v25 = vpop.f32.mrf.mxu1 }
0x179f   :  { %v1233_v43 = vadd.f32 %v1230_v25, %v922_v42  ;;  %v1481_v42 = vld [vmem:[#allocation3 + $0x18] sm:$0xff]  ;;  %v927_v25 = vpop.f32.mrf.mxu3 }
0x17a1   :  { %3043 = vtanh.f32 %v1233_v43  ;;  %v2869_v45 = vmul.f32 -1.442695, %v1233_v43  ;;  %v928_v43 = vadd.f32 %v3749_v20, %v927_v25 }
0x17a3   :  { %3045 = vpow2.f32 %v2869_v45 }
0x17a7   :  { %v3044_v44 = vpop.eup %3043 }
0x17a8   :  { %1256 = vrot.lane.b32.xlu2 %v3044_v44, %s3504_s3 }
0x17a9   :  { %v3046_v46 = vpop.eup %3045 }
0x17aa   :  { %v1237_v47 = vadd.f32 1.0, %v3046_v46 }
0x17ac   :  { %3047 = vrcp.f32 %v1237_v47  ;;  %v1249_v53 = vand.u32 2147483648, %v1237_v47  ;;  %vm1243_vm2 = vweird.f32 %v1237_v47  ;;  %v1247_v54 = vand.u32 2147483647, %v1237_v47 }
0x17ae   :  { %v1250_v56 = vor.u32 1.1754944e-38, %v1249_v53  ;;  %vm1248_vm4 = vcmp.eq.f32.partialorder %v1247_v54, 8.507059e+37 }
0x17b2   :  { %v3048_v48 = vpop.eup %3047 }
0x17b3   :  { %v1239_v49 = vmul.f32 %v3048_v48, %v1237_v47  ;;  %vm1244_vm1 = vweird.f32 %v3048_v48 }
0x17b4   :  { %vm1245_vm3 = vmor %vm1243_vm2, %vm1244_vm1 }
0x17b5   :  { %v1240_v50 = vsub.f32 1.0, %v1239_v49 }
0x17b7   :  { %v1241_v51 = vmul.f32 %v3048_v48, %v1240_v50 }
0x17b9   :  { %v1242_v52 = vadd.f32 %v3048_v48, %v1241_v51 }
0x17bb   :  { %v1246_v55 = vsel %vm1245_vm3, %v3048_v48, %v1242_v52 }
0x17bc   :  { %v1251_v58 = vsel %vm1248_vm4, %v1250_v56, %v1246_v55 }
0x17bd   :  { %v1254_v60 = vmul.f32 %v1251_v58, %v1197_v36  ;;  %v1487_v36 = vld [vmem:[#allocation14 + $0x8] sm:$0xff] }
0x17be   :  { %1532 = vmatpush.msra.mxu1 %v1487_v36  ;;  %2932 = vmatpush.msra.mxu3 %v1487_v36 }
0x17c0   :  { %1533 = vmatpush.msra.mxu1 %v1486_v37  ;;  %2933 = vmatpush.msra.mxu3 %v1486_v37 }
0x17c2   :  { %1980 = vmatpush.msrb.mxu3 %v3835_v27 }
0x1802   :  { %v1257_v57 = vpop.permute.xlu2 %1256 }
0x1803   :  { %v1259_v59 = vmul.f32 %v1257_v57, %v1251_v58 }
0x1805   :  { %1261 = vrot.lane.b32.xlu0 %v1259_v59, %s3505_s0 }
0x1877   :  { %v1262_v61 = vpop.permute.xlu0 %1261 }
0x1878   :  { %v1264_v63 = vadd.f32 %v1262_v61, %v1254_v60 }
0x187a   :  { %3049 = vtanh.f32 %v1264_v63 }
0x1880   :  { %v3050_v0 = vpop.eup %3049 }
0x1881   :  { %1267 = vrot.lane.b32.xlu1 %v3050_v0, %s3504_s3 }
0x18f3   :  { %v1268_v1 = vpop.permute.xlu1 %1267 }
0x18f4   :  { %v1270_v31 = vmul.f32 %v1268_v1, %v1251_v58 }
0x18f6   :  { %1272 = vrot.lane.b32.xlu2 %v1270_v31, %s3505_s0 }
0x1950   :  { %v1273_v2 = vpop.permute.xlu2 %1272 }
0x1951   :  { %1276 = vst.msk [vmem:[#allocation3 + $0x20] sm:$0xff] %vm309_vm6, %v1273_v2  ;;  %2870 = vmatmul.msk.f32.vlgmr.msra.gmra.mxu2 %vm309_vm6, %v1273_v2 }
0x1952   :  { %1584 = vmatpush.msra.mxu2 %v3835_v27 }
0x19d4   :  { %v1297_v4 = vpop.f32.mrf.mxu2 }
0x19d5   :  { %v1300_v5 = vadd.f32 %v1297_v4, %v925_v3  ;;  %v3837_v3 = vld [vmem:[#allocation16 + $0x10] sm:$0xff]  ;;  %v3841_v4 = vld [vmem:[#allocation16 + $0x8] sm:$0xff] }
0x19d6   :  { %1585 = vmatpush.msra.mxu2 %v3837_v3  ;;  %1717 = vmatpush.msra.mxu0 %v3837_v3 }
0x19d7   :  { %3051 = vtanh.f32 %v1300_v5  ;;  %v2871_v7 = vmul.f32 -1.442695, %v1300_v5  ;;  %v3846_v5 = vld [vmem:[#allocation16] sm:$0xff]  ;;  %1981 = vmatpush.msrb.mxu3 %v3837_v3 }
0x19d8   :  { %1586 = vmatpush.msra.mxu2 %v3841_v4  ;;  %1718 = vmatpush.msra.mxu0 %v3841_v4 }
0x19d9   :  { %3053 = vpow2.f32 %v2871_v7  ;;  %1982 = vmatpush.msrb.mxu3 %v3841_v4 }
0x19da   :  { %1587 = vmatpush.msra.mxu2 %v3846_v5  ;;  %1719 = vmatpush.msra.mxu0 %v3846_v5 }
0x19db   :  { %1983 = vmatpush.msrb.mxu3 %v3846_v5 }
0x19dc   :  { %1848 = vmatpush.msrb.mxu0 %v3835_v27 }
0x19dd   :  { %v3052_v6 = vpop.eup %3051 }
0x19de   :  { %1323 = vrot.lane.b32.xlu0 %v3052_v6, %s3504_s3  ;;  %1849 = vmatpush.msrb.mxu0 %v3837_v3 }
0x19df   :  { %v3054_v8 = vpop.eup %3053 }
0x19e0   :  { %v1304_v9 = vadd.f32 1.0, %v3054_v8  ;;  %1850 = vmatpush.msrb.mxu0 %v3841_v4  ;;  %v3875_v8 = vld [vmem:[%s4140_s9] ss:$0 sm:$0xff] }
0x19e2   :  { %3055 = vrcp.f32 %v1304_v9  ;;  %v1316_v22 = vand.u32 2147483648, %v1304_v9  ;;  %vm1310_vm7 = vweird.f32 %v1304_v9  ;;  %v1314_v11 = vand.u32 2147483647, %v1304_v9  ;;  %1851 = vmatpush.msrb.mxu0 %v3846_v5 }
0x19e4   :  { %v1317_v23 = vor.u32 1.1754944e-38, %v1316_v22  ;;  %vm1315_vm9 = vcmp.eq.f32.partialorder %v1314_v11, 8.507059e+37 }
0x19e8   :  { %v3056_v15 = vpop.eup %3055 }
0x19e9   :  { %v1306_v16 = vmul.f32 %v3056_v15, %v1304_v9  ;;  %vm1311_vm5 = vweird.f32 %v3056_v15 }
0x19ea   :  { %vm1312_vm8 = vmor %vm1310_vm7, %vm1311_vm5 }
0x19eb   :  { %v1307_v17 = vsub.f32 1.0, %v1306_v16 }
0x19ed   :  { %v1308_v18 = vmul.f32 %v3056_v15, %v1307_v17 }
0x19ef   :  { %v1309_v21 = vadd.f32 %v3056_v15, %v1308_v18 }
0x19f1   :  { %v1313_v12 = vsel %vm1312_vm8, %v3056_v15, %v1309_v21 }
0x19f2   :  { %v1318_v24 = vsel %vm1315_vm9, %v1317_v23, %v1313_v12 }
0x19f3   :  { %v1321_v26 = vmul.f32 %v1318_v24, %v1264_v63 }
0x1a50   :  { %v1324_v13 = vpop.permute.xlu0 %1323 }
0x1a51   :  { %v1326_v14 = vmul.f32 %v1324_v13, %v1318_v24 }
0x1a53   :  { %1328 = vrot.lane.b32.xlu1 %v1326_v14, %s3505_s0 }
0x1ac5   :  { %v1329_v28 = vpop.permute.xlu1 %1328 }
0x1ac6   :  { %v1331_v30 = vadd.f32 %v1329_v28, %v1321_v26 }
0x1ac8   :  { %3057 = vtanh.f32 %v1331_v30 }
0x1ace   :  { %v3058_v33 = vpop.eup %3057 }
0x1acf   :  { %1334 = vrot.lane.b32.xlu2 %v3058_v33, %s3504_s3 }
0x1b29   :  { %v1335_v35 = vpop.permute.xlu2 %1334 }
0x1b2a   :  { %v1337_v29 = vmul.f32 %v1335_v35, %v1318_v24 }
0x1b2c   :  { %1339 = vrot.lane.b32.xlu0 %v1337_v29, %s3505_s0 }
0x1b9e   :  { %v1340_v38 = vpop.permute.xlu0 %1339 }
0x1b9f   :  { %1343 = vst.msk [vmem:[#allocation3 + $0x28] sm:$0xff] %vm309_vm6, %v1340_v38  ;;  %2872 = vmatmul.msk.f32.vlgmr.msrb.gmra.mxu1 %vm309_vm6, %v1340_v38 }
0x1ba7   :  { %2876 = vmatmul.msk.f32.vlgmr.msra.gmra.mxu1 %vm309_vm6, %v1478_v39 }
0x1baf   :  { %2877 = vmatmul.msk.f32.gmra.mxu1 %vm309_vm6, %v1479_v40 }
0x1bb7   :  { %2878 = vmatmul.msk.f32.gmra.mxu1 %vm309_vm6, %v1480_v41 }
0x1bbf   :  { %2879 = vmatmul.msk.f32.gmra.mxu1 %vm309_vm6, %v1481_v42 }
0x1c1c   :  { %v1364_v44 = vpop.f32.mrf.mxu1 }
0x1c1d   :  { %v1367_v45 = vadd.f32 %v1364_v44, %v928_v43 }
0x1c1f   :  { %3059 = vtanh.f32 %v1367_v45  ;;  %v2873_v47 = vmul.f32 -1.442695, %v1367_v45 }
0x1c21   :  { %3061 = vpow2.f32 %v2873_v47 }
0x1c24   :  { %v1535_v9 = vpop.f32.mrf.mxu1 }
0x1c25   :  { %v3060_v46 = vpop.eup %3059  ;;  %v1536_v15 = vadd.f32 %v3875_v8, %v1535_v9 }
0x1c26   :  { %1390 = vrot.lane.b32.xlu1 %v3060_v46, %s3504_s3 }
0x1c27   :  { %v3062_v48 = vpop.eup %3061 }
0x1c28   :  { %v1371_v49 = vadd.f32 1.0, %v3062_v48 }
0x1c2a   :  { %3063 = vrcp.f32 %v1371_v49  ;;  %v1383_v55 = vand.u32 2147483648, %v1371_v49  ;;  %vm1377_vm11 = vweird.f32 %v1371_v49  ;;  %v1381_v20 = vand.u32 2147483647, %v1371_v49 }
0x1c2c   :  { %v1384_v57 = vor.u32 1.1754944e-38, %v1383_v55  ;;  %vm1382_vm13 = vcmp.eq.f32.partialorder %v1381_v20, 8.507059e+37  ;;  %v1538_v42 = vpop.f32.mrf.mxu1 }
0x1c2d   :  { %v1539_v25 = vadd.f32 %v3875_v8, %v1538_v42 }
0x1c30   :  { %v3064_v50 = vpop.eup %3063 }
0x1c31   :  { %v1373_v51 = vmul.f32 %v3064_v50, %v1371_v49  ;;  %vm1378_vm10 = vweird.f32 %v3064_v50 }
0x1c32   :  { %vm1379_vm12 = vmor %vm1377_vm11, %vm1378_vm10 }
0x1c33   :  { %v1374_v52 = vsub.f32 1.0, %v1373_v51 }
0x1c34   :  { %v1541_v9 = vpop.f32.mrf.mxu1 }
0x1c35   :  { %v1375_v53 = vmul.f32 %v3064_v50, %v1374_v52 }
0x1c37   :  { %v1376_v54 = vadd.f32 %v3064_v50, %v1375_v53 }
0x1c39   :  { %v1380_v56 = vsel %vm1379_vm12, %v3064_v50, %v1376_v54 }
0x1c3a   :  { %v1385_v59 = vsel %vm1382_vm13, %v1384_v57, %v1380_v56 }
0x1c3b   :  { %v1388_v61 = vmul.f32 %v1385_v59, %v1331_v30 }
0x1c98   :  { %v1391_v58 = vpop.permute.xlu1 %1390 }
0x1c99   :  { %v1393_v60 = vmul.f32 %v1391_v58, %v1385_v59 }
0x1c9b   :  { %1395 = vrot.lane.b32.xlu2 %v1393_v60, %s3505_s0 }
0x1cf5   :  { %v1396_v63 = vpop.permute.xlu2 %1395 }
0x1cf6   :  { %v3830_v0 = vadd.f32 %v1396_v63, %v1388_v61 }
0x1cf8   :  { %3065 = vtanh.f32 %v3830_v0 }
0x1cfe   :  { %v3066_v1 = vpop.eup %3065 }
0x1cff   :  { %1401 = vrot.lane.b32.xlu0 %v3066_v1, %s3504_s3 }
0x1d71   :  { %v1402_v31 = vpop.permute.xlu0 %1401 }
0x1d72   :  { %v1404_v2 = vmul.f32 %v1402_v31, %v1385_v59 }
0x1d74   :  { %1406 = vrot.lane.b32.xlu1 %v1404_v2, %s3505_s0 }
0x1de6   :  { %v1407_v6 = vpop.permute.xlu1 %1406 }
0x1de7   :  { %1410 = vst.msk [vmem:[#allocation3 + $0x30] sm:$0xff] %vm309_vm6, %v1407_v6  ;;  %2874 = vmatmul.msk.f32.vlgmr.msrb.gmra.mxu2 %vm309_vm6, %v1407_v6 }
0x1de8   :  { %1650 = vmatpush.msrb.mxu2 %v3835_v27 }
0x1dea   :  { %1651 = vmatpush.msrb.mxu2 %v3837_v3 }
0x1dec   :  { %1652 = vmatpush.msrb.mxu2 %v3841_v4 }
0x1dee   :  { %1653 = vmatpush.msrb.mxu2 %v3846_v5 }
0x1def   :  { %1588 = vmatmul.f32.vlgmr.msra.gmra.mxu2 %v3503_v19 }
0x1df0   :  { %1782 = vmatpush.msra.mxu2 %v3835_v27 }
0x1df2   :  { %1783 = vmatpush.msra.mxu2 %v3837_v3 }
0x1df4   :  { %1784 = vmatpush.msra.mxu2 %v3841_v4 }
0x1df6   :  { %1785 = vmatpush.msra.mxu2 %v3846_v5 }
0x1e6a   :  { %v3870_v7 = vpop.f32.mrf.mxu2 }
0x1e72   :  { %v1589_v16 = vpop.f32.mrf.mxu2 }
0x1e73   :  { %v1592_v17 = vadd.f32 %v1589_v16, %v1536_v15  ;;  %v1542_v15 = vadd.f32 %v3875_v8, %v1541_v9 }
0x1e75   :  { %3067 = vtanh.f32 %v1592_v17  ;;  %v2884_v21 = vmul.f32 -1.442695, %v1592_v17 }
0x1e77   :  { %3069 = vpow2.f32 %v2884_v21 }
0x1e7b   :  { %v3068_v18 = vpop.eup %3067 }
0x1e7c   :  { %1615 = vrot.lane.b32.xlu2 %v3068_v18, %s3504_s3 }
0x1e7d   :  { %v3070_v22 = vpop.eup %3069 }
0x1e7e   :  { %v1596_v11 = vadd.f32 1.0, %v3070_v22 }
0x1e80   :  { %3071 = vrcp.f32 %v1596_v11  ;;  %v1608_v26 = vand.u32 2147483648, %v1596_v11  ;;  %vm1602_vm15 = vweird.f32 %v1596_v11  ;;  %v1606_v28 = vand.u32 2147483647, %v1596_v11 }
0x1e82   :  { %v1609_v33 = vor.u32 1.1754944e-38, %v1608_v26  ;;  %vm1607_vm1 = vcmp.eq.f32.partialorder %v1606_v28, 8.507059e+37 }
0x1e86   :  { %v3072_v12 = vpop.eup %3071 }
0x1e87   :  { %v1598_v23 = vmul.f32 %v3072_v12, %v1596_v11  ;;  %vm1603_vm14 = vweird.f32 %v3072_v12 }
0x1e88   :  { %vm1604_vm0 = vmor %vm1602_vm15, %vm1603_vm14 }
0x1e89   :  { %v1599_v13 = vsub.f32 1.0, %v1598_v23 }
0x1e8b   :  { %v1600_v24 = vmul.f32 %v3072_v12, %v1599_v13 }
0x1e8d   :  { %v1601_v14 = vadd.f32 %v3072_v12, %v1600_v24 }
0x1e8f   :  { %v1605_v30 = vsel %vm1604_vm0, %v3072_v12, %v1601_v14 }
0x1e90   :  { %v1610_v29 = vsel %vm1607_vm1, %v1609_v33, %v1605_v30 }
0x1e91   :  { %v1613_v34 = vmul.f32 0.0, %v1610_v29 }
0x1ed6   :  { %v1616_v35 = vpop.permute.xlu2 %1615 }
0x1ed7   :  { %v1618_v32 = vmul.f32 %v1616_v35, %v1610_v29 }
0x1ed9   :  { %1620 = vrot.lane.b32.xlu0 %v1618_v32, %s3505_s0 }
0x1f4b   :  { %v1621_v36 = vpop.permute.xlu0 %1620 }
0x1f4c   :  { %v1623_v37 = vadd.f32 %v1621_v36, %v1613_v34  ;;  %v2852_v36 = vmul.f32 -1.442695, %v3778_v10 }
0x1f4e   :  { %3073 = vtanh.f32 %v1623_v37 }
0x1f54   :  { %v3074_v38 = vpop.eup %3073 }
0x1f55   :  { %1626 = vrot.lane.b32.xlu1 %v3074_v38, %s3504_s3 }
0x1fc7   :  { %v1627_v39 = vpop.permute.xlu1 %1626 }
0x1fc8   :  { %v1629_v40 = vmul.f32 %v1627_v39, %v1610_v29 }
0x1fca   :  { %1631 = vrot.lane.b32.xlu2 %v1629_v40, %s3505_s0 }
0x2024   :  { %v1632_v41 = vpop.permute.xlu2 %1631 }
0x2025   :  { %1634 = vst.msk [vmem:[#allocation2] sm:$0xff] %vm309_vm6, %v1632_v41  ;;  %2885 = vmatmul.msk.f32.vlgmr.msrb.gmra.mxu2 %vm309_vm6, %v1632_v41 }
0x2026   :  { %1914 = vmatpush.msrb.mxu2 %v3835_v27 }
0x2028   :  { %1915 = vmatpush.msrb.mxu2 %v3837_v3 }
0x202a   :  { %1916 = vmatpush.msrb.mxu2 %v3841_v4 }
0x202c   :  { %1917 = vmatpush.msrb.mxu2 %v3846_v5 }
0x20a8   :  { %v1655_v43 = vpop.f32.mrf.mxu2 }
0x20a9   :  { %v1658_v44 = vadd.f32 %v1655_v43, %v1539_v25 }
0x20ab   :  { %3075 = vtanh.f32 %v1658_v44  ;;  %v2886_v46 = vmul.f32 -1.442695, %v1658_v44 }
0x20ad   :  { %3077 = vpow2.f32 %v2886_v46 }
0x20b1   :  { %v3076_v45 = vpop.eup %3075 }
0x20b2   :  { %1681 = vrot.lane.b32.xlu0 %v3076_v45, %s3504_s3 }
0x20b3   :  { %v3078_v47 = vpop.eup %3077 }
0x20b4   :  { %v1662_v48 = vadd.f32 1.0, %v3078_v47 }
0x20b6   :  { %3079 = vrcp.f32 %v1662_v48  ;;  %v1674_v54 = vand.u32 2147483648, %v1662_v48  ;;  %vm1668_vm3 = vweird.f32 %v1662_v48  ;;  %v1672_v55 = vand.u32 2147483647, %v1662_v48 }
0x20b8   :  { %v1675_v56 = vor.u32 1.1754944e-38, %v1674_v54  ;;  %vm1673_vm5 = vcmp.eq.f32.partialorder %v1672_v55, 8.507059e+37 }
0x20bc   :  { %v3080_v49 = vpop.eup %3079 }
0x20bd   :  { %v1664_v50 = vmul.f32 %v3080_v49, %v1662_v48  ;;  %vm1669_vm2 = vweird.f32 %v3080_v49 }
0x20be   :  { %vm1670_vm4 = vmor %vm1668_vm3, %vm1669_vm2 }
0x20bf   :  { %v1665_v51 = vsub.f32 1.0, %v1664_v50 }
0x20c1   :  { %v1666_v52 = vmul.f32 %v3080_v49, %v1665_v51 }
0x20c3   :  { %v1667_v53 = vadd.f32 %v3080_v49, %v1666_v52  ;;  %v1544_v52 = vpop.f32.mrf.mxu1 }
0x20c5   :  { %v1671_v20 = vsel %vm1670_vm4, %v3080_v49, %v1667_v53  ;;  %v1545_v53 = vadd.f32 %v3875_v8, %v1544_v52 }
0x20c6   :  { %v1676_v58 = vsel %vm1673_vm5, %v1675_v56, %v1671_v20 }
0x20c7   :  { %v1679_v60 = vmul.f32 %v1676_v58, %v1623_v37 }
0x2124   :  { %v1682_v57 = vpop.permute.xlu0 %1681 }
0x2125   :  { %v1684_v59 = vmul.f32 %v1682_v57, %v1676_v58 }
0x2127   :  { %1686 = vrot.lane.b32.xlu1 %v1684_v59, %s3505_s0 }
0x2199   :  { %v1687_v61 = vpop.permute.xlu1 %1686 }
0x219a   :  { %v1689_v63 = vadd.f32 %v1687_v61, %v1679_v60 }
0x219c   :  { %3081 = vtanh.f32 %v1689_v63 }
0x21a2   :  { %v3082_v1 = vpop.eup %3081 }
0x21a3   :  { %1692 = vrot.lane.b32.xlu2 %v3082_v1, %s3504_s3 }
0x21fd   :  { %v1693_v31 = vpop.permute.xlu2 %1692 }
0x21fe   :  { %v1695_v2 = vmul.f32 %v1693_v31, %v1676_v58 }
0x2200   :  { %1697 = vrot.lane.b32.xlu0 %v1695_v2, %s3505_s0 }
0x2272   :  { %v1698_v6 = vpop.permute.xlu0 %1697 }
0x2273   :  { %1700 = vst.msk [vmem:[#allocation2 + $0x8] sm:$0xff] %vm309_vm6, %v1698_v6  ;;  %2887 = vmatmul.msk.f32.vlgmr.msra.gmra.mxu0 %vm309_vm6, %v1698_v6 }
0x2274   :  { %2046 = vmatpush.msra.mxu0 %v3835_v27 }
0x2276   :  { %2047 = vmatpush.msra.mxu0 %v3837_v3 }
0x2278   :  { %2048 = vmatpush.msra.mxu0 %v3841_v4 }
0x227a   :  { %2049 = vmatpush.msra.mxu0 %v3846_v5 }
0x22f0   :  { %v1721_v16 = vpop.f32.mrf.mxu0 }
0x22f1   :  { %v1724_v17 = vadd.f32 %v1721_v16, %v1542_v15 }
0x22f3   :  { %3083 = vtanh.f32 %v1724_v17  ;;  %v2888_v21 = vmul.f32 -1.442695, %v1724_v17 }
0x22f5   :  { %3085 = vpow2.f32 %v2888_v21 }
0x22f9   :  { %v3084_v18 = vpop.eup %3083 }
0x22fa   :  { %1747 = vrot.lane.b32.xlu1 %v3084_v18, %s3504_s3 }
0x22fb   :  { %v3086_v22 = vpop.eup %3085 }
0x22fc   :  { %v1728_v11 = vadd.f32 1.0, %v3086_v22 }
0x22fe   :  { %3087 = vrcp.f32 %v1728_v11  ;;  %v1740_v5 = vand.u32 2147483648, %v1728_v11  ;;  %vm1734_vm8 = vweird.f32 %v1728_v11  ;;  %v1738_v13 = vand.u32 2147483647, %v1728_v11 }
0x22ff   :  { %3089 = vtanh.f32 %v3778_v10 }
0x2300   :  { %v1741_v14 = vor.u32 1.1754944e-38, %v1740_v5  ;;  %vm1739_vm10 = vcmp.eq.f32.partialorder %v1738_v13, 8.507059e+37 }
0x2304   :  { %v3088_v27 = vpop.eup %3087 }
0x2305   :  { %v1730_v3 = vmul.f32 %v3088_v27, %v1728_v11  ;;  %vm1735_vm7 = vweird.f32 %v3088_v27  ;;  %v3090_v33 = vpop.eup %3089 }
0x2306   :  { %vm1736_vm9 = vmor %vm1734_vm8, %vm1735_vm7 }
0x2307   :  { %v1731_v12 = vsub.f32 1.0, %v1730_v3 }
0x2309   :  { %v1732_v4 = vmul.f32 %v3088_v27, %v1731_v12 }
0x230b   :  { %v1733_v23 = vadd.f32 %v3088_v27, %v1732_v4 }
0x230d   :  { %v1737_v24 = vsel %vm1736_vm9, %v3088_v27, %v1733_v23 }
0x230e   :  { %v1742_v28 = vsel %vm1739_vm10, %v1741_v14, %v1737_v24  ;;  %v1482_v24 = vld [vmem:[#allocation3 + $0x20] sm:$0xff]  ;;  %v1483_v14 = vld [vmem:[#allocation3 + $0x28] sm:$0xff] }
0x230f   :  { %v1745_v35 = vmul.f32 %v1742_v28, %v1689_v63 }
0x236c   :  { %v1748_v26 = vpop.permute.xlu1 %1747 }
0x236d   :  { %v1750_v30 = vmul.f32 %v1748_v26, %v1742_v28  ;;  %v1484_v26 = vld [vmem:[#allocation3 + $0x30] sm:$0xff] }
0x236f   :  { %1752 = vrot.lane.b32.xlu2 %v1750_v30, %s3505_s0 }
0x2377   :  { %831 = vrot.lane.b32.xlu2 %v3090_v33, %s3504_s3 }
0x23c9   :  { %v1753_v29 = vpop.permute.xlu2 %1752 }
0x23ca   :  { %v3904_v32 = vadd.f32 %v1753_v29, %v1745_v35 }
0x23cc   :  { %3091 = vtanh.f32 %v3904_v32 }
0x23cd   :  { %3093 = vpow2.f32 %v2852_v36 }
0x23d1   :  { %v832_v48 = vpop.permute.xlu2 %831 }
0x23d2   :  { %v3092_v34 = vpop.eup %3091 }
0x23d3   :  { %1758 = vrot.lane.b32.xlu0 %v3092_v34, %s3504_s3  ;;  %v3094_v37 = vpop.eup %3093 }
0x23d4   :  { %v812_v38 = vadd.f32 1.0, %v3094_v37 }
0x23d6   :  { %3095 = vrcp.f32 %v812_v38  ;;  %v824_v45 = vand.u32 2147483648, %v812_v38  ;;  %vm818_vm12 = vweird.f32 %v812_v38  ;;  %v822_v46 = vand.u32 2147483647, %v812_v38 }
0x23d8   :  { %v825_v10 = vor.u32 1.1754944e-38, %v824_v45  ;;  %vm823_vm14 = vcmp.eq.f32.partialorder %v822_v46, 8.507059e+37 }
0x23dc   :  { %v3096_v39 = vpop.eup %3095 }
0x23dd   :  { %v814_v40 = vmul.f32 %v3096_v39, %v812_v38  ;;  %vm819_vm11 = vweird.f32 %v3096_v39 }
0x23de   :  { %vm820_vm13 = vmor %vm818_vm12, %vm819_vm11 }
0x23df   :  { %v815_v41 = vsub.f32 1.0, %v814_v40 }
0x23e1   :  { %v816_v42 = vmul.f32 %v3096_v39, %v815_v41 }
0x23e3   :  { %v817_v43 = vadd.f32 %v3096_v39, %v816_v42 }
0x23e5   :  { %v821_v47 = vsel %vm820_vm13, %v3096_v39, %v817_v43 }
0x23e6   :  { %v826_v49 = vsel %vm823_vm14, %v825_v10, %v821_v47  ;;  %v3211_v47 = vld [vmem:[%s4137_s6] ss:$0 sm:$0xff] }
0x23e7   :  { %v834_v50 = vmul.f32 %v832_v48, %v826_v49  ;;  %v829_v56 = vmul.f32 %v826_v49, %v3757_v62 }
0x2445   :  { %v1759_v25 = vpop.permute.xlu0 %1758 }
0x2446   :  { %v1761_v44 = vmul.f32 %v1759_v25, %v1742_v28 }
0x2448   :  { %1763 = vrot.lane.b32.xlu1 %v1761_v44, %s3505_s0 }
0x2450   :  { %836 = vrot.lane.b32.xlu1 %v834_v50, %s3505_s0 }
0x24ba   :  { %v1764_v51 = vpop.permute.xlu1 %1763 }
0x24bb   :  { %1766 = vst.msk [vmem:[#allocation2 + $0x10] sm:$0xff] %vm309_vm6, %v1764_v51  ;;  %2889 = vmatmul.msk.f32.vlgmr.msra.gmra.mxu2 %vm309_vm6, %v1764_v51 }
0x24c2   :  { %v837_v20 = vpop.permute.xlu1 %836 }
0x24c3   :  { %v839_v57 = vadd.f32 %v837_v20, %v829_v56 }
0x253e   :  { %v1787_v54 = vpop.f32.mrf.mxu2 }
0x253f   :  { %v1790_v55 = vadd.f32 %v1787_v54, %v1545_v53 }
0x2541   :  { %3097 = vtanh.f32 %v1790_v55  ;;  %v2890_v60 = vmul.f32 -1.442695, %v1790_v55 }
0x2542   :  { %3099 = vtanh.f32 %v839_v57 }
0x2543   :  { %3101 = vpow2.f32 %v2890_v60 }
0x2547   :  { %v3098_v58 = vpop.eup %3097 }
0x2548   :  { %1813 = vrot.lane.b32.xlu0 %v3098_v58, %s3504_s3  ;;  %v3100_v59 = vpop.eup %3099 }
0x2549   :  { %v3102_v61 = vpop.eup %3101 }
0x254a   :  { %v1794_v63 = vadd.f32 1.0, %v3102_v61 }
0x254c   :  { %3103 = vrcp.f32 %v1794_v63  ;;  %v1806_v62 = vand.u32 2147483648, %v1794_v63  ;;  %vm1800_vm0 = vweird.f32 %v1794_v63  ;;  %v1804_v15 = vand.u32 2147483647, %v1794_v63 }
0x254e   :  { %v1807_v17 = vor.u32 1.1754944e-38, %v1806_v62  ;;  %vm1805_vm2 = vcmp.eq.f32.partialorder %v1804_v15, 8.507059e+37 }
0x2550   :  { %842 = vrot.lane.b32.xlu0 %v3100_v59, %s3504_s3 }
0x2552   :  { %v3104_v1 = vpop.eup %3103 }
0x2553   :  { %v1796_v31 = vmul.f32 %v3104_v1, %v1794_v63  ;;  %vm1801_vm15 = vweird.f32 %v3104_v1 }
0x2554   :  { %vm1802_vm1 = vmor %vm1800_vm0, %vm1801_vm15 }
0x2555   :  { %v1797_v2 = vsub.f32 1.0, %v1796_v31 }
0x2557   :  { %v1798_v6 = vmul.f32 %v3104_v1, %v1797_v2 }
0x2559   :  { %v1799_v9 = vadd.f32 %v3104_v1, %v1798_v6 }
0x255b   :  { %v1803_v16 = vsel %vm1802_vm1, %v3104_v1, %v1799_v9 }
0x255c   :  { %v1808_v21 = vsel %vm1805_vm2, %v1807_v17, %v1803_v16 }
0x255d   :  { %v1811_v3 = vmul.f32 %v1808_v21, %v3904_v32 }
0x25ba   :  { %v1814_v18 = vpop.permute.xlu0 %1813 }
0x25bb   :  { %v1816_v22 = vmul.f32 %v1814_v18, %v1808_v21 }
0x25bd   :  { %1818 = vrot.lane.b32.xlu2 %v1816_v22, %s3505_s0  ;;  %v2108_v22 = vld [vmem:[#allocation17 + $0x18] sm:$0xff] }
0x25be   :  { %2149 = vmatpush.msra.mxu2 %v2108_v22 }
0x25c2   :  { %v843_v11 = vpop.permute.xlu0 %842 }
0x25c3   :  { %v845_v27 = vmul.f32 %v843_v11, %v826_v49  ;;  %v2107_v11 = vld [vmem:[#allocation17 + $0x10] sm:$0xff] }
0x25c4   :  { %2150 = vmatpush.msra.mxu2 %v2107_v11 }
0x25c5   :  { %847 = vrot.lane.b32.xlu2 %v845_v27, %s3505_s0  ;;  %v2106_v27 = vld [vmem:[#allocation17 + $0x8] sm:$0xff] }
0x25c6   :  { %2151 = vmatpush.msra.mxu2 %v2106_v27 }
0x2617   :  { %v1819_v12 = vpop.permute.xlu2 %1818 }
0x2618   :  { %v1821_v4 = vadd.f32 %v1819_v12, %v1811_v3  ;;  %v2105_v3 = vld [vmem:[#allocation17] sm:$0xff] }
0x2619   :  { %2152 = vmatpush.msra.mxu2 %v2105_v3 }
0x261a   :  { %3105 = vtanh.f32 %v1821_v4 }
0x261f   :  { %v848_v23 = vpop.permute.xlu2 %847 }
0x2620   :  { %v3106_v5 = vpop.eup %3105  ;;  %851 = vst.msk [vmem:[#allocation2 + $0x38] sm:$0xff] %vm309_vm6, %v848_v23  ;;  %v2098_v23 = vld [vmem:[#allocation2 + $0x8] sm:$0xff] }
0x2621   :  { %1824 = vrot.lane.b32.xlu1 %v3106_v5, %s3504_s3  ;;  %v2099_v5 = vld [vmem:[#allocation2 + $0x10] sm:$0xff] }
0x2627   :  { %v859_v13 = vld [vmem:[#allocation2 + $0x38] sm:$0xff] }
0x2628   :  { %2860 = vmatmul.msk.f32.gmra.mxu3 %vm309_vm6, %v859_v13 }
0x2630   :  { %2880 = vmatmul.msk.f32.vlgmr.msra.gmra.mxu3 %vm309_vm6, %v1482_v24 }
0x2638   :  { %2881 = vmatmul.msk.f32.gmra.mxu3 %vm309_vm6, %v1483_v14 }
0x2640   :  { %2882 = vmatmul.msk.f32.gmra.mxu3 %vm309_vm6, %v1484_v26 }
0x2693   :  { %v1825_v28 = vpop.permute.xlu1 %1824 }
0x2694   :  { %v1827_v30 = vmul.f32 %v1825_v28, %v1808_v21 }
0x2696   :  { %1829 = vrot.lane.b32.xlu0 %v1827_v30, %s3505_s0 }
0x26ab   :  { %v930_v35 = vpop.f32.mrf.mxu3 }
0x26ac   :  { %v931_v10 = vadd.f32 %v3211_v47, %v930_v35 }
0x26ae   :  { %v1434_v50 = vadd.f32 %v3870_v7, %v931_v10 }
0x26b0   :  { %v2875_v58 = vmul.f32 -1.442695, %v1434_v50 }
0x26b3   :  { %v1547_v29 = vpop.f32.mrf.mxu3 }
0x26b4   :  { %v1548_v32 = vadd.f32 %v3875_v8, %v1547_v29 }
0x26bb   :  { %v1550_v14 = vpop.f32.mrf.mxu3 }
0x26bc   :  { %v1551_v26 = vadd.f32 %v3875_v8, %v1550_v14 }
0x2708   :  { %v1830_v33 = vpop.permute.xlu0 %1829 }
0x2709   :  { %1832 = vst.msk [vmem:[#allocation2 + $0x18] sm:$0xff] %vm309_vm6, %v1830_v33  ;;  %2891 = vmatmul.msk.f32.vlgmr.msrb.gmra.mxu0 %vm309_vm6, %v1830_v33 }
0x2710   :  { %v2100_v13 = vld [vmem:[#allocation2 + $0x18] sm:$0xff] }
0x2786   :  { %v1853_v34 = vpop.f32.mrf.mxu0 }
0x2787   :  { %v1856_v36 = vadd.f32 %v1853_v34, %v1548_v32 }
0x2789   :  { %3107 = vtanh.f32 %v1856_v36  ;;  %v2892_v38 = vmul.f32 -1.442695, %v1856_v36 }
0x278b   :  { %3109 = vpow2.f32 %v2892_v38 }
0x278f   :  { %v3108_v37 = vpop.eup %3107 }
0x2790   :  { %1879 = vrot.lane.b32.xlu1 %v3108_v37, %s3504_s3 }
0x2791   :  { %v3110_v39 = vpop.eup %3109 }
0x2792   :  { %v1860_v40 = vadd.f32 1.0, %v3110_v39 }
0x2794   :  { %3111 = vrcp.f32 %v1860_v40  ;;  %v1872_v45 = vand.u32 2147483648, %v1860_v40  ;;  %vm1866_vm4 = vweird.f32 %v1860_v40  ;;  %v1870_v46 = vand.u32 2147483647, %v1860_v40 }
0x2795   :  { %3113 = vtanh.f32 %v1434_v50 }
0x2796   :  { %v1873_v49 = vor.u32 1.1754944e-38, %v1872_v45  ;;  %vm1871_vm7 = vcmp.eq.f32.partialorder %v1870_v46, 8.507059e+37 }
0x279a   :  { %v3112_v41 = vpop.eup %3111 }
0x279b   :  { %v1862_v42 = vmul.f32 %v3112_v41, %v1860_v40  ;;  %vm1867_vm3 = vweird.f32 %v3112_v41  ;;  %v3114_v54 = vpop.eup %3113 }
0x279c   :  { %vm1868_vm5 = vmor %vm1866_vm4, %vm1867_vm3 }
0x279d   :  { %v1863_v25 = vsub.f32 1.0, %v1862_v42 }
0x279f   :  { %v1864_v43 = vmul.f32 %v3112_v41, %v1863_v25 }
0x27a1   :  { %v1865_v44 = vadd.f32 %v3112_v41, %v1864_v43 }
0x27a3   :  { %v1869_v48 = vsel %vm1868_vm5, %v3112_v41, %v1865_v44 }
0x27a4   :  { %v1874_v52 = vsel %vm1871_vm7, %v1873_v49, %v1869_v48 }
0x27a5   :  { %v1877_v55 = vmul.f32 %v1874_v52, %v1821_v4  ;;  %v2097_v4 = vld [vmem:[#allocation2] sm:$0xff] }
0x2802   :  { %v1880_v51 = vpop.permute.xlu1 %1879 }
0x2803   :  { %v1882_v53 = vmul.f32 %v1880_v51, %v1874_v52 }
0x2805   :  { %1884 = vrot.lane.b32.xlu2 %v1882_v53, %s3505_s0 }
0x280d   :  { %1457 = vrot.lane.b32.xlu2 %v3114_v54, %s3504_s3 }
0x285f   :  { %v1885_v20 = vpop.permute.xlu2 %1884 }
0x2860   :  { %v3937_v56 = vadd.f32 %v1885_v20, %v1877_v55 }
0x2862   :  { %3115 = vtanh.f32 %v3937_v56 }
0x2863   :  { %3117 = vpow2.f32 %v2875_v58  ;;  %v3964_v58 = vld [vmem:[#allocation19 + $0x18] sm:$0xff] }
0x2864   :  { %2203 = vmatpush.msra.mxu3 %v3964_v58  ;;  %2269 = vmatpush.msrb.mxu0 %v3964_v58 }
0x2867   :  { %v1458_v17 = vpop.permute.xlu2 %1457 }
0x2868   :  { %v3116_v57 = vpop.eup %3115 }
0x2869   :  { %1890 = vrot.lane.b32.xlu0 %v3116_v57, %s3504_s3  ;;  %v3118_v7 = vpop.eup %3117 }
0x286a   :  { %v1438_v59 = vadd.f32 1.0, %v3118_v7  ;;  %v3970_v7 = vld [vmem:[#allocation19 + $0x8] sm:$0xff] }
0x286c   :  { %3119 = vrcp.f32 %v1438_v59  ;;  %v1450_v9 = vand.u32 2147483648, %v1438_v59  ;;  %vm1444_vm9 = vweird.f32 %v1438_v59  ;;  %v1448_v62 = vand.u32 2147483647, %v1438_v59 }
0x286e   :  { %v1451_v16 = vor.u32 1.1754944e-38, %v1450_v9  ;;  %vm1449_vm11 = vcmp.eq.f32.partialorder %v1448_v62, 8.507059e+37  ;;  %v3998_v9 = vld [vmem:[%s4143_s12] ss:$0 sm:$0xff] }
0x2872   :  { %v3120_v60 = vpop.eup %3119 }
0x2873   :  { %v1440_v61 = vmul.f32 %v3120_v60, %v1438_v59  ;;  %vm1445_vm8 = vweird.f32 %v3120_v60  ;;  %v3974_v59 = vld [vmem:[#allocation19] sm:$0xff] }
0x2874   :  { %vm1446_vm10 = vmor %vm1444_vm9, %vm1445_vm8 }
0x2875   :  { %v1441_v63 = vsub.f32 1.0, %v1440_v61 }
0x2877   :  { %v1442_v1 = vmul.f32 %v3120_v60, %v1441_v63  ;;  %v1553_v63 = vpop.f32.mrf.mxu3 }
0x2879   :  { %v1443_v2 = vadd.f32 %v3120_v60, %v1442_v1 }
0x287b   :  { %v1447_v15 = vsel %vm1446_vm10, %v3120_v60, %v1443_v2 }
0x287c   :  { %v1452_v18 = vsel %vm1449_vm11, %v1451_v16, %v1447_v15 }
0x287d   :  { %v1460_v21 = vmul.f32 %v1458_v17, %v1452_v18  ;;  %v1455_v35 = vmul.f32 %v1452_v18, %v3830_v0 }
0x28db   :  { %v1891_v31 = vpop.permute.xlu0 %1890 }
0x28dc   :  { %v1893_v6 = vmul.f32 %v1891_v31, %v1874_v52  ;;  %v1554_v31 = vadd.f32 %v3875_v8, %v1553_v63 }
0x28de   :  { %1895 = vrot.lane.b32.xlu1 %v1893_v6, %s3505_s0 }
0x28e6   :  { %1462 = vrot.lane.b32.xlu1 %v1460_v21, %s3505_s0 }
0x2950   :  { %v1896_v12 = vpop.permute.xlu1 %1895 }
0x2951   :  { %1898 = vst.msk [vmem:[#allocation2 + $0x20] sm:$0xff] %vm309_vm6, %v1896_v12  ;;  %2893 = vmatmul.msk.f32.vlgmr.msrb.gmra.mxu2 %vm309_vm6, %v1896_v12 }
0x2958   :  { %v2101_v24 = vld [vmem:[#allocation2 + $0x20] sm:$0xff]  ;;  %v1463_v33 = vpop.permute.xlu1 %1462 }
0x2959   :  { %2899 = vmatmul.msk.f32.vlgmr.msra.gmra.mxu2 %vm309_vm6, %v2097_v4  ;;  %v1465_v29 = vadd.f32 %v1463_v33, %v1455_v35 }
0x2961   :  { %2900 = vmatmul.msk.f32.gmra.mxu2 %vm309_vm6, %v2098_v23 }
0x2969   :  { %2901 = vmatmul.msk.f32.gmra.mxu2 %vm309_vm6, %v2099_v5 }
0x2971   :  { %2902 = vmatmul.msk.f32.gmra.mxu2 %vm309_vm6, %v2100_v13 }
0x2979   :  { %2903 = vmatmul.msk.f32.gmra.mxu2 %vm309_vm6, %v2101_v24 }
0x29d4   :  { %v1919_v28 = vpop.f32.mrf.mxu2 }
0x29d5   :  { %v1922_v30 = vadd.f32 %v1919_v28, %v1551_v26 }
0x29d7   :  { %3121 = vtanh.f32 %v1922_v30  ;;  %v2894_v36 = vmul.f32 -1.442695, %v1922_v30 }
0x29d8   :  { %3123 = vtanh.f32 %v1465_v29 }
0x29d9   :  { %3125 = vpow2.f32 %v2894_v36 }
0x29dd   :  { %v3122_v32 = vpop.eup %3121 }
0x29de   :  { %1945 = vrot.lane.b32.xlu0 %v3122_v32, %s3504_s3  ;;  %v3124_v34 = vpop.eup %3123 }
0x29df   :  { %v3126_v37 = vpop.eup %3125 }
0x29e0   :  { %v1926_v38 = vadd.f32 1.0, %v3126_v37 }
0x29e2   :  { %3127 = vrcp.f32 %v1926_v38  ;;  %v1938_v0 = vand.u32 2147483648, %v1926_v38  ;;  %vm1932_vm13 = vweird.f32 %v1926_v38  ;;  %v1936_v43 = vand.u32 2147483647, %v1926_v38 }
0x29e4   :  { %v1939_v45 = vor.u32 1.1754944e-38, %v1938_v0  ;;  %vm1937_vm15 = vcmp.eq.f32.partialorder %v1936_v43, 8.507059e+37 }
0x29e6   :  { %1468 = vrot.lane.b32.xlu0 %v3124_v34, %s3504_s3 }
0x29e8   :  { %v3128_v39 = vpop.eup %3127 }
0x29e9   :  { %v1928_v40 = vmul.f32 %v3128_v39, %v1926_v38  ;;  %vm1933_vm12 = vweird.f32 %v3128_v39 }
0x29ea   :  { %vm1934_vm14 = vmor %vm1932_vm13, %vm1933_vm12 }
0x29eb   :  { %v1929_v41 = vsub.f32 1.0, %v1928_v40 }
0x29ed   :  { %v1930_v42 = vmul.f32 %v3128_v39, %v1929_v41 }
0x29ef   :  { %v1931_v25 = vadd.f32 %v3128_v39, %v1930_v42 }
0x29f1   :  { %v1935_v44 = vsel %vm1934_vm14, %v3128_v39, %v1931_v25 }
0x29f2   :  { %v1940_v47 = vsel %vm1937_vm15, %v1939_v45, %v1935_v44 }
0x29f3   :  { %v1943_v50 = vmul.f32 %v1940_v47, %v3937_v56  ;;  %v3966_v56 = vld [vmem:[#allocation19 + $0x10] sm:$0xff] }
0x29f4   :  { %2204 = vmatpush.msra.mxu3 %v3966_v56  ;;  %2270 = vmatpush.msrb.mxu0 %v3966_v56 }
0x29f6   :  { %2205 = vmatpush.msra.mxu3 %v3970_v7  ;;  %2271 = vmatpush.msrb.mxu0 %v3970_v7 }
0x29f8   :  { %2206 = vmatpush.msra.mxu3 %v3974_v59  ;;  %2272 = vmatpush.msrb.mxu0 %v3974_v59 }
0x2a50   :  { %v1946_v46 = vpop.permute.xlu0 %1945 }
0x2a51   :  { %v1948_v10 = vmul.f32 %v1946_v46, %v1940_v47 }
0x2a53   :  { %1950 = vrot.lane.b32.xlu2 %v1948_v10, %s3505_s0 }
0x2a58   :  { %v1469_v48 = vpop.permute.xlu0 %1468 }
0x2a59   :  { %v1471_v49 = vmul.f32 %v1469_v48, %v1452_v18 }
0x2a5b   :  { %1473 = vrot.lane.b32.xlu2 %v1471_v49, %s3505_s0 }
0x2aad   :  { %v1951_v51 = vpop.permute.xlu2 %1950 }
0x2aae   :  { %v3957_v52 = vadd.f32 %v1951_v51, %v1943_v50 }
0x2ab0   :  { %3129 = vtanh.f32 %v3957_v52 }
0x2ab5   :  { %v1474_v53 = vpop.permute.xlu2 %1473 }
0x2ab6   :  { %v3130_v54 = vpop.eup %3129  ;;  %1477 = vst.msk [vmem:[#allocation3 + $0x38] sm:$0xff] %vm309_vm6, %v1474_v53 }
0x2ab7   :  { %1956 = vrot.lane.b32.xlu1 %v3130_v54, %s3504_s3 }
0x2abd   :  { %v1485_v55 = vld [vmem:[#allocation3 + $0x38] sm:$0xff] }
0x2abe   :  { %2883 = vmatmul.msk.f32.gmra.mxu3 %vm309_vm6, %v1485_v55  ;;  %v2727_v55 = vld [vmem:[#allocation20 + $0x18] sm:$0xff] }
0x2abf   :  { %2768 = vmatpush.msrb.mxu1 %v2727_v55 }
0x2b29   :  { %v1957_v20 = vpop.permute.xlu1 %1956 }
0x2b2a   :  { %v1959_v57 = vmul.f32 %v1957_v20, %v1940_v47  ;;  %v2726_v20 = vld [vmem:[#allocation20 + $0x10] sm:$0xff] }
0x2b2b   :  { %2769 = vmatpush.msrb.mxu1 %v2726_v20 }
0x2b2c   :  { %1961 = vrot.lane.b32.xlu0 %v1959_v57, %s3505_s0  ;;  %v2724_v57 = vld [vmem:[#allocation20] sm:$0xff] }
0x2b41   :  { %v3992_v1 = vpop.f32.mrf.mxu3 }
0x2b9e   :  { %v1962_v60 = vpop.permute.xlu0 %1961 }
0x2b9f   :  { %1964 = vst.msk [vmem:[#allocation2 + $0x28] sm:$0xff] %vm309_vm6, %v1962_v60  ;;  %2895 = vmatmul.msk.f32.vlgmr.msrb.gmra.mxu3 %vm309_vm6, %v1962_v60 }
0x2ba0   :  { %2335 = vmatpush.msrb.mxu3 %v3964_v58 }
0x2ba2   :  { %2336 = vmatpush.msrb.mxu3 %v3966_v56 }
0x2ba4   :  { %2337 = vmatpush.msrb.mxu3 %v3970_v7 }
0x2ba6   :  { %v2102_v61 = vld [vmem:[#allocation2 + $0x28] sm:$0xff]  ;;  %2338 = vmatpush.msrb.mxu3 %v3974_v59 }
0x2ba7   :  { %2904 = vmatmul.msk.f32.gmra.mxu2 %vm309_vm6, %v2102_v61  ;;  %2207 = vmatmul.f32.vlgmr.msra.gmra.mxu3 %v3503_v19  ;;  %v2154_v19 = vpop.f32.mrf.mxu2 }
0x2ba8   :  { %2467 = vmatpush.msra.mxu3 %v3964_v58  ;;  %v2155_v62 = vadd.f32 %v3998_v9, %v2154_v19 }
0x2baa   :  { %2468 = vmatpush.msra.mxu3 %v3966_v56 }
0x2bac   :  { %2469 = vmatpush.msra.mxu3 %v3970_v7 }
0x2bae   :  { %2470 = vmatpush.msra.mxu3 %v3974_v59 }
0x2c22   :  { %v1985_v2 = vpop.f32.mrf.mxu3 }
0x2c23   :  { %v1988_v6 = vadd.f32 %v1985_v2, %v1554_v31  ;;  %v4033_v2 = vld [vmem:[%s4145_s14] ss:$0 sm:$0xff] }
0x2c25   :  { %3131 = vtanh.f32 %v1988_v6  ;;  %v2896_v11 = vmul.f32 -1.442695, %v1988_v6 }
0x2c2a   :  { %v2208_v15 = vpop.f32.mrf.mxu3 }
0x2c2b   :  { %v3132_v16 = vpop.eup %3131  ;;  %v2211_v17 = vadd.f32 %v2208_v15, %v2155_v62  ;;  %v2157_v15 = vpop.f32.mrf.mxu2 }
0x2c2c   :  { %2011 = vrot.lane.b32.xlu1 %v3132_v16, %s3504_s3  ;;  %v2158_v16 = vadd.f32 %v3998_v9, %v2157_v15 }
0x2c2d   :  { %3133 = vtanh.f32 %v2211_v17  ;;  %v2907_v8 = vmul.f32 -1.442695, %v2211_v17 }
0x2c2f   :  { %3135 = vpow2.f32 %v2907_v8 }
0x2c33   :  { %v3134_v18 = vpop.eup %3133 }
0x2c34   :  { %2234 = vrot.lane.b32.xlu2 %v3134_v18, %s3504_s3 }
0x2c35   :  { %v3136_v21 = vpop.eup %3135 }
0x2c36   :  { %v2215_v22 = vadd.f32 1.0, %v3136_v21 }
0x2c38   :  { %3137 = vrcp.f32 %v2215_v22  ;;  %v2227_v14 = vand.u32 2147483648, %v2215_v22  ;;  %vm2221_vm1 = vweird.f32 %v2215_v22  ;;  %v2225_v26 = vand.u32 2147483647, %v2215_v22 }
0x2c39   :  { %3139 = vpow2.f32 %v2896_v11 }
0x2c3a   :  { %v2228_v33 = vor.u32 1.1754944e-38, %v2227_v14  ;;  %vm2226_vm3 = vcmp.eq.f32.partialorder %v2225_v26, 8.507059e+37 }
0x2c3e   :  { %v3138_v27 = vpop.eup %3137 }
0x2c3f   :  { %v3140_v3 = vpop.eup %3139  ;;  %v2217_v12 = vmul.f32 %v3138_v27, %v2215_v22  ;;  %vm2222_vm0 = vweird.f32 %v3138_v27 }
0x2c40   :  { %v1992_v4 = vadd.f32 1.0, %v3140_v3  ;;  %vm2223_vm2 = vmor %vm2221_vm1, %vm2222_vm0 }
0x2c41   :  { %v2218_v23 = vsub.f32 1.0, %v2217_v12 }
0x2c42   :  { %3141 = vrcp.f32 %v1992_v4  ;;  %v2004_v38 = vand.u32 2147483648, %v1992_v4  ;;  %vm1998_vm5 = vweird.f32 %v1992_v4  ;;  %v2002_v39 = vand.u32 2147483647, %v1992_v4 }
0x2c43   :  { %v2219_v5 = vmul.f32 %v3138_v27, %v2218_v23 }
0x2c44   :  { %v2005_v41 = vor.u32 1.1754944e-38, %v2004_v38  ;;  %vm2003_vm8 = vcmp.eq.f32.partialorder %v2002_v39, 8.507059e+37  ;;  %v2160_v39 = vpop.f32.mrf.mxu2 }
0x2c45   :  { %v2220_v13 = vadd.f32 %v3138_v27, %v2219_v5 }
0x2c47   :  { %v2224_v28 = vsel %vm2223_vm2, %v3138_v27, %v2220_v13 }
0x2c48   :  { %v3142_v24 = vpop.eup %3141  ;;  %v2229_v29 = vsel %vm2226_vm3, %v2228_v33, %v2224_v28 }
0x2c49   :  { %v1994_v30 = vmul.f32 %v3142_v24, %v1992_v4  ;;  %vm1999_vm4 = vweird.f32 %v3142_v24  ;;  %v2232_v43 = vmul.f32 0.0, %v2229_v29 }
0x2c4a   :  { %vm2000_vm7 = vmor %vm1998_vm5, %vm1999_vm4 }
0x2c4b   :  { %v1995_v34 = vsub.f32 1.0, %v1994_v30 }
0x2c4d   :  { %v1996_v36 = vmul.f32 %v3142_v24, %v1995_v34 }
0x2c4f   :  { %v1997_v37 = vadd.f32 %v3142_v24, %v1996_v36 }
0x2c51   :  { %v2001_v40 = vsel %vm2000_vm7, %v3142_v24, %v1997_v37 }
0x2c52   :  { %v2006_v25 = vsel %vm2003_vm8, %v2005_v41, %v2001_v40  ;;  %v2161_v40 = vadd.f32 %v3998_v9, %v2160_v39 }
0x2c53   :  { %v2009_v47 = vmul.f32 %v2006_v25, %v3957_v52  ;;  %v2725_v52 = vld [vmem:[#allocation20 + $0x8] sm:$0xff] }
0x2c54   :  { %2770 = vmatpush.msrb.mxu1 %v2725_v52 }
0x2c56   :  { %2771 = vmatpush.msrb.mxu1 %v2724_v57 }
0x2c8e   :  { %v2235_v35 = vpop.permute.xlu2 %2234 }
0x2c8f   :  { %v2237_v32 = vmul.f32 %v2235_v35, %v2229_v29 }
0x2c91   :  { %2239 = vrot.lane.b32.xlu1 %v2237_v32, %s3505_s0 }
0x2c9e   :  { %v2012_v42 = vpop.permute.xlu1 %2011 }
0x2c9f   :  { %v2014_v0 = vmul.f32 %v2012_v42, %v2006_v25 }
0x2ca1   :  { %2016 = vrot.lane.b32.xlu0 %v2014_v0, %s3505_s0 }
0x2d03   :  { %v2240_v44 = vpop.permute.xlu1 %2239 }
0x2d04   :  { %v4005_v45 = vadd.f32 %v2240_v44, %v2232_v43 }
0x2d06   :  { %3143 = vtanh.f32 %v4005_v45 }
0x2d0c   :  { %v3144_v46 = vpop.eup %3143 }
0x2d0d   :  { %2245 = vrot.lane.b32.xlu0 %v3144_v46, %s3504_s3 }
0x2d13   :  { %v2017_v10 = vpop.permute.xlu0 %2016 }
0x2d14   :  { %v4010_v48 = vadd.f32 %v2017_v10, %v2009_v47 }
0x2d16   :  { %3145 = vtanh.f32 %v4010_v48 }
0x2d1c   :  { %v3146_v49 = vpop.eup %3145 }
0x2d1d   :  { %2022 = vrot.lane.b32.xlu2 %v3146_v49, %s3504_s3 }
0x2d77   :  { %v2023_v50 = vpop.permute.xlu2 %2022 }
0x2d78   :  { %v2025_v51 = vmul.f32 %v2023_v50, %v2006_v25 }
0x2d7a   :  { %2027 = vrot.lane.b32.xlu1 %v2025_v51, %s3505_s0 }
0x2d7f   :  { %v2246_v53 = vpop.permute.xlu0 %2245 }
0x2d80   :  { %v2248_v54 = vmul.f32 %v2246_v53, %v2229_v29 }
0x2d82   :  { %2250 = vrot.lane.b32.xlu2 %v2248_v54, %s3505_s0 }
0x2ddc   :  { %v2251_v60 = vpop.permute.xlu2 %2250 }
0x2ddd   :  { %2253 = vst.msk [vmem:[#allocation3] sm:$0xff] %vm309_vm6, %v2251_v60 }
0x2de4   :  { %v2716_v61 = vld [vmem:[#allocation3] sm:$0xff] }
0x2de5   :  { %2922 = vmatmul.msk.f32.vlgmr.msrb.gmra.mxu1 %vm309_vm6, %v2716_v61 }
0x2dec   :  { %v2028_v63 = vpop.permute.xlu1 %2027 }
0x2ded   :  { %2030 = vst.msk [vmem:[#allocation2 + $0x30] sm:$0xff] %vm309_vm6, %v2028_v63  ;;  %2897 = vmatmul.msk.f32.vlgmr.msra.gmra.mxu0 %vm309_vm6, %v2028_v63 }
0x2dee   :  { %2401 = vmatpush.msra.mxu0 %v3964_v58 }
0x2df0   :  { %2402 = vmatpush.msra.mxu0 %v3966_v56 }
0x2df2   :  { %2403 = vmatpush.msra.mxu0 %v3970_v7 }
0x2df4   :  { %v2103_v31 = vld [vmem:[#allocation2 + $0x30] sm:$0xff]  ;;  %2404 = vmatpush.msra.mxu0 %v3974_v59 }
0x2df5   :  { %2905 = vmatmul.msk.f32.gmra.mxu2 %vm309_vm6, %v2103_v31  ;;  %2908 = vmatmul.msk.f32.vlgmr.msrb.gmra.mxu0 %vm309_vm6, %v2251_v60 }
0x2df6   :  { %2533 = vmatpush.msrb.mxu0 %v3964_v58 }
0x2df8   :  { %2534 = vmatpush.msrb.mxu0 %v3966_v56 }
0x2dfa   :  { %2535 = vmatpush.msrb.mxu0 %v3970_v7 }
0x2dfc   :  { %2536 = vmatpush.msrb.mxu0 %v3974_v59 }
0x2e62   :  { %v2773_v6 = vpop.f32.mrf.mxu1 }
0x2e63   :  { %v2774_v19 = vadd.f32 %v4033_v2, %v2773_v6 }
0x2e65   :  { %2797 = vst [vmem:[#allocation22] sm:$0xff] %v2774_v19 }
0x2e6a   :  { %v4036_v62 = vpop.f32.mrf.mxu0 }
0x2e72   :  { %v2274_v17 = vpop.f32.mrf.mxu0 }
0x2e73   :  { %v2277_v18 = vadd.f32 %v2274_v17, %v2158_v16 }
0x2e75   :  { %3147 = vtanh.f32 %v2277_v18  ;;  %v2909_v21 = vmul.f32 -1.442695, %v2277_v18  ;;  %v2163_v18 = vpop.f32.mrf.mxu2 }
0x2e77   :  { %3149 = vpow2.f32 %v2909_v21 }
0x2e7b   :  { %v3148_v8 = vpop.eup %3147 }
0x2e7c   :  { %2300 = vrot.lane.b32.xlu0 %v3148_v8, %s3504_s3  ;;  %v2164_v8 = vadd.f32 %v3998_v9, %v2163_v18 }
0x2e7d   :  { %v3150_v22 = vpop.eup %3149 }
0x2e7e   :  { %v2281_v11 = vadd.f32 1.0, %v3150_v22 }
0x2e80   :  { %3151 = vrcp.f32 %v2281_v11  ;;  %v2293_v5 = vand.u32 2147483648, %v2281_v11  ;;  %vm2287_vm10 = vweird.f32 %v2281_v11  ;;  %v2291_v13 = vand.u32 2147483647, %v2281_v11 }
0x2e82   :  { %v2294_v14 = vor.u32 1.1754944e-38, %v2293_v5  ;;  %vm2292_vm12 = vcmp.eq.f32.partialorder %v2291_v13, 8.507059e+37 }
0x2e86   :  { %v3152_v27 = vpop.eup %3151 }
0x2e87   :  { %v2283_v3 = vmul.f32 %v3152_v27, %v2281_v11  ;;  %vm2288_vm9 = vweird.f32 %v3152_v27 }
0x2e88   :  { %vm2289_vm11 = vmor %vm2287_vm10, %vm2288_vm9 }
0x2e89   :  { %v2284_v12 = vsub.f32 1.0, %v2283_v3 }
0x2e8b   :  { %v2285_v4 = vmul.f32 %v3152_v27, %v2284_v12 }
0x2e8d   :  { %v2286_v23 = vadd.f32 %v3152_v27, %v2285_v4 }
0x2e8f   :  { %v2290_v24 = vsel %vm2289_vm11, %v3152_v27, %v2286_v23 }
0x2e90   :  { %v2295_v28 = vsel %vm2292_vm12, %v2294_v14, %v2290_v24 }
0x2e91   :  { %v2298_v33 = vmul.f32 %v2295_v28, %v4005_v45 }
0x2eee   :  { %v2301_v26 = vpop.permute.xlu0 %2300 }
0x2eef   :  { %v2303_v30 = vmul.f32 %v2301_v26, %v2295_v28 }
0x2ef1   :  { %2305 = vrot.lane.b32.xlu1 %v2303_v30, %s3505_s0 }
0x2f63   :  { %v2306_v35 = vpop.permute.xlu1 %2305 }
0x2f64   :  { %v2308_v29 = vadd.f32 %v2306_v35, %v2298_v33 }
0x2f66   :  { %3153 = vtanh.f32 %v2308_v29 }
0x2f6c   :  { %v3154_v32 = vpop.eup %3153 }
0x2f6d   :  { %2311 = vrot.lane.b32.xlu2 %v3154_v32, %s3504_s3 }
0x2fc7   :  { %v2312_v34 = vpop.permute.xlu2 %2311 }
0x2fc8   :  { %v2314_v36 = vmul.f32 %v2312_v34, %v2295_v28 }
0x2fca   :  { %2316 = vrot.lane.b32.xlu0 %v2314_v36, %s3505_s0 }
0x303c   :  { %v2317_v37 = vpop.permute.xlu0 %2316 }
0x303d   :  { %2319 = vst.msk [vmem:[#allocation3 + $0x8] sm:$0xff] %vm309_vm6, %v2317_v37  ;;  %2910 = vmatmul.msk.f32.vlgmr.msrb.gmra.mxu3 %vm309_vm6, %v2317_v37 }
0x303e   :  { %2599 = vmatpush.msrb.mxu3 %v3964_v58 }
0x3040   :  { %2600 = vmatpush.msrb.mxu3 %v3966_v56 }
0x3042   :  { %2601 = vmatpush.msrb.mxu3 %v3970_v7 }
0x3044   :  { %v2717_v38 = vld [vmem:[#allocation3 + $0x8] sm:$0xff]  ;;  %2602 = vmatpush.msrb.mxu3 %v3974_v59 }
0x3045   :  { %2923 = vmatmul.msk.f32.gmra.mxu1 %vm309_vm6, %v2717_v38 }
0x30c0   :  { %v2340_v41 = vpop.f32.mrf.mxu3 }
0x30c1   :  { %v2343_v42 = vadd.f32 %v2340_v41, %v2161_v40  ;;  %v2166_v40 = vpop.f32.mrf.mxu2 }
0x30c2   :  { %v2776_v25 = vpop.f32.mrf.mxu1  ;;  %v2167_v41 = vadd.f32 %v3998_v9, %v2166_v40 }
0x30c3   :  { %3155 = vtanh.f32 %v2343_v42  ;;  %v2777_v0 = vadd.f32 %v4033_v2, %v2776_v25  ;;  %v2911_v44 = vmul.f32 -1.442695, %v2343_v42 }
0x30c5   :  { %2798 = vst [vmem:[#allocation22 + $0x8] sm:$0xff] %v2777_v0  ;;  %3157 = vpow2.f32 %v2911_v44 }
0x30c9   :  { %v3156_v43 = vpop.eup %3155 }
0x30ca   :  { %2366 = vrot.lane.b32.xlu1 %v3156_v43, %s3504_s3 }
0x30cb   :  { %v3158_v45 = vpop.eup %3157 }
0x30cc   :  { %v2347_v46 = vadd.f32 1.0, %v3158_v45 }
0x30ce   :  { %3159 = vrcp.f32 %v2347_v46  ;;  %v2359_v53 = vand.u32 2147483648, %v2347_v46  ;;  %vm2353_vm14 = vweird.f32 %v2347_v46  ;;  %v2357_v54 = vand.u32 2147483647, %v2347_v46 }
0x30d0   :  { %v2360_v20 = vor.u32 1.1754944e-38, %v2359_v53  ;;  %vm2358_vm0 = vcmp.eq.f32.partialorder %v2357_v54, 8.507059e+37 }
0x30d4   :  { %v3160_v47 = vpop.eup %3159 }
0x30d5   :  { %v2349_v10 = vmul.f32 %v3160_v47, %v2347_v46  ;;  %vm2354_vm13 = vweird.f32 %v3160_v47 }
0x30d6   :  { %vm2355_vm15 = vmor %vm2353_vm14, %vm2354_vm13 }
0x30d7   :  { %v2350_v49 = vsub.f32 1.0, %v2349_v10 }
0x30d9   :  { %v2351_v50 = vmul.f32 %v3160_v47, %v2350_v49 }
0x30db   :  { %v2352_v51 = vadd.f32 %v3160_v47, %v2351_v50 }
0x30dd   :  { %v2356_v55 = vsel %vm2355_vm15, %v3160_v47, %v2352_v51 }
0x30de   :  { %v2361_v57 = vsel %vm2358_vm0, %v2360_v20, %v2356_v55 }
0x30df   :  { %v2364_v61 = vmul.f32 %v2361_v57, %v2308_v29 }
0x313c   :  { %v2367_v52 = vpop.permute.xlu1 %2366 }
0x313d   :  { %v2369_v60 = vmul.f32 %v2367_v52, %v2361_v57 }
0x313f   :  { %2371 = vrot.lane.b32.xlu2 %v2369_v60, %s3505_s0 }
0x3199   :  { %v2372_v63 = vpop.permute.xlu2 %2371 }
0x319a   :  { %v2374_v31 = vadd.f32 %v2372_v63, %v2364_v61 }
0x319c   :  { %3161 = vtanh.f32 %v2374_v31 }
0x31a2   :  { %v3162_v6 = vpop.eup %3161 }
0x31a3   :  { %2377 = vrot.lane.b32.xlu0 %v3162_v6, %s3504_s3 }
0x3215   :  { %v2378_v19 = vpop.permute.xlu0 %2377 }
0x3216   :  { %v2380_v15 = vmul.f32 %v2378_v19, %v2361_v57 }
0x3218   :  { %2382 = vrot.lane.b32.xlu1 %v2380_v15, %s3505_s0 }
0x328a   :  { %v2383_v16 = vpop.permute.xlu1 %2382 }
0x328b   :  { %2385 = vst.msk [vmem:[#allocation3 + $0x10] sm:$0xff] %vm309_vm6, %v2383_v16  ;;  %2912 = vmatmul.msk.f32.vlgmr.msra.gmra.mxu0 %vm309_vm6, %v2383_v16 }
0x328c   :  { %2665 = vmatpush.msra.mxu0 %v3964_v58 }
0x328e   :  { %2666 = vmatpush.msra.mxu0 %v3966_v56 }
0x3290   :  { %2667 = vmatpush.msra.mxu0 %v3970_v7 }
0x3292   :  { %v2718_v17 = vld [vmem:[#allocation3 + $0x10] sm:$0xff]  ;;  %2668 = vmatpush.msra.mxu0 %v3974_v59 }
0x3293   :  { %2924 = vmatmul.msk.f32.gmra.mxu1 %vm309_vm6, %v2718_v17 }
0x3308   :  { %v2406_v21 = vpop.f32.mrf.mxu0 }
0x3309   :  { %v2409_v22 = vadd.f32 %v2406_v21, %v2164_v8  ;;  %v2169_v8 = vpop.f32.mrf.mxu2 }
0x330a   :  { %v2170_v21 = vadd.f32 %v3998_v9, %v2169_v8 }
0x330b   :  { %3163 = vtanh.f32 %v2409_v22  ;;  %v2913_v58 = vmul.f32 -1.442695, %v2409_v22 }
0x330d   :  { %3165 = vpow2.f32 %v2913_v58 }
0x3310   :  { %v2779_v11 = vpop.f32.mrf.mxu1 }
0x3311   :  { %v3164_v27 = vpop.eup %3163  ;;  %v2780_v3 = vadd.f32 %v4033_v2, %v2779_v11 }
0x3312   :  { %2432 = vrot.lane.b32.xlu2 %v3164_v27, %s3504_s3 }
0x3313   :  { %2799 = vst [vmem:[#allocation22 + $0x10] sm:$0xff] %v2780_v3  ;;  %v3166_v56 = vpop.eup %3165 }
0x3314   :  { %v2413_v7 = vadd.f32 1.0, %v3166_v56 }
0x3316   :  { %3167 = vrcp.f32 %v2413_v7  ;;  %v2425_v13 = vand.u32 2147483648, %v2413_v7  ;;  %vm2419_vm2 = vweird.f32 %v2413_v7  ;;  %v2423_v24 = vand.u32 2147483647, %v2413_v7 }
0x3318   :  { %v2426_v26 = vor.u32 1.1754944e-38, %v2425_v13  ;;  %vm2424_vm4 = vcmp.eq.f32.partialorder %v2423_v24, 8.507059e+37 }
0x331c   :  { %v3168_v59 = vpop.eup %3167 }
0x331d   :  { %v2415_v12 = vmul.f32 %v3168_v59, %v2413_v7  ;;  %vm2420_vm1 = vweird.f32 %v3168_v59 }
0x331e   :  { %vm2421_vm3 = vmor %vm2419_vm2, %vm2420_vm1 }
0x331f   :  { %v2416_v4 = vsub.f32 1.0, %v2415_v12 }
0x3321   :  { %v2417_v23 = vmul.f32 %v3168_v59, %v2416_v4 }
0x3323   :  { %v2418_v5 = vadd.f32 %v3168_v59, %v2417_v23 }
0x3325   :  { %v2422_v14 = vsel %vm2421_vm3, %v3168_v59, %v2418_v5 }
0x3326   :  { %v2427_v30 = vsel %vm2424_vm4, %v2426_v26, %v2422_v14 }
0x3327   :  { %v2430_v35 = vmul.f32 %v2427_v30, %v2374_v31 }
0x336c   :  { %v2433_v28 = vpop.permute.xlu2 %2432 }
0x336d   :  { %v2435_v33 = vmul.f32 %v2433_v28, %v2427_v30  ;;  %v3212_v28 = vld [vmem:[%s4140_s9] ss:$0 sm:$0xff]  ;;  %s3506_s9 = smov [#allocation22]  }
0x336e   :  { %s2809_s5 = sshll.u32 %s3506_s9, 4  ;;  %s2810_s5 = int_to_ptr.vmem [resolvable:$true] %s2809_s5 }
0x336f   :  { %2437 = vrot.lane.b32.xlu0 %v2435_v33, %s3505_s0 }
0x33e1   :  { %v2438_v29 = vpop.permute.xlu0 %2437 }
0x33e2   :  { %v2440_v32 = vadd.f32 %v2438_v29, %v2430_v35 }
0x33e4   :  { %3169 = vtanh.f32 %v2440_v32 }
0x33ea   :  { %v3170_v34 = vpop.eup %3169 }
0x33eb   :  { %2443 = vrot.lane.b32.xlu1 %v3170_v34, %s3504_s3 }
0x345d   :  { %v2444_v36 = vpop.permute.xlu1 %2443 }
0x345e   :  { %v2446_v37 = vmul.f32 %v2444_v36, %v2427_v30  ;;  %v1557_v30 = vadd.f32 %v3212_v28, %v3992_v1 }
0x3460   :  { %2448 = vrot.lane.b32.xlu2 %v2446_v37, %s3505_s0  ;;  %v2054_v35 = vadd.f32 %v4036_v62, %v1557_v30 }
0x3462   :  { %v2898_v40 = vmul.f32 -1.442695, %v2054_v35 }
0x34ba   :  { %v2449_v38 = vpop.permute.xlu2 %2448 }
0x34bb   :  { %2451 = vst.msk [vmem:[#allocation3 + $0x18] sm:$0xff] %vm309_vm6, %v2449_v38  ;;  %2914 = vmatmul.msk.f32.vlgmr.msra.gmra.mxu3 %vm309_vm6, %v2449_v38 }
0x34c2   :  { %v2719_v39 = vld [vmem:[#allocation3 + $0x18] sm:$0xff] }
0x34c3   :  { %2925 = vmatmul.msk.f32.gmra.mxu1 %vm309_vm6, %v2719_v39 }
0x353e   :  { %v2472_v42 = vpop.f32.mrf.mxu3 }
0x353f   :  { %v2475_v25 = vadd.f32 %v2472_v42, %v2167_v41 }
0x3540   :  { %v2782_v0 = vpop.f32.mrf.mxu1 }
0x3541   :  { %3171 = vtanh.f32 %v2475_v25  ;;  %v2783_v43 = vadd.f32 %v4033_v2, %v2782_v0  ;;  %v2915_v45 = vmul.f32 -1.442695, %v2475_v25 }
0x3543   :  { %2800 = vst [vmem:[#allocation22 + $0x18] sm:$0xff] %v2783_v43  ;;  %3173 = vpow2.f32 %v2915_v45 }
0x3547   :  { %v3172_v44 = vpop.eup %3171 }
0x3548   :  { %2498 = vrot.lane.b32.xlu0 %v3172_v44, %s3504_s3 }
0x3549   :  { %v3174_v46 = vpop.eup %3173 }
0x354a   :  { %v2479_v47 = vadd.f32 1.0, %v3174_v46 }
0x354c   :  { %3175 = vrcp.f32 %v2479_v47  ;;  %v2491_v54 = vand.u32 2147483648, %v2479_v47  ;;  %vm2485_vm7 = vweird.f32 %v2479_v47  ;;  %v2489_v55 = vand.u32 2147483647, %v2479_v47 }
0x354e   :  { %v2492_v52 = vor.u32 1.1754944e-38, %v2491_v54  ;;  %vm2490_vm9 = vcmp.eq.f32.partialorder %v2489_v55, 8.507059e+37 }
0x3552   :  { %v3176_v10 = vpop.eup %3175 }
0x3553   :  { %v2481_v49 = vmul.f32 %v3176_v10, %v2479_v47  ;;  %vm2486_vm5 = vweird.f32 %v3176_v10 }
0x3554   :  { %vm2487_vm8 = vmor %vm2485_vm7, %vm2486_vm5 }
0x3555   :  { %v2482_v50 = vsub.f32 1.0, %v2481_v49 }
0x3557   :  { %v2483_v51 = vmul.f32 %v3176_v10, %v2482_v50 }
0x3559   :  { %v2484_v53 = vadd.f32 %v3176_v10, %v2483_v51 }
0x355b   :  { %v2488_v20 = vsel %vm2487_vm8, %v3176_v10, %v2484_v53 }
0x355c   :  { %v2493_v60 = vsel %vm2490_vm9, %v2492_v52, %v2488_v20  ;;  %v2172_v52 = vpop.f32.mrf.mxu2 }
0x355d   :  { %v2496_v63 = vmul.f32 %v2493_v60, %v2440_v32 }
0x35ba   :  { %v2499_v57 = vpop.permute.xlu0 %2498 }
0x35bb   :  { %v2501_v61 = vmul.f32 %v2499_v57, %v2493_v60  ;;  %v2173_v57 = vadd.f32 %v3998_v9, %v2172_v52 }
0x35bd   :  { %2503 = vrot.lane.b32.xlu1 %v2501_v61, %s3505_s0 }
0x362f   :  { %v2504_v31 = vpop.permute.xlu1 %2503 }
0x3630   :  { %v2506_v6 = vadd.f32 %v2504_v31, %v2496_v63 }
0x3632   :  { %3177 = vtanh.f32 %v2506_v6 }
0x3638   :  { %v3178_v19 = vpop.eup %3177 }
0x3639   :  { %2509 = vrot.lane.b32.xlu2 %v3178_v19, %s3504_s3 }
0x3693   :  { %v2510_v15 = vpop.permute.xlu2 %2509 }
0x3694   :  { %v2512_v16 = vmul.f32 %v2510_v15, %v2493_v60 }
0x3696   :  { %2514 = vrot.lane.b32.xlu0 %v2512_v16, %s3505_s0 }
0x3708   :  { %v2515_v17 = vpop.permute.xlu0 %2514 }
0x3709   :  { %2517 = vst.msk [vmem:[#allocation3 + $0x20] sm:$0xff] %vm309_vm6, %v2515_v17  ;;  %2916 = vmatmul.msk.f32.vlgmr.msrb.gmra.mxu0 %vm309_vm6, %v2515_v17 }
0x3710   :  { %v2720_v18 = vld [vmem:[#allocation3 + $0x20] sm:$0xff] }
0x3711   :  { %2926 = vmatmul.msk.f32.gmra.mxu1 %vm309_vm6, %v2720_v18 }
0x3786   :  { %v2538_v22 = vpop.f32.mrf.mxu0 }
0x3787   :  { %v2541_v11 = vadd.f32 %v2538_v22, %v2170_v21 }
0x3789   :  { %3179 = vtanh.f32 %v2541_v11  ;;  %v2917_v56 = vmul.f32 -1.442695, %v2541_v11 }
0x378b   :  { %3181 = vpow2.f32 %v2917_v56 }
0x378e   :  { %v2785_v27 = vpop.f32.mrf.mxu1 }
0x378f   :  { %v3180_v3 = vpop.eup %3179  ;;  %v2786_v58 = vadd.f32 %v4033_v2, %v2785_v27 }
0x3790   :  { %2564 = vrot.lane.b32.xlu1 %v3180_v3, %s3504_s3 }
0x3791   :  { %2801 = vst [vmem:[#allocation22 + $0x20] sm:$0xff] %v2786_v58  ;;  %v3182_v7 = vpop.eup %3181 }
0x3792   :  { %v2545_v59 = vadd.f32 1.0, %v3182_v7 }
0x3794   :  { %3183 = vrcp.f32 %v2545_v59  ;;  %v2557_v24 = vand.u32 2147483648, %v2545_v59  ;;  %vm2551_vm11 = vweird.f32 %v2545_v59  ;;  %v2555_v14 = vand.u32 2147483647, %v2545_v59 }
0x3795   :  { %3185 = vtanh.f32 %v2054_v35 }
0x3796   :  { %v2558_v33 = vor.u32 1.1754944e-38, %v2557_v24  ;;  %vm2556_vm13 = vcmp.eq.f32.partialorder %v2555_v14, 8.507059e+37 }
0x379a   :  { %v3184_v12 = vpop.eup %3183 }
0x379b   :  { %v2547_v4 = vmul.f32 %v3184_v12, %v2545_v59  ;;  %vm2552_vm10 = vweird.f32 %v3184_v12  ;;  %v3186_v36 = vpop.eup %3185 }
0x379c   :  { %vm2553_vm12 = vmor %vm2551_vm11, %vm2552_vm10 }
0x379d   :  { %v2548_v23 = vsub.f32 1.0, %v2547_v4 }
0x379f   :  { %v2549_v5 = vmul.f32 %v3184_v12, %v2548_v23 }
0x37a1   :  { %v2550_v13 = vadd.f32 %v3184_v12, %v2549_v5 }
0x37a3   :  { %v2554_v26 = vsel %vm2553_vm12, %v3184_v12, %v2550_v13 }
0x37a4   :  { %v2559_v32 = vsel %vm2556_vm13, %v2558_v33, %v2554_v26 }
0x37a5   :  { %v2562_v37 = vmul.f32 %v2559_v32, %v2506_v6 }
0x3802   :  { %v2565_v29 = vpop.permute.xlu1 %2564 }
0x3803   :  { %v2567_v34 = vmul.f32 %v2565_v29, %v2559_v32 }
0x3805   :  { %2569 = vrot.lane.b32.xlu2 %v2567_v34, %s3505_s0 }
0x380d   :  { %2077 = vrot.lane.b32.xlu2 %v3186_v36, %s3504_s3 }
0x385f   :  { %v2570_v38 = vpop.permute.xlu2 %2569 }
0x3860   :  { %v4092_v39 = vadd.f32 %v2570_v38, %v2562_v37 }
0x3862   :  { %3187 = vtanh.f32 %v4092_v39 }
0x3863   :  { %3189 = vpow2.f32 %v2898_v40 }
0x3867   :  { %v2078_v51 = vpop.permute.xlu2 %2077 }
0x3868   :  { %v3188_v1 = vpop.eup %3187 }
0x3869   :  { %2575 = vrot.lane.b32.xlu0 %v3188_v1, %s3504_s3  ;;  %v3190_v62 = vpop.eup %3189 }
0x386a   :  { %v2058_v41 = vadd.f32 1.0, %v3190_v62 }
0x386c   :  { %3191 = vrcp.f32 %v2058_v41  ;;  %v2070_v47 = vand.u32 2147483648, %v2058_v41  ;;  %vm2064_vm15 = vweird.f32 %v2058_v41  ;;  %v2068_v10 = vand.u32 2147483647, %v2058_v41 }
0x386e   :  { %v2071_v50 = vor.u32 1.1754944e-38, %v2070_v47  ;;  %vm2069_vm1 = vcmp.eq.f32.partialorder %v2068_v10, 8.507059e+37 }
0x3872   :  { %v3192_v42 = vpop.eup %3191 }
0x3873   :  { %v2060_v25 = vmul.f32 %v3192_v42, %v2058_v41  ;;  %vm2065_vm14 = vweird.f32 %v3192_v42 }
0x3874   :  { %vm2066_vm0 = vmor %vm2064_vm15, %vm2065_vm14 }
0x3875   :  { %v2061_v0 = vsub.f32 1.0, %v2060_v25 }
0x3877   :  { %v2062_v43 = vmul.f32 %v3192_v42, %v2061_v0 }
0x3879   :  { %v2063_v45 = vadd.f32 %v3192_v42, %v2062_v43 }
0x387b   :  { %v2067_v49 = vsel %vm2066_vm0, %v3192_v42, %v2063_v45 }
0x387c   :  { %v2072_v53 = vsel %vm2069_vm1, %v2071_v50, %v2067_v49 }
0x387d   :  { %v2080_v54 = vmul.f32 %v2078_v51, %v2072_v53  ;;  %v2075_v19 = vmul.f32 %v2072_v53, %v4010_v48 }
0x38db   :  { %v2576_v44 = vpop.permute.xlu0 %2575 }
0x38dc   :  { %v2578_v46 = vmul.f32 %v2576_v44, %v2559_v32 }
0x38de   :  { %2580 = vrot.lane.b32.xlu1 %v2578_v46, %s3505_s0 }
0x38e6   :  { %2082 = vrot.lane.b32.xlu1 %v2080_v54, %s3505_s0 }
0x3950   :  { %v2581_v55 = vpop.permute.xlu1 %2580 }
0x3951   :  { %2583 = vst.msk [vmem:[#allocation3 + $0x28] sm:$0xff] %vm309_vm6, %v2581_v55  ;;  %2918 = vmatmul.msk.f32.vlgmr.msrb.gmra.mxu3 %vm309_vm6, %v2581_v55 }
0x3958   :  { %v2721_v20 = vld [vmem:[#allocation3 + $0x28] sm:$0xff]  ;;  %v2083_v6 = vpop.permute.xlu1 %2082 }
0x3959   :  { %2927 = vmatmul.msk.f32.gmra.mxu1 %vm309_vm6, %v2721_v20  ;;  %v2085_v15 = vadd.f32 %v2083_v6, %v2075_v19 }
0x39d4   :  { %v2604_v60 = vpop.f32.mrf.mxu3 }
0x39d5   :  { %v2607_v61 = vadd.f32 %v2604_v60, %v2173_v57 }
0x39d6   :  { %v2788_v63 = vpop.f32.mrf.mxu1 }
0x39d7   :  { %3193 = vtanh.f32 %v2607_v61  ;;  %v2789_v31 = vadd.f32 %v4033_v2, %v2788_v63  ;;  %v2919_v18 = vmul.f32 -1.442695, %v2607_v61 }
0x39d8   :  { %3195 = vtanh.f32 %v2085_v15 }
0x39d9   :  { %2802 = vst [vmem:[#allocation22 + $0x28] sm:$0xff] %v2789_v31  ;;  %3197 = vpow2.f32 %v2919_v18 }
0x39dd   :  { %v3194_v16 = vpop.eup %3193 }
0x39de   :  { %2630 = vrot.lane.b32.xlu0 %v3194_v16, %s3504_s3  ;;  %v3196_v17 = vpop.eup %3195 }
0x39df   :  { %v3198_v8 = vpop.eup %3197 }
0x39e0   :  { %v2611_v21 = vadd.f32 1.0, %v3198_v8 }
0x39e2   :  { %3199 = vrcp.f32 %v2611_v21  ;;  %v2623_v48 = vand.u32 2147483648, %v2611_v21  ;;  %vm2617_vm3 = vweird.f32 %v2611_v21  ;;  %v2621_v56 = vand.u32 2147483647, %v2611_v21 }
0x39e4   :  { %v2624_v59 = vor.u32 1.1754944e-38, %v2623_v48  ;;  %vm2622_vm5 = vcmp.eq.f32.partialorder %v2621_v56, 8.507059e+37 }
0x39e6   :  { %2088 = vrot.lane.b32.xlu0 %v3196_v17, %s3504_s3 }
0x39e8   :  { %v3200_v22 = vpop.eup %3199 }
0x39e9   :  { %v2613_v11 = vmul.f32 %v3200_v22, %v2611_v21  ;;  %vm2618_vm2 = vweird.f32 %v3200_v22 }
0x39ea   :  { %vm2619_vm4 = vmor %vm2617_vm3, %vm2618_vm2 }
0x39eb   :  { %v2614_v27 = vsub.f32 1.0, %v2613_v11 }
0x39ed   :  { %v2615_v3 = vmul.f32 %v3200_v22, %v2614_v27 }
0x39ef   :  { %v2616_v58 = vadd.f32 %v3200_v22, %v2615_v3 }
0x39f1   :  { %v2620_v7 = vsel %vm2619_vm4, %v3200_v22, %v2616_v58 }
0x39f2   :  { %v2625_v4 = vsel %vm2622_vm5, %v2624_v59, %v2620_v7 }
0x39f3   :  { %v2628_v24 = vmul.f32 %v2625_v4, %v4092_v39 }
0x3a50   :  { %v2631_v12 = vpop.permute.xlu0 %2630 }
0x3a51   :  { %v2633_v23 = vmul.f32 %v2631_v12, %v2625_v4 }
0x3a53   :  { %2635 = vrot.lane.b32.xlu2 %v2633_v23, %s3505_s0 }
0x3a58   :  { %v2089_v5 = vpop.permute.xlu0 %2088 }
0x3a59   :  { %v2091_v13 = vmul.f32 %v2089_v5, %v2072_v53 }
0x3a5b   :  { %2093 = vrot.lane.b32.xlu2 %v2091_v13, %s3505_s0 }
0x3aad   :  { %v2636_v14 = vpop.permute.xlu2 %2635 }
0x3aae   :  { %v2638_v26 = vadd.f32 %v2636_v14, %v2628_v24 }
0x3ab0   :  { %3201 = vtanh.f32 %v2638_v26 }
0x3ab5   :  { %v2094_v28 = vpop.permute.xlu2 %2093 }
0x3ab6   :  { %v3202_v30 = vpop.eup %3201  ;;  %2096 = vst.msk [vmem:[#allocation2 + $0x38] sm:$0xff] %vm309_vm6, %v2094_v28 }
0x3ab7   :  { %2641 = vrot.lane.b32.xlu1 %v3202_v30, %s3504_s3 }
0x3abd   :  { %v2104_v33 = vld [vmem:[#allocation2 + $0x38] sm:$0xff] }
0x3abe   :  { %2906 = vmatmul.msk.f32.gmra.mxu2 %vm309_vm6, %v2104_v33 }
0x3b29   :  { %v2642_v35 = vpop.permute.xlu1 %2641 }
0x3b2a   :  { %v2644_v29 = vmul.f32 %v2642_v35, %v2625_v4 }
0x3b2c   :  { %2646 = vrot.lane.b32.xlu0 %v2644_v29, %s3505_s0 }
0x3b41   :  { %v2175_v36 = vpop.f32.mrf.mxu2 }
0x3b42   :  { %v2176_v37 = vadd.f32 %v3998_v9, %v2175_v36 }
0x3b9e   :  { %v2647_v32 = vpop.permute.xlu0 %2646 }
0x3b9f   :  { %2649 = vst.msk [vmem:[#allocation3 + $0x30] sm:$0xff] %vm309_vm6, %v2647_v32  ;;  %2920 = vmatmul.msk.f32.vlgmr.msra.gmra.mxu0 %vm309_vm6, %v2647_v32 }
0x3ba6   :  { %v2722_v34 = vld [vmem:[#allocation3 + $0x30] sm:$0xff] }
0x3ba7   :  { %2928 = vmatmul.msk.f32.gmra.mxu1 %vm309_vm6, %v2722_v34 }
0x3c1c   :  { %v2670_v38 = vpop.f32.mrf.mxu0 }
0x3c1d   :  { %v2673_v39 = vadd.f32 %v2670_v38, %v2176_v37 }
0x3c1f   :  { %3203 = vtanh.f32 %v2673_v39  ;;  %v2921_v41 = vmul.f32 -1.442695, %v2673_v39 }
0x3c21   :  { %3205 = vpow2.f32 %v2921_v41 }
0x3c24   :  { %v2791_v1 = vpop.f32.mrf.mxu1 }
0x3c25   :  { %v3204_v40 = vpop.eup %3203  ;;  %v2792_v62 = vadd.f32 %v4033_v2, %v2791_v1 }
0x3c26   :  { %2696 = vrot.lane.b32.xlu1 %v3204_v40, %s3504_s3 }
0x3c27   :  { %2803 = vst [vmem:[#allocation22 + $0x30] sm:$0xff] %v2792_v62  ;;  %v3206_v42 = vpop.eup %3205 }
0x3c28   :  { %v2677_v25 = vadd.f32 1.0, %v3206_v42 }
0x3c2a   :  { %3207 = vrcp.f32 %v2677_v25  ;;  %v2689_v46 = vand.u32 2147483648, %v2677_v25  ;;  %vm2683_vm8 = vweird.f32 %v2677_v25  ;;  %v2687_v47 = vand.u32 2147483647, %v2677_v25 }
0x3c2c   :  { %v2690_v49 = vor.u32 1.1754944e-38, %v2689_v46  ;;  %vm2688_vm10 = vcmp.eq.f32.partialorder %v2687_v47, 8.507059e+37 }
0x3c30   :  { %v3208_v0 = vpop.eup %3207 }
0x3c31   :  { %v2679_v43 = vmul.f32 %v3208_v0, %v2677_v25  ;;  %vm2684_vm7 = vweird.f32 %v3208_v0 }
0x3c32   :  { %vm2685_vm9 = vmor %vm2683_vm8, %vm2684_vm7 }
0x3c33   :  { %v2680_v44 = vsub.f32 1.0, %v2679_v43 }
0x3c35   :  { %v2681_v45 = vmul.f32 %v3208_v0, %v2680_v44 }
0x3c37   :  { %v2682_v9 = vadd.f32 %v3208_v0, %v2681_v45 }
0x3c39   :  { %v2686_v10 = vsel %vm2685_vm9, %v3208_v0, %v2682_v9 }
0x3c3a   :  { %v2691_v51 = vsel %vm2688_vm10, %v2690_v49, %v2686_v10 }
0x3c3b   :  { %v2694_v54 = vmul.f32 %v2691_v51, %v2638_v26 }
0x3c98   :  { %v2697_v50 = vpop.permute.xlu1 %2696 }
0x3c99   :  { %v2699_v53 = vmul.f32 %v2697_v50, %v2691_v51 }
0x3c9b   :  { %2701 = vrot.lane.b32.xlu2 %v2699_v53, %s3505_s0 }
0x3cf5   :  { %v2702_v55 = vpop.permute.xlu2 %2701 }
0x3cf6   :  { %v2704_v20 = vadd.f32 %v2702_v55, %v2694_v54 }
0x3cf8   :  { %3209 = vtanh.f32 %v2704_v20 }
0x3cfe   :  { %v3210_v52 = vpop.eup %3209 }
0x3cff   :  { %2707 = vrot.lane.b32.xlu0 %v3210_v52, %s3504_s3 }
0x3d71   :  { %v2708_v57 = vpop.permute.xlu0 %2707 }
0x3d72   :  { %v2710_v60 = vmul.f32 %v2708_v57, %v2691_v51 }
0x3d74   :  { %2712 = vrot.lane.b32.xlu1 %v2710_v60, %s3505_s0 }
0x3de6   :  { %v2713_v61 = vpop.permute.xlu1 %2712 }
0x3de7   :  { %2715 = vst.msk [vmem:[#allocation3 + $0x38] sm:$0xff] %vm309_vm6, %v2713_v61 }
0x3dee   :  { %v2723_v63 = vld [vmem:[#allocation3 + $0x38] sm:$0xff] }
0x3def   :  { %2929 = vmatmul.msk.f32.gmra.mxu1 %vm309_vm6, %v2723_v63 }
0x3e6c   :  { %v2794_v31 = vpop.f32.mrf.mxu1 }
0x3e6d   :  { %v2795_v6 = vadd.f32 %v4033_v2, %v2794_v31 }
0x3e6f   :  { %2804 = vst [vmem:[#allocation22 + $0x38] sm:$0xff] %v2795_v6 }
0x3e70   :  { %2817 = dma.vmem_to_hbm [thread:$0]  %s2810_s5, 1024, %s2812_s24, [#allocation7], %s3492_s26, %s3492_s26, %s3493_s27  }
0x3e71   :  { %3489 = dma.done.wait [#allocation7], 1024  }
0x3e72   :  { %3490 = vsyncadd [#allocation7], 4294966272 }
0x3e73   :  { %2822 = vsyncpa [#allocation6], 1 }
0x3e74   :  { %2823 = vsyncpa [#allocation9], 1 }
0x3e75   :  { %2824 = vsyncpa [#allocation12], 1 }
0x3e76   :  { %2825 = vsyncpa [#allocation15], 1 }
0x3e77   :  { %2826 = vsyncpa [#allocation18], 1 }
0x3e78   :  { %2827 = vsyncpa [#allocation21], 1 }
0x3e79   :  { %2828 = vsyncpa [#allocation7], 1 }

</bundles_post_ra>
